<compile_context>
chip_gen: v5e
topology: v5e:2x2
jax: 0.10.0
libtpu: 0.0.40
codegen_flags: <defaults>
</compile_context>

<pallas_src>
import functools
import math

import jax
import jax.numpy as jnp
from jax import lax
from jax.experimental import pallas as pl
from jax.experimental.pallas import tpu as pltpu


def _round_up(v, m):
    return ((v + m - 1) // m) * m


# ----------------------------------------------------------------------------
# Pallas kernel: one ConvGRU cell step for a block of whole images.
# ----------------------------------------------------------------------------
def convgru_kernel(h_ref, x_ref, w1_ref, w2_ref, bias_ref, out_ref, st_ref,
                   *, H, W, K, ext):
    """ConvGRU step on one lane block of `blk = n_images * H * W` lanes.

    h_ref:    (Ch, blk)   bf16   previous hidden state, feature-major
    x_ref:    (Cin, blk)  bf16   input, feature-major
    w1_ref:   (K*K, 3*Ch, Cpad) bf16  per-tap [update|reset|out(x-only)] weights,
                                      columns ordered [h | x | zero-pad]
    w2_ref:   (K*K, Ch, Ch)     bf16  per-tap out-gate weights for the h*reset conv
    bias_ref: (3*Ch, 1)   f32   [b_update | b_reset | b_out]
    out_ref:  (Ch, blk)   f32   new hidden state
    st_ref:   (Cpad, blk + 2*ext) f32 scratch (interior at [ext, ext+blk))
    """
    pad = K // 2
    Ch, blk = h_ref.shape
    Cin = x_ref.shape[0]
    Cpad = st_ref.shape[0]
    npad = Cpad - Ch - Cin

    # ---- stage stacked [h ; x ; 0-pad] (f32) into the lane-extended scratch --
    # The ext-wide end regions are intentionally left uninitialized: any read
    # landing outside the interior [ext, ext+blk) corresponds to a tap whose
    # source (row+dh, col+dw) is outside the image (flat index < 0 or >= blk),
    # and such lanes are always replaced by 0 via the mask below, so the
    # garbage never reaches the matmul (no redundant zero stores on the narrow
    # vst slot).
    h32 = h_ref[...].astype(jnp.float32)
    x32 = x_ref[...].astype(jnp.float32)
    st_ref[0:Ch, ext:ext + blk] = h32
    if npad > 0:
        x32s = jnp.concatenate([x32, jnp.zeros((npad, blk), jnp.float32)],
                               axis=0)
    else:
        x32s = x32
    st_ref[Ch:Cpad, ext:ext + blk] = x32s

    # ---- in-kernel lane -> (row, col) indices (no HBM mask tensor) -----------
    # col = lane % W, row = (lane // W) % H.  Integer vector div/mod is avoided
    # via an exact float-reciprocal + truncation trick (exact for blk < 2^22).
    lane = lax.broadcasted_iota(jnp.int32, (1, blk), 1)
    lane_f = lane.astype(jnp.float32)
    q1 = ((lane_f + 0.5) * (1.0 / W)).astype(jnp.int32)     # lane // W
    col = lane - q1 * W                                      # lane %  W
    q2 = ((q1.astype(jnp.float32) + 0.5) * (1.0 / H)).astype(jnp.int32)
    row = q1 - q2 * H                                        # (lane // W) % H

    def conv_taps(w_ref3, nrows, acc):
        """acc += sum_{kh,kw} W[kh,kw] @ mask(shift(st[:nrows], dh*W+dw))."""
        # TODO(synk): at production sizes, pad the flattened row stride so W is
        # a multiple of 128; then the dh*W part of each shift is a free aligned
        # offset and only K-1 lane rotations (one per dw != 0) are needed.
        for kh in range(K):
            for kw in range(K):
                dh, dw = kh - pad, kw - pad
                s = dh * W + dw
                src = st_ref[0:nrows, ext + s:ext + s + blk]
                conds = []
                if dh > 0:
                    conds.append(row < (H - dh))
                elif dh < 0:
                    conds.append(row >= -dh)
                if dw > 0:
                    conds.append(col < (W - dw))
                elif dw < 0:
                    conds.append(col >= -dw)
                if conds:
                    m = conds[0]
                    for c in conds[1:]:
                        m = m & c
                    src = jnp.where(m, src, 0.0)
                acc = acc + jnp.dot(w_ref3[kh * K + kw],
                                    src.astype(jnp.bfloat16),
                                    preferred_element_type=jnp.float32)
        return acc

    # ---- gate pre-activations: tap-by-tap bf16 MXU matmuls, f32 accum --------
    gates = conv_taps(w1_ref, Cpad, jnp.zeros((3 * Ch, blk), jnp.float32))
    gates = gates + bias_ref[...]                            # lane-broadcast

    update = jax.nn.sigmoid(gates[0:Ch])                     # (Ch, blk)
    reset = jax.nn.sigmoid(gates[Ch:2 * Ch])                 # (Ch, blk)
    out_x = gates[2 * Ch:3 * Ch]                             # conv_x(x) + b_out

    # ---- out-gate conv over h*reset: reuse the h rows of the scratch ---------
    st_ref[0:Ch, ext:ext + blk] = h32 * reset
    out_pre = conv_taps(w2_ref, Ch, out_x)
    out_inputs = jnp.tanh(out_pre)

    new_state = h32 + update * (out_inputs - h32)
    out_ref[...] = new_state.astype(out_ref.dtype)


# ----------------------------------------------------------------------------
# Weight/bias packing (hoist this out of any per-timestep loop).
# ----------------------------------------------------------------------------
def pack_convgru_params(params, input_size, kernel_size):
    Ch = params["w_update"].shape[0]
    Cin = input_size
    K = kernel_size
    assert K % 2 == 1
    assert params["w_update"].shape[1] == Cin + Ch
    assert Ch % 8 == 0, "hidden_size must be a multiple of 8 (sublane tiling)"
    Cpad = _round_up(Cin + Ch, 8)

    def taps(w):  # (Ch, C, K, K) -> (K*K, Ch, C), tap index t = kh*K + kw
        return jnp.transpose(w, (2, 3, 0, 1)).reshape(K * K, Ch, w.shape[1])

    def gate_block(w, x_only=False):
        wt = taps(w)
        w_x, w_h = wt[:, :, :Cin], wt[:, :, Cin:]
        if x_only:
            w_h = jnp.zeros_like(w_h)
        zpad = jnp.zeros((K * K, Ch, Cpad - Cin - Ch), wt.dtype)
        return jnp.concatenate([w_h, w_x, zpad], axis=2)     # columns [h|x|pad]

    w1 = jnp.concatenate([gate_block(params["w_update"]),
                          gate_block(params["w_reset"]),
                          gate_block(params["w_out"], x_only=True)],
                         axis=1).astype(jnp.bfloat16)         # (K*K, 3Ch, Cpad)
    w2 = taps(params["w_out"][:, Cin:]).astype(jnp.bfloat16)  # (K*K, Ch, Ch)
    bias = jnp.concatenate([params["b_update"], params["b_reset"],
                            params["b_out"]]).reshape(3 * Ch, 1)
    return {"w1": w1, "w2": w2, "bias": bias.astype(jnp.float32),
            "Cin": Cin, "Ch": Ch, "Cpad": Cpad, "K": K}


# ----------------------------------------------------------------------------
# Feature-major single step (keep the recurrent state in this layout).
# ----------------------------------------------------------------------------
def conv_gru_step_fm(x_fm, h_fm, packed, H, W, images_per_block=None,
                     out_dtype=jnp.float32):
    Cin, Ch, Cpad, K = packed["Cin"], packed["Ch"], packed["Cpad"], packed["K"]
    pad = K // 2
    BHW = x_fm.shape[1]
    HW = H * W
    B = BHW // HW
    assert B * HW == BHW

    if images_per_block is None:
        target = max(1, -(-512 // HW))          # aim for >= ~512 lanes / block
        images_per_block = min(B, target)
        while B % images_per_block:
            images_per_block -= 1
    assert B % images_per_block == 0
    blk = images_per_block * HW
    assert blk % 128 == 0, "images_per_block*H*W must be a multiple of 128"
    assert blk < (1 << 22)                      # exactness of the index trick
    grid = (B // images_per_block,)

    ext = _round_up(pad * (W + 1), 128)         # lane extension >= max |shift|
    x_fm = x_fm.astype(jnp.bfloat16)
    h_fm = h_fm.astype(jnp.bfloat16)

    kernel = functools.partial(convgru_kernel, H=H, W=W, K=K, ext=ext)
    return pl.pallas_call(
        kernel,
        out_shape=jax.ShapeDtypeStruct((Ch, BHW), out_dtype),
        grid=grid,
        in_specs=[
            pl.BlockSpec((Ch, blk), lambda b: (0, b)),
            pl.BlockSpec((Cin, blk), lambda b: (0, b)),
            pl.BlockSpec((K * K, 3 * Ch, Cpad), lambda b: (0, 0, 0)),
            pl.BlockSpec((K * K, Ch, Ch), lambda b: (0, 0, 0)),
            pl.BlockSpec((3 * Ch, 1), lambda b: (0, 0)),
        ],
        out_specs=pl.BlockSpec((Ch, blk), lambda b: (0, b)),
        scratch_shapes=[pltpu.VMEM((Cpad, blk + 2 * ext), jnp.float32)],
        compiler_params=pltpu.CompilerParams(
            dimension_semantics=("parallel",)),
    )(h_fm, x_fm, packed["w1"], packed["w2"], packed["bias"])


# ----------------------------------------------------------------------------
# NCHW convenience wrapper (matches the PyTorch module's forward signature).
# ----------------------------------------------------------------------------
def conv_gru_cell(x, prev_state, params, kernel_size, images_per_block=None):
    """x: (B, Cin, H, W). prev_state: (B, Ch, H, W) or None -> zeros."""
    B, Cin, H, W = x.shape
    Ch = params["w_update"].shape[0]
    if prev_state is None:
        prev_state = jnp.zeros((B, Ch, H, W), x.dtype)

    # TODO(synk): for recurrent rollouts, hoist pack_convgru_params() and keep
    # the state feature-major across steps (aliasing it into the output via
    # input_output_aliases) instead of round-tripping NCHW + repacking here.
    packed = pack_convgru_params(params, Cin, kernel_size)

    x_fm = jnp.transpose(x, (1, 0, 2, 3)).reshape(Cin, B * H * W)
    h_fm = jnp.transpose(prev_state, (1, 0, 2, 3)).reshape(Ch, B * H * W)
    out_fm = conv_gru_step_fm(x_fm, h_fm, packed, H, W, images_per_block,
                              out_dtype=x.dtype)
    return jnp.transpose(out_fm.reshape(Ch, B, H, W), (1, 0, 2, 3))


# ----------------------------------------------------------------------------
# Deterministic parameter init (mimics torch.nn.init.orthogonal_ / constant_).
# ----------------------------------------------------------------------------
def orthogonal_init(key, shape):
    rows = shape[0]
    cols = int(math.prod(shape[1:]))
    a = jax.random.normal(key, (max(rows, cols), min(rows, cols)), jnp.float32)
    q, r = jnp.linalg.qr(a)
    q = q * jnp.sign(jnp.diagonal(r))
    if rows < cols:
        q = q.T
    return q[:rows, :cols].reshape(shape)


def make_params(key, input_size, hidden_size, kernel_size):
    k1, k2, k3 = jax.random.split(key, 3)
    wshape = (hidden_size, input_size + hidden_size, kernel_size, kernel_size)
    return {
        "w_update": orthogonal_init(k1, wshape),
        "w_reset": orthogonal_init(k2, wshape),
        "w_out": orthogonal_init(k3, wshape),
        "b_update": jnp.zeros((hidden_size,), jnp.float32),
        "b_reset": jnp.zeros((hidden_size,), jnp.float32),
        "b_out": jnp.zeros((hidden_size,), jnp.float32),
    }


# ----------------------------------------------------------------------------
# Pure-JAX reference (mirrors the PyTorch forward) for correctness checking.
# ----------------------------------------------------------------------------
def ref_conv_gru_cell(x, prev_state, params, kernel_size):
    pad = kernel_size // 2
    if prev_state is None:
        prev_state = jnp.zeros((x.shape[0], params["w_update"].shape[0],
                                x.shape[2], x.shape[3]), x.dtype)

    def conv(inp, w, b):
        out = lax.conv_general_dilated(
            inp, w, window_strides=(1, 1),
            padding=[(pad, pad), (pad, pad)],
            dimension_numbers=("NCHW", "OIHW", "NCHW"))
        return out + b[None, :, None, None]

    stacked = jnp.concatenate([x, prev_state], axis=1)
    update = jax.nn.sigmoid(conv(stacked, params["w_update"], params["b_update"]))
    reset = jax.nn.sigmoid(conv(stacked, params["w_reset"], params["b_reset"]))
    out_inputs = jnp.tanh(conv(jnp.concatenate([x, prev_state * reset], axis=1),
                               params["w_out"], params["b_out"]))
    return prev_state * (1.0 - update) + out_inputs * update


if __name__ == "__main__":
    B, Cin, Ch, H, W, K = 2, 4, 8, 16, 16, 3

    key = jax.random.PRNGKey(0)
    kx, kh, kp = jax.random.split(key, 3)
    x = jax.random.normal(kx, (B, Cin, H, W), jnp.float32)
    h0 = jax.random.normal(kh, (B, Ch, H, W), jnp.float32)
    params = make_params(kp, Cin, Ch, K)

    # Case 1: prev_state=None (module zero-inits), default block -> grid=(1,).
    out_none = jax.block_until_ready(conv_gru_cell(x, None, params, K))
    ref_none = ref_conv_gru_cell(x, None, params, K)

    # Case 2: explicit prev_state, one image per block -> grid=(2,) exercising
    # the "parallel" batch grid (shards across two TensorCores on v7x).
    out_h = jax.block_until_ready(
        conv_gru_cell(x, h0, params, K, images_per_block=1))
    ref_h = ref_conv_gru_cell(x, h0, params, K)

    assert out_none.shape == (B, Ch, H, W) and out_h.shape == (B, Ch, H, W)
    # bf16 matmul operands + bf16 input shipping -> loosened tolerances.
    assert jnp.allclose(out_none, ref_none, rtol=3e-2, atol=3e-2), float(
        jnp.max(jnp.abs(out_none - ref_none)))
    assert jnp.allclose(out_h, ref_h, rtol=3e-2, atol=3e-2), float(
        jnp.max(jnp.abs(out_h - ref_h)))

    print("KERNEL_OK")
</pallas_src>

<mosaic_0001>
module attributes {stable_mosaic.version = 11 : i64} {
  func.func @convgru_kernel(%arg0: i32, %arg1: memref<8x512xbf16, #tpu.memory_space<vmem>>, %arg2: memref<4x512xbf16, #tpu.memory_space<vmem>>, %arg3: memref<9x24x16xbf16, #tpu.memory_space<vmem>>, %arg4: memref<9x8x8xbf16, #tpu.memory_space<vmem>>, %arg5: memref<24x1xf32, #tpu.memory_space<vmem>>, %arg6: memref<8x512xf32, #tpu.memory_space<vmem>>, %arg7: memref<16x768xf32, #tpu.memory_space<vmem>>) attributes {dimension_semantics = [#tpu.dimension_semantics<parallel>], iteration_bounds = array<i64: 1>, scalar_prefetch = 0 : i64, scratch_operands = 1 : i64, tpu.core_type = #tpu.core_type<tc>, window_params = [{transform_indices = @transform_0, window_bounds = array<i64: 8, 512>}, {transform_indices = @transform_1, window_bounds = array<i64: 4, 512>}, {pipeline_mode = #tpu.pipeline_mode<synchronous>, transform_indices = @transform_2, window_bounds = array<i64: 9, 24, 16>}, {pipeline_mode = #tpu.pipeline_mode<synchronous>, transform_indices = @transform_3, window_bounds = array<i64: 9, 8, 8>}, {pipeline_mode = #tpu.pipeline_mode<synchronous>, transform_indices = @transform_4, window_bounds = array<i64: 24, 1>}, {transform_indices = @transform_5, window_bounds = array<i64: 8, 512>}]} {
    %c0 = arith.constant 0 : index
    %c0_0 = arith.constant 0 : index
    %0 = vector.load %arg1[%c0, %c0_0] : memref<8x512xbf16, #tpu.memory_space<vmem>>, vector<8x512xbf16>
    %1 = arith.extf %0 : vector<8x512xbf16> to vector<8x512xf32>
    %c0_1 = arith.constant 0 : index
    %c0_2 = arith.constant 0 : index
    %2 = vector.load %arg2[%c0_1, %c0_2] : memref<4x512xbf16, #tpu.memory_space<vmem>>, vector<4x512xbf16>
    %3 = arith.extf %2 : vector<4x512xbf16> to vector<4x512xf32>
    %c0_3 = arith.constant 0 : index
    %c128 = arith.constant 128 : index
    %4 = vector.load %arg7[%c0_3, %c128] : memref<16x768xf32, #tpu.memory_space<vmem>>, vector<8x512xf32>
    tpu.vector_store %arg7[%c0_3, %c128], %1 {strides = array<i32>} : memref<16x768xf32, #tpu.memory_space<vmem>>, vector<8x512xf32>,
    %cst = arith.constant 0.000000e+00 : f32
    %5 = vector.broadcast %cst : f32 to vector<4x512xf32>
    %6 = tpu.concatenate %3, %5 in 0 : vector<4x512xf32>, vector<4x512xf32> -> vector<8x512xf32>
    %c8 = arith.constant 8 : index
    %c128_4 = arith.constant 128 : index
    %7 = vector.load %arg7[%c8, %c128_4] : memref<16x768xf32, #tpu.memory_space<vmem>>, vector<8x512xf32>
    tpu.vector_store %arg7[%c8, %c128_4], %6 {strides = array<i32>} : memref<16x768xf32, #tpu.memory_space<vmem>>, vector<8x512xf32>,
    %8 = tpu.iota {dimensions = array<i32: 1>} : vector<1x512xi32>
    %9 = arith.sitofp %8 : vector<1x512xi32> to vector<1x512xf32>
    %cst_5 = arith.constant 5.000000e-01 : f32
    %10 = vector.broadcast %cst_5 : f32 to vector<1x512xf32>
    %11 = arith.addf %9, %10 : vector<1x512xf32>
    %cst_6 = arith.constant 6.250000e-02 : f32
    %12 = vector.broadcast %cst_6 : f32 to vector<1x512xf32>
    %13 = arith.mulf %11, %12 : vector<1x512xf32>
    %14 = arith.fptosi %13 : vector<1x512xf32> to vector<1x512xi32>
    %c16_i32 = arith.constant 16 : i32
    %15 = vector.broadcast %c16_i32 : i32 to vector<1x512xi32>
    %16 = arith.muli %14, %15 : vector<1x512xi32>
    %17 = arith.subi %8, %16 : vector<1x512xi32>
    %18 = arith.sitofp %14 : vector<1x512xi32> to vector<1x512xf32>
    %cst_7 = arith.constant 5.000000e-01 : f32
    %19 = vector.broadcast %cst_7 : f32 to vector<1x512xf32>
    %20 = arith.addf %18, %19 : vector<1x512xf32>
    %cst_8 = arith.constant 6.250000e-02 : f32
    %21 = vector.broadcast %cst_8 : f32 to vector<1x512xf32>
    %22 = arith.mulf %20, %21 : vector<1x512xf32>
    %23 = arith.fptosi %22 : vector<1x512xf32> to vector<1x512xi32>
    %c16_i32_9 = arith.constant 16 : i32
    %24 = vector.broadcast %c16_i32_9 : i32 to vector<1x512xi32>
    %25 = arith.muli %23, %24 : vector<1x512xi32>
    %26 = arith.subi %14, %25 : vector<1x512xi32>
    %cst_10 = arith.constant 0.000000e+00 : f32
    %27 = vector.broadcast %cst_10 : f32 to vector<24x512xf32>
    %c0_11 = arith.constant 0 : index
    %c111 = arith.constant 111 : index
    %28 = vector.load %arg7[%c0_11, %c111] : memref<16x768xf32, #tpu.memory_space<vmem>>, vector<16x512xf32>
    %c1_i32 = arith.constant 1 : i32
    %29 = vector.broadcast %c1_i32 : i32 to vector<1x512xi32>
    %30 = arith.cmpi sge, %26, %29 : vector<1x512xi32>
    %c1_i32_12 = arith.constant 1 : i32
    %31 = vector.broadcast %c1_i32_12 : i32 to vector<1x512xi32>
    %32 = arith.cmpi sge, %17, %31 : vector<1x512xi32>
    %33 = arith.andi %30, %32 : vector<1x512xi1>
    %cst_13 = arith.constant 0.000000e+00 : f32
    %34 = vector.shape_cast %33 : vector<1x512xi1> to vector<1x512xi1>
    %35 = vector.broadcast %34 : vector<1x512xi1> to vector<16x512xi1>
    %36 = vector.broadcast %cst_13 : f32 to vector<16x512xf32>
    %37 = arith.select %35, %28, %36 : vector<16x512xi1>, vector<16x512xf32>
    %c0_14 = arith.constant 0 : index
    %c0_15 = arith.constant 0 : index
    %c0_16 = arith.constant 0 : index
    %38 = vector.load %arg3[%c0_14, %c0_15, %c0_16] : memref<9x24x16xbf16, #tpu.memory_space<vmem>>, vector<1x24x16xbf16>
    %39 = vector.shape_cast %38 : vector<1x24x16xbf16> to vector<24x16xbf16>
    %40 = arith.truncf %37 : vector<16x512xf32> to vector<16x512xbf16>
    %cst_17 = arith.constant dense<0.000000e+00> : vector<24x512xf32>
    %41 = tpu.matmul %39, %40, %cst_17 {dimension_numbers = #tpu.dot_dimension_numbers<[1], [0], [0], [1], [0, 0, 1, 1], [], []>} : vector<24x16xbf16>, vector<16x512xbf16>, vector<24x512xf32> -> vector<24x512xf32>
    %42 = arith.addf %27, %41 : vector<24x512xf32>
    %c0_18 = arith.constant 0 : index
    %c112 = arith.constant 112 : index
    %43 = vector.load %arg7[%c0_18, %c112] : memref<16x768xf32, #tpu.memory_space<vmem>>, vector<16x512xf32>
    %c1_i32_19 = arith.constant 1 : i32
    %44 = vector.broadcast %c1_i32_19 : i32 to vector<1x512xi32>
    %45 = arith.cmpi sge, %26, %44 : vector<1x512xi32>
    %cst_20 = arith.constant 0.000000e+00 : f32
    %46 = vector.shape_cast %45 : vector<1x512xi1> to vector<1x512xi1>
    %47 = vector.broadcast %46 : vector<1x512xi1> to vector<16x512xi1>
    %48 = vector.broadcast %cst_20 : f32 to vector<16x512xf32>
    %49 = arith.select %47, %43, %48 : vector<16x512xi1>, vector<16x512xf32>
    %c1 = arith.constant 1 : index
    %c0_21 = arith.constant 0 : index
    %c0_22 = arith.constant 0 : index
    %50 = vector.load %arg3[%c1, %c0_21, %c0_22] : memref<9x24x16xbf16, #tpu.memory_space<vmem>>, vector<1x24x16xbf16>
    %51 = vector.shape_cast %50 : vector<1x24x16xbf16> to vector<24x16xbf16>
    %52 = arith.truncf %49 : vector<16x512xf32> to vector<16x512xbf16>
    %cst_23 = arith.constant dense<0.000000e+00> : vector<24x512xf32>
    %53 = tpu.matmul %51, %52, %cst_23 {dimension_numbers = #tpu.dot_dimension_numbers<[1], [0], [0], [1], [0, 0, 1, 1], [], []>} : vector<24x16xbf16>, vector<16x512xbf16>, vector<24x512xf32> -> vector<24x512xf32>
    %54 = arith.addf %42, %53 : vector<24x512xf32>
    %c0_24 = arith.constant 0 : index
    %c113 = arith.constant 113 : index
    %55 = vector.load %arg7[%c0_24, %c113] : memref<16x768xf32, #tpu.memory_space<vmem>>, vector<16x512xf32>
    %c1_i32_25 = arith.constant 1 : i32
    %56 = vector.broadcast %c1_i32_25 : i32 to vector<1x512xi32>
    %57 = arith.cmpi sge, %26, %56 : vector<1x512xi32>
    %c15_i32 = arith.constant 15 : i32
    %58 = vector.broadcast %c15_i32 : i32 to vector<1x512xi32>
    %59 = arith.cmpi slt, %17, %58 : vector<1x512xi32>
    %60 = arith.andi %57, %59 : vector<1x512xi1>
    %cst_26 = arith.constant 0.000000e+00 : f32
    %61 = vector.shape_cast %60 : vector<1x512xi1> to vector<1x512xi1>
    %62 = vector.broadcast %61 : vector<1x512xi1> to vector<16x512xi1>
    %63 = vector.broadcast %cst_26 : f32 to vector<16x512xf32>
    %64 = arith.select %62, %55, %63 : vector<16x512xi1>, vector<16x512xf32>
    %c2 = arith.constant 2 : index
    %c0_27 = arith.constant 0 : index
    %c0_28 = arith.constant 0 : index
    %65 = vector.load %arg3[%c2, %c0_27, %c0_28] : memref<9x24x16xbf16, #tpu.memory_space<vmem>>, vector<1x24x16xbf16>
    %66 = vector.shape_cast %65 : vector<1x24x16xbf16> to vector<24x16xbf16>
    %67 = arith.truncf %64 : vector<16x512xf32> to vector<16x512xbf16>
    %cst_29 = arith.constant dense<0.000000e+00> : vector<24x512xf32>
    %68 = tpu.matmul %66, %67, %cst_29 {dimension_numbers = #tpu.dot_dimension_numbers<[1], [0], [0], [1], [0, 0, 1, 1], [], []>} : vector<24x16xbf16>, vector<16x512xbf16>, vector<24x512xf32> -> vector<24x512xf32>
    %69 = arith.addf %54, %68 : vector<24x512xf32>
    %c0_30 = arith.constant 0 : index
    %c127 = arith.constant 127 : index
    %70 = vector.load %arg7[%c0_30, %c127] : memref<16x768xf32, #tpu.memory_space<vmem>>, vector<16x512xf32>
    %c1_i32_31 = arith.constant 1 : i32
    %71 = vector.broadcast %c1_i32_31 : i32 to vector<1x512xi32>
    %72 = arith.cmpi sge, %17, %71 : vector<1x512xi32>
    %cst_32 = arith.constant 0.000000e+00 : f32
    %73 = vector.shape_cast %72 : vector<1x512xi1> to vector<1x512xi1>
    %74 = vector.broadcast %73 : vector<1x512xi1> to vector<16x512xi1>
    %75 = vector.broadcast %cst_32 : f32 to vector<16x512xf32>
    %76 = arith.select %74, %70, %75 : vector<16x512xi1>, vector<16x512xf32>
    %c3 = arith.constant 3 : index
    %c0_33 = arith.constant 0 : index
    %c0_34 = arith.constant 0 : index
    %77 = vector.load %arg3[%c3, %c0_33, %c0_34] : memref<9x24x16xbf16, #tpu.memory_space<vmem>>, vector<1x24x16xbf16>
    %78 = vector.shape_cast %77 : vector<1x24x16xbf16> to vector<24x16xbf16>
    %79 = arith.truncf %76 : vector<16x512xf32> to vector<16x512xbf16>
    %cst_35 = arith.constant dense<0.000000e+00> : vector<24x512xf32>
    %80 = tpu.matmul %78, %79, %cst_35 {dimension_numbers = #tpu.dot_dimension_numbers<[1], [0], [0], [1], [0, 0, 1, 1], [], []>} : vector<24x16xbf16>, vector<16x512xbf16>, vector<24x512xf32> -> vector<24x512xf32>
    %81 = arith.addf %69, %80 : vector<24x512xf32>
    %c0_36 = arith.constant 0 : index
    %c128_37 = arith.constant 128 : index
    %82 = vector.load %arg7[%c0_36, %c128_37] : memref<16x768xf32, #tpu.memory_space<vmem>>, vector<16x512xf32>
    %c4 = arith.constant 4 : index
    %c0_38 = arith.constant 0 : index
    %c0_39 = arith.constant 0 : index
    %83 = vector.load %arg3[%c4, %c0_38, %c0_39] : memref<9x24x16xbf16, #tpu.memory_space<vmem>>, vector<1x24x16xbf16>
    %84 = vector.shape_cast %83 : vector<1x24x16xbf16> to vector<24x16xbf16>
    %85 = arith.truncf %82 : vector<16x512xf32> to vector<16x512xbf16>
    %cst_40 = arith.constant dense<0.000000e+00> : vector<24x512xf32>
    %86 = tpu.matmul %84, %85, %cst_40 {dimension_numbers = #tpu.dot_dimension_numbers<[1], [0], [0], [1], [0, 0, 1, 1], [], []>} : vector<24x16xbf16>, vector<16x512xbf16>, vector<24x512xf32> -> vector<24x512xf32>
    %87 = arith.addf %81, %86 : vector<24x512xf32>
    %c0_41 = arith.constant 0 : index
    %c129 = arith.constant 129 : index
    %88 = vector.load %arg7[%c0_41, %c129] : memref<16x768xf32, #tpu.memory_space<vmem>>, vector<16x512xf32>
    %c15_i32_42 = arith.constant 15 : i32
    %89 = vector.broadcast %c15_i32_42 : i32 to vector<1x512xi32>
    %90 = arith.cmpi slt, %17, %89 : vector<1x512xi32>
    %cst_43 = arith.constant 0.000000e+00 : f32
    %91 = vector.shape_cast %90 : vector<1x512xi1> to vector<1x512xi1>
    %92 = vector.broadcast %91 : vector<1x512xi1> to vector<16x512xi1>
    %93 = vector.broadcast %cst_43 : f32 to vector<16x512xf32>
    %94 = arith.select %92, %88, %93 : vector<16x512xi1>, vector<16x512xf32>
    %c5 = arith.constant 5 : index
    %c0_44 = arith.constant 0 : index
    %c0_45 = arith.constant 0 : index
    %95 = vector.load %arg3[%c5, %c0_44, %c0_45] : memref<9x24x16xbf16, #tpu.memory_space<vmem>>, vector<1x24x16xbf16>
    %96 = vector.shape_cast %95 : vector<1x24x16xbf16> to vector<24x16xbf16>
    %97 = arith.truncf %94 : vector<16x512xf32> to vector<16x512xbf16>
    %cst_46 = arith.constant dense<0.000000e+00> : vector<24x512xf32>
    %98 = tpu.matmul %96, %97, %cst_46 {dimension_numbers = #tpu.dot_dimension_numbers<[1], [0], [0], [1], [0, 0, 1, 1], [], []>} : vector<24x16xbf16>, vector<16x512xbf16>, vector<24x512xf32> -> vector<24x512xf32>
    %99 = arith.addf %87, %98 : vector<24x512xf32>
    %c0_47 = arith.constant 0 : index
    %c143 = arith.constant 143 : index
    %100 = vector.load %arg7[%c0_47, %c143] : memref<16x768xf32, #tpu.memory_space<vmem>>, vector<16x512xf32>
    %c15_i32_48 = arith.constant 15 : i32
    %101 = vector.broadcast %c15_i32_48 : i32 to vector<1x512xi32>
    %102 = arith.cmpi slt, %26, %101 : vector<1x512xi32>
    %c1_i32_49 = arith.constant 1 : i32
    %103 = vector.broadcast %c1_i32_49 : i32 to vector<1x512xi32>
    %104 = arith.cmpi sge, %17, %103 : vector<1x512xi32>
    %105 = arith.andi %102, %104 : vector<1x512xi1>
    %cst_50 = arith.constant 0.000000e+00 : f32
    %106 = vector.shape_cast %105 : vector<1x512xi1> to vector<1x512xi1>
    %107 = vector.broadcast %106 : vector<1x512xi1> to vector<16x512xi1>
    %108 = vector.broadcast %cst_50 : f32 to vector<16x512xf32>
    %109 = arith.select %107, %100, %108 : vector<16x512xi1>, vector<16x512xf32>
    %c6 = arith.constant 6 : index
    %c0_51 = arith.constant 0 : index
    %c0_52 = arith.constant 0 : index
    %110 = vector.load %arg3[%c6, %c0_51, %c0_52] : memref<9x24x16xbf16, #tpu.memory_space<vmem>>, vector<1x24x16xbf16>
    %111 = vector.shape_cast %110 : vector<1x24x16xbf16> to vector<24x16xbf16>
    %112 = arith.truncf %109 : vector<16x512xf32> to vector<16x512xbf16>
    %cst_53 = arith.constant dense<0.000000e+00> : vector<24x512xf32>
    %113 = tpu.matmul %111, %112, %cst_53 {dimension_numbers = #tpu.dot_dimension_numbers<[1], [0], [0], [1], [0, 0, 1, 1], [], []>} : vector<24x16xbf16>, vector<16x512xbf16>, vector<24x512xf32> -> vector<24x512xf32>
    %114 = arith.addf %99, %113 : vector<24x512xf32>
    %c0_54 = arith.constant 0 : index
    %c144 = arith.constant 144 : index
    %115 = vector.load %arg7[%c0_54, %c144] : memref<16x768xf32, #tpu.memory_space<vmem>>, vector<16x512xf32>
    %c15_i32_55 = arith.constant 15 : i32
    %116 = vector.broadcast %c15_i32_55 : i32 to vector<1x512xi32>
    %117 = arith.cmpi slt, %26, %116 : vector<1x512xi32>
    %cst_56 = arith.constant 0.000000e+00 : f32
    %118 = vector.shape_cast %117 : vector<1x512xi1> to vector<1x512xi1>
    %119 = vector.broadcast %118 : vector<1x512xi1> to vector<16x512xi1>
    %120 = vector.broadcast %cst_56 : f32 to vector<16x512xf32>
    %121 = arith.select %119, %115, %120 : vector<16x512xi1>, vector<16x512xf32>
    %c7 = arith.constant 7 : index
    %c0_57 = arith.constant 0 : index
    %c0_58 = arith.constant 0 : index
    %122 = vector.load %arg3[%c7, %c0_57, %c0_58] : memref<9x24x16xbf16, #tpu.memory_space<vmem>>, vector<1x24x16xbf16>
    %123 = vector.shape_cast %122 : vector<1x24x16xbf16> to vector<24x16xbf16>
    %124 = arith.truncf %121 : vector<16x512xf32> to vector<16x512xbf16>
    %cst_59 = arith.constant dense<0.000000e+00> : vector<24x512xf32>
    %125 = tpu.matmul %123, %124, %cst_59 {dimension_numbers = #tpu.dot_dimension_numbers<[1], [0], [0], [1], [0, 0, 1, 1], [], []>} : vector<24x16xbf16>, vector<16x512xbf16>, vector<24x512xf32> -> vector<24x512xf32>
    %126 = arith.addf %114, %125 : vector<24x512xf32>
    %c0_60 = arith.constant 0 : index
    %c145 = arith.constant 145 : index
    %127 = vector.load %arg7[%c0_60, %c145] : memref<16x768xf32, #tpu.memory_space<vmem>>, vector<16x512xf32>
    %c15_i32_61 = arith.constant 15 : i32
    %128 = vector.broadcast %c15_i32_61 : i32 to vector<1x512xi32>
    %129 = arith.cmpi slt, %26, %128 : vector<1x512xi32>
    %c15_i32_62 = arith.constant 15 : i32
    %130 = vector.broadcast %c15_i32_62 : i32 to vector<1x512xi32>
    %131 = arith.cmpi slt, %17, %130 : vector<1x512xi32>
    %132 = arith.andi %129, %131 : vector<1x512xi1>
    %cst_63 = arith.constant 0.000000e+00 : f32
    %133 = vector.shape_cast %132 : vector<1x512xi1> to vector<1x512xi1>
    %134 = vector.broadcast %133 : vector<1x512xi1> to vector<16x512xi1>
    %135 = vector.broadcast %cst_63 : f32 to vector<16x512xf32>
    %136 = arith.select %134, %127, %135 : vector<16x512xi1>, vector<16x512xf32>
    %c8_64 = arith.constant 8 : index
    %c0_65 = arith.constant 0 : index
    %c0_66 = arith.constant 0 : index
    %137 = vector.load %arg3[%c8_64, %c0_65, %c0_66] : memref<9x24x16xbf16, #tpu.memory_space<vmem>>, vector<1x24x16xbf16>
    %138 = vector.shape_cast %137 : vector<1x24x16xbf16> to vector<24x16xbf16>
    %139 = arith.truncf %136 : vector<16x512xf32> to vector<16x512xbf16>
    %cst_67 = arith.constant dense<0.000000e+00> : vector<24x512xf32>
    %140 = tpu.matmul %138, %139, %cst_67 {dimension_numbers = #tpu.dot_dimension_numbers<[1], [0], [0], [1], [0, 0, 1, 1], [], []>} : vector<24x16xbf16>, vector<16x512xbf16>, vector<24x512xf32> -> vector<24x512xf32>
    %141 = arith.addf %126, %140 : vector<24x512xf32>
    %c0_68 = arith.constant 0 : index
    %c0_69 = arith.constant 0 : index
    %142 = vector.load %arg5[%c0_68, %c0_69] : memref<24x1xf32, #tpu.memory_space<vmem>>, vector<24x1xf32>
    %143 = vector.broadcast %142 : vector<24x1xf32> to vector<24x512xf32>
    %144 = arith.addf %141, %143 : vector<24x512xf32>
    %145 = vector.extract_strided_slice %144 {offsets = [0, 0], sizes = [8, 512], strides = [1, 1]} : vector<24x512xf32> to vector<8x512xf32>
    %146 = arith.negf %145 : vector<8x512xf32>
    %147 = math.exp %146 : vector<8x512xf32>
    %cst_70 = arith.constant 1.000000e+00 : f32
    %148 = vector.broadcast %cst_70 : f32 to vector<8x512xf32>
    %149 = arith.addf %148, %147 : vector<8x512xf32>
    %150 = arith.divf %148, %149 : vector<8x512xf32>
    %151 = vector.extract_strided_slice %144 {offsets = [8, 0], sizes = [8, 512], strides = [1, 1]} : vector<24x512xf32> to vector<8x512xf32>
    %152 = arith.negf %151 : vector<8x512xf32>
    %153 = math.exp %152 : vector<8x512xf32>
    %cst_71 = arith.constant 1.000000e+00 : f32
    %154 = vector.broadcast %cst_71 : f32 to vector<8x512xf32>
    %155 = arith.addf %154, %153 : vector<8x512xf32>
    %156 = arith.divf %154, %155 : vector<8x512xf32>
    %157 = vector.extract_strided_slice %144 {offsets = [16, 0], sizes = [8, 512], strides = [1, 1]} : vector<24x512xf32> to vector<8x512xf32>
    %158 = arith.mulf %1, %156 : vector<8x512xf32>
    %c0_72 = arith.constant 0 : index
    %c128_73 = arith.constant 128 : index
    %159 = vector.load %arg7[%c0_72, %c128_73] : memref<16x768xf32, #tpu.memory_space<vmem>>, vector<8x512xf32>
    tpu.vector_store %arg7[%c0_72, %c128_73], %158 {strides = array<i32>} : memref<16x768xf32, #tpu.memory_space<vmem>>, vector<8x512xf32>,
    %c0_74 = arith.constant 0 : index
    %c111_75 = arith.constant 111 : index
    %160 = vector.load %arg7[%c0_74, %c111_75] : memref<16x768xf32, #tpu.memory_space<vmem>>, vector<8x512xf32>
    %c1_i32_76 = arith.constant 1 : i32
    %161 = vector.broadcast %c1_i32_76 : i32 to vector<1x512xi32>
    %162 = arith.cmpi sge, %26, %161 : vector<1x512xi32>
    %c1_i32_77 = arith.constant 1 : i32
    %163 = vector.broadcast %c1_i32_77 : i32 to vector<1x512xi32>
    %164 = arith.cmpi sge, %17, %163 : vector<1x512xi32>
    %165 = arith.andi %162, %164 : vector<1x512xi1>
    %cst_78 = arith.constant 0.000000e+00 : f32
    %166 = vector.shape_cast %165 : vector<1x512xi1> to vector<1x512xi1>
    %167 = vector.broadcast %166 : vector<1x512xi1> to vector<8x512xi1>
    %168 = vector.broadcast %cst_78 : f32 to vector<8x512xf32>
    %169 = arith.select %167, %160, %168 : vector<8x512xi1>, vector<8x512xf32>
    %c0_79 = arith.constant 0 : index
    %c0_80 = arith.constant 0 : index
    %c0_81 = arith.constant 0 : index
    %170 = vector.load %arg4[%c0_79, %c0_80, %c0_81] : memref<9x8x8xbf16, #tpu.memory_space<vmem>>, vector<1x8x8xbf16>
    %171 = vector.shape_cast %170 : vector<1x8x8xbf16> to vector<8x8xbf16>
    %172 = arith.truncf %169 : vector<8x512xf32> to vector<8x512xbf16>
    %cst_82 = arith.constant dense<0.000000e+00> : vector<8x512xf32>
    %173 = tpu.matmul %171, %172, %cst_82 {dimension_numbers = #tpu.dot_dimension_numbers<[1], [0], [0], [1], [0, 0, 1, 1], [], []>} : vector<8x8xbf16>, vector<8x512xbf16>, vector<8x512xf32> -> vector<8x512xf32>
    %174 = arith.addf %157, %173 : vector<8x512xf32>
    %c0_83 = arith.constant 0 : index
    %c112_84 = arith.constant 112 : index
    %175 = vector.load %arg7[%c0_83, %c112_84] : memref<16x768xf32, #tpu.memory_space<vmem>>, vector<8x512xf32>
    %c1_i32_85 = arith.constant 1 : i32
    %176 = vector.broadcast %c1_i32_85 : i32 to vector<1x512xi32>
    %177 = arith.cmpi sge, %26, %176 : vector<1x512xi32>
    %cst_86 = arith.constant 0.000000e+00 : f32
    %178 = vector.shape_cast %177 : vector<1x512xi1> to vector<1x512xi1>
    %179 = vector.broadcast %178 : vector<1x512xi1> to vector<8x512xi1>
    %180 = vector.broadcast %cst_86 : f32 to vector<8x512xf32>
    %181 = arith.select %179, %175, %180 : vector<8x512xi1>, vector<8x512xf32>
    %c1_87 = arith.constant 1 : index
    %c0_88 = arith.constant 0 : index
    %c0_89 = arith.constant 0 : index
    %182 = vector.load %arg4[%c1_87, %c0_88, %c0_89] : memref<9x8x8xbf16, #tpu.memory_space<vmem>>, vector<1x8x8xbf16>
    %183 = vector.shape_cast %182 : vector<1x8x8xbf16> to vector<8x8xbf16>
    %184 = arith.truncf %181 : vector<8x512xf32> to vector<8x512xbf16>
    %cst_90 = arith.constant dense<0.000000e+00> : vector<8x512xf32>
    %185 = tpu.matmul %183, %184, %cst_90 {dimension_numbers = #tpu.dot_dimension_numbers<[1], [0], [0], [1], [0, 0, 1, 1], [], []>} : vector<8x8xbf16>, vector<8x512xbf16>, vector<8x512xf32> -> vector<8x512xf32>
    %186 = arith.addf %174, %185 : vector<8x512xf32>
    %c0_91 = arith.constant 0 : index
    %c113_92 = arith.constant 113 : index
    %187 = vector.load %arg7[%c0_91, %c113_92] : memref<16x768xf32, #tpu.memory_space<vmem>>, vector<8x512xf32>
    %c1_i32_93 = arith.constant 1 : i32
    %188 = vector.broadcast %c1_i32_93 : i32 to vector<1x512xi32>
    %189 = arith.cmpi sge, %26, %188 : vector<1x512xi32>
    %c15_i32_94 = arith.constant 15 : i32
    %190 = vector.broadcast %c15_i32_94 : i32 to vector<1x512xi32>
    %191 = arith.cmpi slt, %17, %190 : vector<1x512xi32>
    %192 = arith.andi %189, %191 : vector<1x512xi1>
    %cst_95 = arith.constant 0.000000e+00 : f32
    %193 = vector.shape_cast %192 : vector<1x512xi1> to vector<1x512xi1>
    %194 = vector.broadcast %193 : vector<1x512xi1> to vector<8x512xi1>
    %195 = vector.broadcast %cst_95 : f32 to vector<8x512xf32>
    %196 = arith.select %194, %187, %195 : vector<8x512xi1>, vector<8x512xf32>
    %c2_96 = arith.constant 2 : index
    %c0_97 = arith.constant 0 : index
    %c0_98 = arith.constant 0 : index
    %197 = vector.load %arg4[%c2_96, %c0_97, %c0_98] : memref<9x8x8xbf16, #tpu.memory_space<vmem>>, vector<1x8x8xbf16>
    %198 = vector.shape_cast %197 : vector<1x8x8xbf16> to vector<8x8xbf16>
    %199 = arith.truncf %196 : vector<8x512xf32> to vector<8x512xbf16>
    %cst_99 = arith.constant dense<0.000000e+00> : vector<8x512xf32>
    %200 = tpu.matmul %198, %199, %cst_99 {dimension_numbers = #tpu.dot_dimension_numbers<[1], [0], [0], [1], [0, 0, 1, 1], [], []>} : vector<8x8xbf16>, vector<8x512xbf16>, vector<8x512xf32> -> vector<8x512xf32>
    %201 = arith.addf %186, %200 : vector<8x512xf32>
    %c0_100 = arith.constant 0 : index
    %c127_101 = arith.constant 127 : index
    %202 = vector.load %arg7[%c0_100, %c127_101] : memref<16x768xf32, #tpu.memory_space<vmem>>, vector<8x512xf32>
    %c1_i32_102 = arith.constant 1 : i32
    %203 = vector.broadcast %c1_i32_102 : i32 to vector<1x512xi32>
    %204 = arith.cmpi sge, %17, %203 : vector<1x512xi32>
    %cst_103 = arith.constant 0.000000e+00 : f32
    %205 = vector.shape_cast %204 : vector<1x512xi1> to vector<1x512xi1>
    %206 = vector.broadcast %205 : vector<1x512xi1> to vector<8x512xi1>
    %207 = vector.broadcast %cst_103 : f32 to vector<8x512xf32>
    %208 = arith.select %206, %202, %207 : vector<8x512xi1>, vector<8x512xf32>
    %c3_104 = arith.constant 3 : index
    %c0_105 = arith.constant 0 : index
    %c0_106 = arith.constant 0 : index
    %209 = vector.load %arg4[%c3_104, %c0_105, %c0_106] : memref<9x8x8xbf16, #tpu.memory_space<vmem>>, vector<1x8x8xbf16>
    %210 = vector.shape_cast %209 : vector<1x8x8xbf16> to vector<8x8xbf16>
    %211 = arith.truncf %208 : vector<8x512xf32> to vector<8x512xbf16>
    %cst_107 = arith.constant dense<0.000000e+00> : vector<8x512xf32>
    %212 = tpu.matmul %210, %211, %cst_107 {dimension_numbers = #tpu.dot_dimension_numbers<[1], [0], [0], [1], [0, 0, 1, 1], [], []>} : vector<8x8xbf16>, vector<8x512xbf16>, vector<8x512xf32> -> vector<8x512xf32>
    %213 = arith.addf %201, %212 : vector<8x512xf32>
    %c0_108 = arith.constant 0 : index
    %c128_109 = arith.constant 128 : index
    %214 = vector.load %arg7[%c0_108, %c128_109] : memref<16x768xf32, #tpu.memory_space<vmem>>, vector<8x512xf32>
    %c4_110 = arith.constant 4 : index
    %c0_111 = arith.constant 0 : index
    %c0_112 = arith.constant 0 : index
    %215 = vector.load %arg4[%c4_110, %c0_111, %c0_112] : memref<9x8x8xbf16, #tpu.memory_space<vmem>>, vector<1x8x8xbf16>
    %216 = vector.shape_cast %215 : vector<1x8x8xbf16> to vector<8x8xbf16>
    %217 = arith.truncf %214 : vector<8x512xf32> to vector<8x512xbf16>
    %cst_113 = arith.constant dense<0.000000e+00> : vector<8x512xf32>
    %218 = tpu.matmul %216, %217, %cst_113 {dimension_numbers = #tpu.dot_dimension_numbers<[1], [0], [0], [1], [0, 0, 1, 1], [], []>} : vector<8x8xbf16>, vector<8x512xbf16>, vector<8x512xf32> -> vector<8x512xf32>
    %219 = arith.addf %213, %218 : vector<8x512xf32>
    %c0_114 = arith.constant 0 : index
    %c129_115 = arith.constant 129 : index
    %220 = vector.load %arg7[%c0_114, %c129_115] : memref<16x768xf32, #tpu.memory_space<vmem>>, vector<8x512xf32>
    %c15_i32_116 = arith.constant 15 : i32
    %221 = vector.broadcast %c15_i32_116 : i32 to vector<1x512xi32>
    %222 = arith.cmpi slt, %17, %221 : vector<1x512xi32>
    %cst_117 = arith.constant 0.000000e+00 : f32
    %223 = vector.shape_cast %222 : vector<1x512xi1> to vector<1x512xi1>
    %224 = vector.broadcast %223 : vector<1x512xi1> to vector<8x512xi1>
    %225 = vector.broadcast %cst_117 : f32 to vector<8x512xf32>
    %226 = arith.select %224, %220, %225 : vector<8x512xi1>, vector<8x512xf32>
    %c5_118 = arith.constant 5 : index
    %c0_119 = arith.constant 0 : index
    %c0_120 = arith.constant 0 : index
    %227 = vector.load %arg4[%c5_118, %c0_119, %c0_120] : memref<9x8x8xbf16, #tpu.memory_space<vmem>>, vector<1x8x8xbf16>
    %228 = vector.shape_cast %227 : vector<1x8x8xbf16> to vector<8x8xbf16>
    %229 = arith.truncf %226 : vector<8x512xf32> to vector<8x512xbf16>
    %cst_121 = arith.constant dense<0.000000e+00> : vector<8x512xf32>
    %230 = tpu.matmul %228, %229, %cst_121 {dimension_numbers = #tpu.dot_dimension_numbers<[1], [0], [0], [1], [0, 0, 1, 1], [], []>} : vector<8x8xbf16>, vector<8x512xbf16>, vector<8x512xf32> -> vector<8x512xf32>
    %231 = arith.addf %219, %230 : vector<8x512xf32>
    %c0_122 = arith.constant 0 : index
    %c143_123 = arith.constant 143 : index
    %232 = vector.load %arg7[%c0_122, %c143_123] : memref<16x768xf32, #tpu.memory_space<vmem>>, vector<8x512xf32>
    %c15_i32_124 = arith.constant 15 : i32
    %233 = vector.broadcast %c15_i32_124 : i32 to vector<1x512xi32>
    %234 = arith.cmpi slt, %26, %233 : vector<1x512xi32>
    %c1_i32_125 = arith.constant 1 : i32
    %235 = vector.broadcast %c1_i32_125 : i32 to vector<1x512xi32>
    %236 = arith.cmpi sge, %17, %235 : vector<1x512xi32>
    %237 = arith.andi %234, %236 : vector<1x512xi1>
    %cst_126 = arith.constant 0.000000e+00 : f32
    %238 = vector.shape_cast %237 : vector<1x512xi1> to vector<1x512xi1>
    %239 = vector.broadcast %238 : vector<1x512xi1> to vector<8x512xi1>
    %240 = vector.broadcast %cst_126 : f32 to vector<8x512xf32>
    %241 = arith.select %239, %232, %240 : vector<8x512xi1>, vector<8x512xf32>
    %c6_127 = arith.constant 6 : index
    %c0_128 = arith.constant 0 : index
    %c0_129 = arith.constant 0 : index
    %242 = vector.load %arg4[%c6_127, %c0_128, %c0_129] : memref<9x8x8xbf16, #tpu.memory_space<vmem>>, vector<1x8x8xbf16>
    %243 = vector.shape_cast %242 : vector<1x8x8xbf16> to vector<8x8xbf16>
    %244 = arith.truncf %241 : vector<8x512xf32> to vector<8x512xbf16>
    %cst_130 = arith.constant dense<0.000000e+00> : vector<8x512xf32>
    %245 = tpu.matmul %243, %244, %cst_130 {dimension_numbers = #tpu.dot_dimension_numbers<[1], [0], [0], [1], [0, 0, 1, 1], [], []>} : vector<8x8xbf16>, vector<8x512xbf16>, vector<8x512xf32> -> vector<8x512xf32>
    %246 = arith.addf %231, %245 : vector<8x512xf32>
    %c0_131 = arith.constant 0 : index
    %c144_132 = arith.constant 144 : index
    %247 = vector.load %arg7[%c0_131, %c144_132] : memref<16x768xf32, #tpu.memory_space<vmem>>, vector<8x512xf32>
    %c15_i32_133 = arith.constant 15 : i32
    %248 = vector.broadcast %c15_i32_133 : i32 to vector<1x512xi32>
    %249 = arith.cmpi slt, %26, %248 : vector<1x512xi32>
    %cst_134 = arith.constant 0.000000e+00 : f32
    %250 = vector.shape_cast %249 : vector<1x512xi1> to vector<1x512xi1>
    %251 = vector.broadcast %250 : vector<1x512xi1> to vector<8x512xi1>
    %252 = vector.broadcast %cst_134 : f32 to vector<8x512xf32>
    %253 = arith.select %251, %247, %252 : vector<8x512xi1>, vector<8x512xf32>
    %c7_135 = arith.constant 7 : index
    %c0_136 = arith.constant 0 : index
    %c0_137 = arith.constant 0 : index
    %254 = vector.load %arg4[%c7_135, %c0_136, %c0_137] : memref<9x8x8xbf16, #tpu.memory_space<vmem>>, vector<1x8x8xbf16>
    %255 = vector.shape_cast %254 : vector<1x8x8xbf16> to vector<8x8xbf16>
    %256 = arith.truncf %253 : vector<8x512xf32> to vector<8x512xbf16>
    %cst_138 = arith.constant dense<0.000000e+00> : vector<8x512xf32>
    %257 = tpu.matmul %255, %256, %cst_138 {dimension_numbers = #tpu.dot_dimension_numbers<[1], [0], [0], [1], [0, 0, 1, 1], [], []>} : vector<8x8xbf16>, vector<8x512xbf16>, vector<8x512xf32> -> vector<8x512xf32>
    %258 = arith.addf %246, %257 : vector<8x512xf32>
    %c0_139 = arith.constant 0 : index
    %c145_140 = arith.constant 145 : index
    %259 = vector.load %arg7[%c0_139, %c145_140] : memref<16x768xf32, #tpu.memory_space<vmem>>, vector<8x512xf32>
    %c15_i32_141 = arith.constant 15 : i32
    %260 = vector.broadcast %c15_i32_141 : i32 to vector<1x512xi32>
    %261 = arith.cmpi slt, %26, %260 : vector<1x512xi32>
    %c15_i32_142 = arith.constant 15 : i32
    %262 = vector.broadcast %c15_i32_142 : i32 to vector<1x512xi32>
    %263 = arith.cmpi slt, %17, %262 : vector<1x512xi32>
    %264 = arith.andi %261, %263 : vector<1x512xi1>
    %cst_143 = arith.constant 0.000000e+00 : f32
    %265 = vector.shape_cast %264 : vector<1x512xi1> to vector<1x512xi1>
    %266 = vector.broadcast %265 : vector<1x512xi1> to vector<8x512xi1>
    %267 = vector.broadcast %cst_143 : f32 to vector<8x512xf32>
    %268 = arith.select %266, %259, %267 : vector<8x512xi1>, vector<8x512xf32>
    %c8_144 = arith.constant 8 : index
    %c0_145 = arith.constant 0 : index
    %c0_146 = arith.constant 0 : index
    %269 = vector.load %arg4[%c8_144, %c0_145, %c0_146] : memref<9x8x8xbf16, #tpu.memory_space<vmem>>, vector<1x8x8xbf16>
    %270 = vector.shape_cast %269 : vector<1x8x8xbf16> to vector<8x8xbf16>
    %271 = arith.truncf %268 : vector<8x512xf32> to vector<8x512xbf16>
    %cst_147 = arith.constant dense<0.000000e+00> : vector<8x512xf32>
    %272 = tpu.matmul %270, %271, %cst_147 {dimension_numbers = #tpu.dot_dimension_numbers<[1], [0], [0], [1], [0, 0, 1, 1], [], []>} : vector<8x8xbf16>, vector<8x512xbf16>, vector<8x512xf32> -> vector<8x512xf32>
    %273 = arith.addf %258, %272 : vector<8x512xf32>
    %274 = math.tanh %273 : vector<8x512xf32>
    %275 = arith.subf %274, %1 : vector<8x512xf32>
    %276 = arith.mulf %150, %275 : vector<8x512xf32>
    %277 = arith.addf %1, %276 : vector<8x512xf32>
    %c0_148 = arith.constant 0 : index
    %c0_149 = arith.constant 0 : index
    %278 = vector.load %arg6[%c0_148, %c0_149] : memref<8x512xf32, #tpu.memory_space<vmem>>, vector<8x512xf32>
    tpu.vector_store %arg6[%c0_148, %c0_149], %277 {strides = array<i32>} : memref<8x512xf32, #tpu.memory_space<vmem>>, vector<8x512xf32>,
    return
  }
  func.func @transform_0(%arg0: i32) -> (i32, i32) {
    %c0_i32 = arith.constant 0 : i32
    %c0_i32_0 = arith.constant 0 : i32
    return %c0_i32, %arg0 : i32, i32
  }
  func.func @transform_1(%arg0: i32) -> (i32, i32) {
    %c0_i32 = arith.constant 0 : i32
    %c0_i32_0 = arith.constant 0 : i32
    return %c0_i32, %arg0 : i32, i32
  }
  func.func @transform_2(%arg0: i32) -> (i32, i32, i32) {
    %c0_i32 = arith.constant 0 : i32
    %c0_i32_0 = arith.constant 0 : i32
    %c0_i32_1 = arith.constant 0 : i32
    %c0_i32_2 = arith.constant 0 : i32
    return %c0_i32, %c0_i32_0, %c0_i32_1 : i32, i32, i32
  }
  func.func @transform_3(%arg0: i32) -> (i32, i32, i32) {
    %c0_i32 = arith.constant 0 : i32
    %c0_i32_0 = arith.constant 0 : i32
    %c0_i32_1 = arith.constant 0 : i32
    %c0_i32_2 = arith.constant 0 : i32
    return %c0_i32, %c0_i32_0, %c0_i32_1 : i32, i32, i32
  }
  func.func @transform_4(%arg0: i32) -> (i32, i32) {
    %c0_i32 = arith.constant 0 : i32
    %c0_i32_0 = arith.constant 0 : i32
    %c0_i32_1 = arith.constant 0 : i32
    return %c0_i32, %c0_i32_0 : i32, i32
  }
  func.func @transform_5(%arg0: i32) -> (i32, i32) {
    %c0_i32 = arith.constant 0 : i32
    %c0_i32_0 = arith.constant 0 : i32
    return %c0_i32, %arg0 : i32, i32
  }
}

</mosaic_0001>

<bundles_post_ra>
// kernel: tpu_custom_call.1
= control target key start
LH: loop header
LB: loop body
LE: loop exit
PB: predicated region body
PF: predicated region fallthrough
CT: control target
= control target key end

     0   :  { %v110_v5 = vld [vmem:[#allocation2 + $0x40] sm:$0xff]  ;;  %v115_v6 = vld [vmem:[#allocation2 + $0x30] sm:$0xff]  ;;  %s4625_s0 = inlined_call_operand.vmem [shape: bf16[8,512], index: 0, kind: input, shape index: {}]   ;;  %s4626_s1 = inlined_call_operand.vmem [shape: bf16[4,512], index: 1, kind: input, shape index: {}]   ;;  %s4627_s2 = inlined_call_operand.vmem [shape: bf16[9,24,16], index: 2, kind: input, shape index: {}]   ;;  %s4628_s3 = inlined_call_operand.vmem [shape: bf16[9,8,8], index: 3, kind: input, shape index: {}]   ;;  %s4629_s4 = inlined_call_operand.vmem [shape: f32[24,1], index: 4, kind: input, shape index: {}]   ;;  %s4630_s5 = inlined_call_operand.hbm [shape: f32[8,512], index: 5, kind: output, shape index: {}]  }
   0x1   :  { %v22_v0 = vld [vmem:[%s4625_s0] sm:$0xff]  ;;  %v23_v1 = vld [vmem:[%s4625_s0 + $0x8] sm:$0xff] }
   0x2   :  { %v28_v2 = vld [vmem:[%s4626_s1] sm:$0xff]  ;;  %v3400_v3 = vunpack.c.h.bf16 %v22_v0  ;;  %v3402_v4 = vunpack.c.l.bf16 %v23_v1 }
   0x3   :  { %10 = vsyncpa [#allocation4], 0  ;;  %v30_v7 = vunpack.c.h.bf16 %v28_v2  ;;  %v29_v8 = vunpack.c.l.bf16 %v28_v2  ;;  %v3009_v9 = vpack.i.bf16 %v115_v6, %v110_v5  ;;  %s3350_s24 = smov 16   ;;  %vm4631_vm0 = vcmask 1043456   ;;  %s3351_s0 = smov 17  }
   0x4   :  { %v2989_v10 = vpack.i.bf16 %v3402_v4, %v3400_v3  ;;  %v3408_v11 = vunpack.c.h.bf16 %v23_v1  ;;  %v3433_v20 = vunpack.c.l.bf16 %v22_v0  ;;  %s3352_s1 = smov 15   ;;  %s3353_s25 = smov 1   ;;  %v57_v24 = vlaneseq }
   0x5   :  { %39 = vst [vmem:[#allocation1 + $0x10] ss:$2 sm:$0xff] %v30_v7  ;;  %3010 = vrot.lane.b32.xlu2 %v3009_v9, %s3350_s24  ;;  %vm4650_vm10 = vcmask 130048   ;;  %s3354_s30 = smov 127   ;;  %s3355_s6 = smov 113  }
   0x6   :  { %2990 = vrot.lane.b32.xlu0 %v2989_v10, %s3350_s24  ;;  %37 = vst [vmem:[#allocation1] ss:$2 sm:$0xff] %v29_v8  ;;  %v3463_v25 = vand.u32 127, %v57_v24  ;;  %s3356_s9 = smov 112   ;;  %s3357_s12 = smov 111  }
   0x7   :  { %s2641_s20 = sshll.u32 %s4630_s5, 4  ;;  %s2642_s20 = int_to_ptr.hbm [resolvable:$true] %s2641_s20 }
   0x8   :  { %v3466_v26 = vadd.s32 256, %v3463_v25  ;;  %v3469_v27 = vadd.s32 384, %v3463_v25  ;;  %v3474_v33 = vadd.s32 128, %v3463_v25  ;;  %v62_v35 = vcvt.s32.f32 %v3463_v25 }
   0xa   :  { %v64_v28 = vcvt.s32.f32 %v3466_v26  ;;  %v65_v29 = vcvt.s32.f32 %v3469_v27  ;;  %v63_v36 = vcvt.s32.f32 %v3474_v33  ;;  %v66_v39 = vadd.f32 0.5, %v62_v35 }
   0xc   :  { %v3410_v12 = vld.sshfl [vmem:[#allocation1 + $0x10] sm:$0xff pattern:$0x75316420]  ;;  %v3412_v13 = vld.sshfl [vmem:[#allocation1 + $0x18] sm:$0xff pattern:$0x75316420] }
   0xd   :  { %v3416_v14 = vsel %vm4631_vm0, %v3410_v12, 0.0  ;;  %v3420_v15 = vsel %vm4631_vm0, %v3412_v13, 0.0  ;;  %v3422_v16 = vld.sshfl [vmem:[#allocation1 + $0x8] sm:$0xff pattern:$0x75316420]  ;;  %3015 = vrot.lane.b32.xlu2 %v2989_v10, %s3351_s0  ;;  %v68_v30 = vadd.f32 0.5, %v64_v28 }
   0xe   :  { %v2999_v17 = vpack.i.bf16 %v3420_v15, %v3416_v14  ;;  %v3429_v18 = vsel %vm4631_vm0, %v3422_v16, 0.0  ;;  %v3431_v19 = vld.sshfl [vmem:[#allocation1] sm:$0xff pattern:$0x75316420]  ;;  %v69_v31 = vadd.f32 0.5, %v65_v29  ;;  %v67_v40 = vadd.f32 0.5, %v63_v36 }
   0xf   :  { %v2994_v21 = vpack.i.bf16 %v3429_v18, %v3408_v11  ;;  %v49_v22 = vsel %vm4631_vm0, %v3431_v19, 0.0  ;;  %v72_v32 = vmul.f32 0.0625, %v68_v30  ;;  %v70_v44 = vmul.f32 0.0625, %v66_v39 }
  0x10   :  { %3000 = vrot.lane.b32.xlu1 %v2999_v17, %s3350_s24  ;;  %v3442_v23 = vpack.i.bf16 %v49_v22, %v3433_v20  ;;  %v73_v34 = vmul.f32 0.0625, %v69_v31  ;;  %v71_v45 = vmul.f32 0.0625, %v67_v40 }
  0x11   :  { %2995 = vrot.lane.b32.xlu0 %v2994_v21, %s3350_s24  ;;  %v2950_v37 = vceil.f32 %v72_v32  ;;  %v2951_v38 = vfloor.f32 %v72_v32  ;;  %vm2949_vm1 = vcmp.lt.s32.totalorder %v72_v32, 0  ;;  %v2940_v48 = vceil.f32 %v70_v44 }
  0x12   :  { %v2955_v41 = vceil.f32 %v73_v34  ;;  %v2956_v42 = vfloor.f32 %v73_v34  ;;  %vm2954_vm2 = vcmp.lt.s32.totalorder %v73_v34, 0  ;;  %v2941_v49 = vfloor.f32 %v70_v44 }
  0x13   :  { %v2952_v43 = vsel %vm2949_vm1, %v2950_v37, %v2951_v38  ;;  %v2945_v50 = vceil.f32 %v71_v45  ;;  %v2946_v51 = vfloor.f32 %v71_v45  ;;  %vm2939_vm3 = vcmp.lt.s32.totalorder %v70_v44, 0 }
  0x14   :  { %v2957_v46 = vsel %vm2954_vm2, %v2955_v41, %v2956_v42  ;;  %v3478_v47 = vcvt.f32.s32 %v2952_v43  ;;  %vm2944_vm4 = vcmp.lt.s32.totalorder %v71_v45, 0  ;;  %v2942_v54 = vsel %vm2939_vm3, %v2940_v48, %v2941_v49 }
  0x15   :  { %3030 = vrot.lane.b32.xlu2 %v3442_v23, %s3351_s0  ;;  %v3480_v52 = vcvt.f32.s32 %v2957_v46  ;;  %v2947_v55 = vsel %vm2944_vm4, %v2945_v50, %v2946_v51  ;;  %v3484_v58 = vcvt.f32.s32 %v2942_v54  ;;  %vm4633_vm1 = vcmask 138240  }
  0x16   :  { %v88_v53 = vcvt.s32.f32 %v3478_v47  ;;  %v2948_v59 = vcvt.f32.s32 %v2947_v55 }
  0x17   :  { %v89_v56 = vcvt.s32.f32 %v3480_v52  ;;  %v86_v62 = vcvt.s32.f32 %v3484_v58 }
  0x18   :  { %3005 = vrot.lane.b32.xlu1 %v3442_v23, %s3350_s24  ;;  %v92_v57 = vadd.f32 0.5, %v88_v53  ;;  %v87_v63 = vcvt.s32.f32 %v2948_v59  ;;  %v79_v50 = vmul.u32 16, %v2948_v59 }
  0x19   :  { %3020 = vrot.lane.b32.xlu0 %v2994_v21, %s3351_s0  ;;  %v93_v60 = vadd.f32 0.5, %v89_v56  ;;  %v90_v5 = vadd.f32 0.5, %v86_v62 }
  0x1a   :  { %v96_v61 = vmul.f32 0.0625, %v92_v57  ;;  %v91_v6 = vadd.f32 0.5, %v87_v63  ;;  %v3504_v57 = vsub.s32 %v3474_v33, %v79_v50 }
  0x1b   :  { %v97_v0 = vmul.f32 0.0625, %v93_v60  ;;  %v80_v60 = vmul.u32 16, %v3478_v47 }
  0x1c   :  { %v2970_v1 = vceil.f32 %v96_v61  ;;  %v2971_v2 = vfloor.f32 %v96_v61  ;;  %vm2969_vm5 = vcmp.lt.s32.totalorder %v96_v61, 0  ;;  %4683 = vst [vmem:[#allocation6_spill] sm:$0xff] %v3504_v57  ;;  %vm4646_vm14 = vcmp.ge.s32.totalorder %v3504_v57, 1 }
  0x1d   :  { %3045 = vrot.lane.b32.xlu2 %v2994_v21, %s3352_s1  ;;  %v2975_v7 = vceil.f32 %v97_v0  ;;  %v2976_v8 = vfloor.f32 %v97_v0  ;;  %vm2974_vm6 = vcmp.lt.s32.totalorder %v97_v0, 0 }
  0x1f   :  { %v2977_v22 = vsel %vm2974_vm6, %v2975_v7, %v2976_v8 }
  0x20   :  { %3025 = vrot.lane.b32.xlu1 %v2999_v17, %s3351_s0  ;;  %v2978_v32 = vcvt.f32.s32 %v2977_v22 }
  0x21   :  { %3035 = vrot.lane.b32.xlu0 %v3009_v9, %s3351_s0 }
  0x22   :  { %v105_v38 = vmul.u32 16, %v2978_v32 }
  0x24   :  { %v3497_v43 = vsub.s32 %v3480_v52, %v105_v38 }
  0x25   :  { %3060 = vrot.lane.b32.xlu2 %v3009_v9, %s3352_s1 }
  0x26   :  { %vm4640_vm11 = vcmp.ge.s32.totalorder %v3497_v43, 1 }
  0x27   :  { %vm2672_vm13 = vmpackc.low %vm4640_vm11, %vm4640_vm11 }
  0x28   :  { %3040 = vrot.lane.b32.xlu1 %v2989_v10, %s3352_s1 }
  0x29   :  { %3050 = vrot.lane.b32.xlu0 %v2999_v17, %s3352_s1 }
  0x2d   :  { %3075 = vrot.lane.b32.xlu2 %v2999_v17, %s3353_s25  ;;  %v95_v17 = vmul.f32 0.0625, %v91_v6 }
  0x2f   :  { %v2965_v30 = vceil.f32 %v95_v17  ;;  %v2966_v31 = vfloor.f32 %v95_v17  ;;  %vm2964_vm8 = vcmp.lt.s32.totalorder %v95_v17, 0 }
  0x30   :  { %3055 = vrot.lane.b32.xlu1 %v3442_v23, %s3352_s1 }
  0x31   :  { %3065 = vrot.lane.b32.xlu0 %v2989_v10, %s3353_s25  ;;  %v94_v10 = vmul.f32 0.0625, %v90_v5  ;;  %v2967_v37 = vsel %vm2964_vm8, %v2965_v30, %v2966_v31  ;;  %v81_v5 = vmul.u32 16, %v3480_v52 }
  0x32   :  { %v2968_v41 = vcvt.f32.s32 %v2967_v37 }
  0x33   :  { %v2960_v28 = vceil.f32 %v94_v10  ;;  %v2961_v29 = vfloor.f32 %v94_v10  ;;  %vm2959_vm7 = vcmp.lt.s32.totalorder %v94_v10, 0  ;;  %v3536_v10 = vsub.s32 %v3466_v26, %v80_v60 }
  0x34   :  { %v103_v45 = vmul.u32 16, %v2968_v41  ;;  %v78_v26 = vmul.u32 16, %v3484_v58 }
  0x35   :  { %v2962_v36 = vsel %vm2959_vm7, %v2960_v28, %v2961_v29  ;;  %v3546_v28 = vsub.s32 %v3469_v27, %v81_v5 }
  0x36   :  { %v2963_v40 = vcvt.f32.s32 %v2962_v36  ;;  %v3518_v0 = vsub.s32 %v2948_v59, %v103_v45  ;;  %v2931_v59 = vld [vmem:[%s4627_s2 + $0xc] sm:$0xff]  ;;  %v3572_v37 = vsub.s32 %v3463_v25, %v78_v26 }
  0x37   :  { %4686 = vst [vmem:[#allocation7_spill] sm:$0xff] %v3546_v28  ;;  %v876_v36 = vld [vmem:[#allocation2] sm:$0xff]  ;;  %vm4634_vm8 = vcmp.ge.s32.totalorder %v3546_v28, 1 }
  0x38   :  { %3070 = vrot.lane.b32.xlu1 %v2994_v21, %s3353_s25  ;;  %v102_v44 = vmul.u32 16, %v2963_v40  ;;  %vm4636_vm2 = vcmp.ge.s32.totalorder %v3518_v0, 1  ;;  %4691 = vst [vmem:[#allocation8_spill] sm:$0xff] %v3572_v37  ;;  %v3590_v50 = vpack.i.bf16 %v876_v36, %v3420_v15 }
  0x39   :  { %3080 = vrot.lane.b32.xlu0 %v3442_v23, %s3353_s25  ;;  %vm3554_vm3 = vmand %vm4636_vm2, %vm4646_vm14 }
  0x3a   :  { %v3516_v63 = vsub.s32 %v3484_v58, %v102_v44  ;;  %vm2662_vm6 = vmpackc.low %vm4636_vm2, %vm4636_vm2 }
  0x3b   :  { %vm2686_vm7 = vmpackc.low %vm3554_vm3, %vm3554_vm3 }
  0x3c   :  { %vm4641_vm15 = vcmp.ge.s32.totalorder %v3516_v63, 1 }
  0x3d   :  { %vm3563_vm4 = vmpackc.low %vm4641_vm15, %vm4641_vm15 }
  0x40   :  { %3085 = vrot.lane.b32.xlu1 %v3009_v9, %s3353_s25  ;;  %v2972_v9 = vsel %vm2969_vm5, %v2970_v1, %v2971_v2  ;;  %vm4635_vm5 = vcmp.ge.s32.totalorder %v3536_v10, 1 }
  0x41   :  { %v2973_v24 = vcvt.f32.s32 %v2972_v9 }
  0x43   :  { %v104_v35 = vmul.u32 16, %v2973_v24 }
  0x45   :  { %v3494_v42 = vsub.s32 %v3478_v47, %v104_v35  ;;  %v871_v35 = vld [vmem:[#allocation2 + $0x18] sm:$0xff] }
  0x47   :  { %vm4638_vm9 = vcmp.ge.s32.totalorder %v3494_v42, 1 }
  0x48   :  { %vm3510_vm12 = vmpackc.low %vm4638_vm9, %vm4638_vm9  ;;  %3100 = vrot.lane.b32.xlu1 %v3590_v50, %s3354_s30 }
  0x5f   :  { %v3487_v21 = vpop.permute.xlu2 %3010 }
  0x60   :  { %v3013_v52 = vunpack.i.h.bf16 %v3487_v21  ;;  %v3012_v17 = vunpack.i.l.bf16 %v3487_v21 }
  0x67   :  { %v3491_v39 = vpop.permute.xlu2 %3015 }
  0x68   :  { %v3017_v8 = vunpack.i.l.bf16 %v3491_v39  ;;  %v3018_v31 = vunpack.i.h.bf16 %v3491_v39 }
  0x6f   :  { %v3520_v1 = vpop.permute.xlu2 %3030 }
  0x70   :  { %v3032_v9 = vunpack.i.l.bf16 %v3520_v1  ;;  %v3033_v24 = vunpack.i.h.bf16 %v3520_v1  ;;  %v3651_v1 = vpack.i.bf16 %v3408_v11, %v3402_v4 }
  0x72   :  { %3090 = vrot.lane.b32.xlu2 %v3651_v1, %s3354_s30  ;;  %3115 = vrot.lane.b32.xlu1 %v3651_v1, %s3355_s6 }
  0x78   :  { %v3489_v34 = vpop.permute.xlu0 %2990 }
  0x79   :  { %v2993_v46 = vunpack.i.h.bf16 %v3489_v34  ;;  %v2992_v48 = vunpack.i.l.bf16 %v3489_v34  ;;  %v172_v34 = vsel %vm4633_vm1, %v3032_v9, %v3017_v8 }
  0x7b   :  { %v233_v33 = vsel %vm4650_vm10, %v2992_v48, %v2993_v46 }
  0x82   :  { %v3001_v49 = vpop.permute.xlu1 %3000 }
  0x83   :  { %v3003_v51 = vunpack.i.h.bf16 %v3001_v49  ;;  %v3002_v53 = vunpack.i.l.bf16 %v3001_v49  ;;  %v2996_v54 = vpop.permute.xlu0 %2995 }
  0x84   :  { %v2998_v55 = vunpack.i.h.bf16 %v2996_v54  ;;  %v2997_v56 = vunpack.i.l.bf16 %v2996_v54 }
  0x85   :  { %v238_v62 = vsel %vm4650_vm10, %v3002_v53, %v3003_v51  ;;  %v2652_v51 = vld [vmem:[%s4627_s2 + $0x14] sm:$0xf] }
  0x86   :  { %v237_v47 = vsel %vm4650_vm10, %v2998_v55, %v3002_v53  ;;  %v234_v2 = vsel %vm4650_vm10, %v2993_v46, %v2997_v56  ;;  %v173_v56 = vsel %vm4633_vm1, %v3017_v8, %v3018_v31  ;;  %v4299_v53 = vld [vmem:[%s4628_s3 + $0x4] sm:$0xf] }
  0x87   :  { %v2668_v6 = vpack.c.bf16 %v237_v47, %v233_v33  ;;  %v2673_v7 = vpack.c.bf16 %v238_v62, %v234_v2  ;;  %v268_v33 = vunpack.c.l.b16 %v2652_v51 }
  0x89   :  { %2669 = vmatpush.bf16.msk.msra.mxu2 %vm3510_vm12, %v2668_v6  ;;  %2674 = vmatpush.bf16.msk.msra.mxu3 %vm2672_vm13, %v2673_v7  ;;  %vm4632_vm12 = vcmp.ge.s32.totalorder %v3572_v37, 1  ;;  %vm3602_vm13 = vmand %vm4638_vm9, %vm4635_vm5 }
  0x8a   :  { %v3006_v22 = vpop.permute.xlu1 %3005 }
  0x8b   :  { %v3008_v29 = vunpack.i.h.bf16 %v3006_v22  ;;  %v3007_v30 = vunpack.i.l.bf16 %v3006_v22  ;;  %v3021_v32 = vpop.permute.xlu0 %3020  ;;  %v270_v22 = vpack.c.b16 %v268_v33, %v268_v33 }
  0x8c   :  { %2670 = vmatmul.msk.bf16.vlgmr.msra.gmra.mxu2 %vm4650_vm10, %v2931_v59  ;;  %2675 = vmatmul.msk.bf16.vlgmr.msra.gmra.mxu3 %vm4650_vm10, %v2931_v59  ;;  %v3023_v58 = vunpack.i.h.bf16 %v3021_v32  ;;  %v3022_v25 = vunpack.i.l.bf16 %v3021_v32 }
  0x8d   :  { %v231_v38 = vsel %vm4650_vm10, %v3012_v17, %v3007_v30  ;;  %v235_v39 = vsel %vm4650_vm10, %v3013_v52, %v3008_v29  ;;  %v232_v40 = vsel %vm4650_vm10, %v3007_v30, %v2992_v48  ;;  %v236_v41 = vsel %vm4650_vm10, %v3008_v29, %v2998_v55 }
  0x8e   :  { %v2658_v44 = vpack.c.bf16 %v235_v39, %v231_v38  ;;  %v2663_v45 = vpack.c.bf16 %v236_v41, %v232_v40  ;;  %v176_v46 = vsel %vm4633_vm1, %v3033_v24, %v3023_v58  ;;  %v3587_v48 = vpack.i.bf16 %v3416_v14, %v871_v35 }
  0x8f   :  { %v2687_v49 = vpack.c.bf16 %v176_v46, %v172_v34  ;;  %v174_v60 = vsel %vm4633_vm1, %v3018_v31, %v3022_v25  ;;  %v4698_v46 = vmov 0 }
  0x90   :  { %2659 = vmatpush.bf16.msk.msra.mxu0 %vm3563_vm4, %v2658_v44  ;;  %2664 = vmatpush.bf16.msk.msra.mxu1 %vm2662_vm6, %v2663_v45  ;;  %vm3612_vm4 = vmand %vm4640_vm11, %vm4634_vm8  ;;  %v3667_v44 = vpack.i.bf16 %v3429_v18, %v3400_v3  ;;  %vm4644_vm8 = vcmp.lt.s32.totalorder %v3546_v28, 15 }
  0x91   :  { %3095 = vrot.lane.b32.xlu0 %v3587_v48, %s3354_s30  ;;  %vm3626_vm6 = vmand %vm4641_vm15, %vm4632_vm12 }
  0x92   :  { %v3026_v15 = vpop.permute.xlu1 %3025  ;;  %vm2696_vm0 = vmpackc.low %vm3612_vm4, %vm3612_vm4  ;;  %3105 = vrot.lane.b32.xlu2 %v3667_v44, %s3354_s30  ;;  %3130 = vrot.lane.b32.xlu1 %v3667_v44, %s3355_s6 }
  0x93   :  { %2660 = vmatmul.msk.bf16.vlgmr.msra.gmra.mxu0 %vm4650_vm10, %v2931_v59  ;;  %2665 = vmatmul.msk.bf16.vlgmr.msra.gmra.mxu1 %vm4650_vm10, %v2931_v59  ;;  %v3028_v54 = vunpack.i.h.bf16 %v3026_v15  ;;  %v3027_v55 = vunpack.i.l.bf16 %v3026_v15  ;;  %v3036_v61 = vpop.permute.xlu0 %3035  ;;  %vm2681_vm12 = vmpackc.low %vm3626_vm6, %vm3626_vm6 }
  0x94   :  { %2688 = vmatpush.bf16.msk.msrb.mxu1 %vm2686_vm7, %v2687_v49  ;;  %vm2691_vm7 = vmpackc.low %vm3602_vm13, %vm3602_vm13  ;;  %v3038_v47 = vunpack.i.h.bf16 %v3036_v61  ;;  %v3037_v2 = vunpack.i.l.bf16 %v3036_v61  ;;  %v4703_v61 = vmov 0 }
  0x95   :  { %v177_v5 = vsel %vm4633_vm1, %v3023_v58, %v3027_v55  ;;  %v178_v6 = vsel %vm4633_vm1, %v3027_v55, %v3028_v54 }
  0x96   :  { %v2692_v7 = vpack.c.bf16 %v177_v5, %v173_v56  ;;  %v2697_v59 = vpack.c.bf16 %v178_v6, %v174_v60  ;;  %v171_v8 = vsel %vm4633_vm1, %v3037_v2, %v3032_v9  ;;  %v175_v52 = vsel %vm4633_vm1, %v3038_v47, %v3033_v24  ;;  %v3046_v24 = vpop.permute.xlu2 %3045  ;;  %v2930_v60 = vld [vmem:[%s4627_s2] sm:$0xff]  ;;  %v197_v6 = vld [vmem:[%s4627_s2 + $0x8] sm:$0xf] }
  0x97   :  { %v2682_v17 = vpack.c.bf16 %v175_v52, %v171_v8  ;;  %v3048_v32 = vunpack.i.h.bf16 %v3046_v24  ;;  %v3047_v58 = vunpack.i.l.bf16 %v3046_v24  ;;  %vm4639_vm1 = vcmp.lt.s32.totalorder %v3536_v10, 15 }
  0x98   :  { %2693 = vmatpush.bf16.msk.msrb.mxu2 %vm2691_vm7, %v2692_v7  ;;  %2698 = vmatpush.bf16.msk.msrb.mxu3 %vm2696_vm0, %v2697_v59  ;;  %vm4642_vm0 = vcmask 121856   ;;  %v4706_v5 = vmov 0  ;;  %v354_v59 = vunpack.c.l.b16 %v197_v6 }
  0x99   :  { %2683 = vmatpush.bf16.msk.msrb.mxu0 %vm2681_vm12, %v2682_v17  ;;  %3110 = vrot.lane.b32.xlu0 %v3442_v23, %s3354_s30  ;;  %vm4637_vm12 = vcmp.lt.s32.totalorder %v3504_v57, 15 }
  0x9a   :  { %v3041_v26 = vpop.permute.xlu1 %3040  ;;  %vm3674_vm7 = vmand %vm4636_vm2, %vm4637_vm12  ;;  %3120 = vrot.lane.b32.xlu2 %v3587_v48, %s3355_s6  ;;  %3145 = vrot.lane.b32.xlu1 %v3587_v48, %s3356_s9  ;;  %v356_v8 = vpack.c.b16 %v354_v59, %v354_v59 }
  0x9b   :  { %v3051_v9 = vpop.permute.xlu0 %3050  ;;  %v3043_v29 = vunpack.i.h.bf16 %v3041_v26  ;;  %v3042_v30 = vunpack.i.l.bf16 %v3041_v26  ;;  %v4699_v46 = vsel %vm3674_vm7, 4294967295, %v4698_v46  ;;  %vm2713_vm5 = vmpackc.low %vm3674_vm7, %vm3674_vm7  ;;  %vm4731_vm7 = vcmask 924672  }
  0x9c   :  { %2671 = vmatmul.msk.bf16.gmra.mxu2 %vm4650_vm10, %v270_v22  ;;  %2676 = vmatmul.msk.bf16.gmra.mxu3 %vm4650_vm10, %v270_v22  ;;  %v3052_v31 = vunpack.i.l.bf16 %v3051_v9  ;;  %v3053_v27 = vunpack.i.h.bf16 %v3051_v9  ;;  %4700 = vst [vmem:[#allocation9_spill] sm:$0xff] %v4699_v46  ;;  %vm3691_vm2 = vmand %vm4638_vm9, %vm4639_vm1 }
  0x9d   :  { %v474_v34 = vsel %vm4642_vm0, %v3042_v30, %v3043_v29  ;;  %v475_v38 = vsel %vm4642_vm0, %v3043_v29, %v3047_v58  ;;  %vm2718_vm12 = vmpackc.low %vm3691_vm2, %vm3691_vm2 }
  0x9e   :  { %v478_v35 = vsel %vm4642_vm0, %v3048_v32, %v3052_v31  ;;  %v479_v36 = vsel %vm4642_vm0, %v3052_v31, %v3053_v27  ;;  %v3061_v25 = vpop.permute.xlu2 %3060  ;;  %vm3707_vm9 = vmand %vm4640_vm11, %vm4644_vm8 }
  0x9f   :  { %v2719_v45 = vpack.c.bf16 %v478_v35, %v474_v34  ;;  %v3063_v51 = vunpack.i.h.bf16 %v3061_v25  ;;  %v3062_v15 = vunpack.i.l.bf16 %v3061_v25  ;;  %v2724_v54 = vpack.c.bf16 %v479_v36, %v475_v38  ;;  %vm2723_vm1 = vmpackc.low %vm3707_vm9, %vm3707_vm9  ;;  %v2932_v25 = vld [vmem:[%s4627_s2 + $0x18] sm:$0xff] }
  0xa0   :  { %v4704_v61 = vsel %vm3707_vm9, 4294967295, %v4703_v61 }
  0xa1   :  { %3125 = vrot.lane.b32.xlu0 %v3590_v50, %s3355_s6  ;;  %2720 = vmatpush.bf16.msk.msra.mxu2 %vm2718_vm12, %v2719_v45  ;;  %4705 = vst [vmem:[#allocation10_spill] sm:$0xff] %v4704_v61 }
  0xa2   :  { %v3056_v39 = vpop.permute.xlu1 %3055  ;;  %2725 = vmatpush.bf16.msk.msra.mxu3 %vm2723_vm1, %v2724_v54  ;;  %3135 = vrot.lane.b32.xlu2 %v3442_v23, %s3355_s6  ;;  %vm2740_vm1 = vmpackc.low %vm4646_vm14, %vm4646_vm14 }
  0xa3   :  { %2661 = vmatmul.msk.bf16.gmra.mxu0 %vm4650_vm10, %v270_v22  ;;  %2666 = vmatmul.msk.bf16.gmra.mxu1 %vm4650_vm10, %v270_v22  ;;  %v3058_v40 = vunpack.i.h.bf16 %v3056_v39  ;;  %v3057_v41 = vunpack.i.l.bf16 %v3056_v39  ;;  %v3066_v7 = vpop.permute.xlu0 %3065 }
  0xa4   :  { %3160 = vrot.lane.b32.xlu1 %v3442_v23, %s3356_s9  ;;  %v3068_v52 = vunpack.i.h.bf16 %v3066_v7  ;;  %v3067_v17 = vunpack.i.l.bf16 %v3066_v7 }
  0xa5   :  { %v477_v49 = vsel %vm4642_vm0, %v3058_v40, %v3048_v32  ;;  %v473_v18 = vsel %vm4642_vm0, %v3057_v41, %v3042_v30  ;;  %v472_v33 = vsel %vm4642_vm0, %v3062_v15, %v3057_v41  ;;  %v476_v47 = vsel %vm4642_vm0, %v3063_v51, %v3058_v40 }
  0xa6   :  { %v2714_v55 = vpack.c.bf16 %v477_v49, %v473_v18  ;;  %v2709_v2 = vpack.c.bf16 %v476_v47, %v472_v33  ;;  %v3076_v26 = vpop.permute.xlu2 %3075  ;;  %v2730_v33 = vld [vmem:[%s4627_s2 + $0x2c] sm:$0xf] }
  0xa7   :  { %v3078_v29 = vunpack.i.h.bf16 %v3076_v26  ;;  %v3077_v30 = vunpack.i.l.bf16 %v3076_v26  ;;  %v668_v47 = vunpack.c.l.b16 %v2730_v33 }
  0xa8   :  { %2715 = vmatpush.bf16.msk.msra.mxu1 %vm2713_vm5, %v2714_v55  ;;  %vm4643_vm5 = vcmp.lt.s32.totalorder %v3572_v37, 15  ;;  %v3316_v55 = vpack.c.bf16 %v3412_v13, %v3408_v11  ;;  %v3322_v13 = vpack.c.bf16 %v3422_v16, %v3400_v3 }
  0xa9   :  { %3140 = vrot.lane.b32.xlu0 %v3651_v1, %s3356_s9  ;;  %vm3725_vm12 = vmand %vm4641_vm15, %vm4643_vm5  ;;  %vm4709_vm15 = vcmp.ge.s32.totalorder %v3536_v10, 1  ;;  %vm4710_vm5 = vcmp.ge.s32.totalorder %v3546_v28, 1 }
  0xaa   :  { %v4707_v5 = vsel %vm3725_vm12, 4294967295, %v4706_v5  ;;  %vm2708_vm11 = vmpackc.low %vm3725_vm12, %vm3725_vm12  ;;  %v3071_v31 = vpop.permute.xlu1 %3070  ;;  %3150 = vrot.lane.b32.xlu2 %v3590_v50, %s3356_s9 }
  0xab   :  { %4708 = vst [vmem:[#allocation11_spill] sm:$0xff] %v4707_v5  ;;  %2710 = vmatpush.bf16.msk.msra.mxu0 %vm2708_vm11, %v2709_v2  ;;  %vm4645_vm11 = vcmask 7168   ;;  %v3081_v22 = vpop.permute.xlu0 %3080  ;;  %v3073_v27 = vunpack.i.h.bf16 %v3071_v31  ;;  %v3072_v58 = vunpack.i.l.bf16 %v3071_v31  ;;  %vm2745_vm0 = vmpackc.low %vm4709_vm15, %vm4709_vm15  ;;  %vm4711_vm15 = vcmp.ge.s32.totalorder %v3572_v37, 1 }
  0xac   :  { %2694 = vmatmul.msk.bf16.vlgmr.msrb.gmra.mxu2 %vm4650_vm10, %v2930_v60  ;;  %2699 = vmatmul.msk.bf16.vlgmr.msrb.gmra.mxu3 %vm4650_vm10, %v2930_v60  ;;  %v3083_v9 = vunpack.i.h.bf16 %v3081_v22  ;;  %v3082_v24 = vunpack.i.l.bf16 %v3081_v22  ;;  %v633_v32 = vsel %vm4645_vm11, %v3067_v17, %v3068_v52  ;;  %v638_v34 = vsel %vm4645_vm11, %v3077_v30, %v3078_v29  ;;  %vm2750_vm8 = vmpackc.low %vm4710_vm5, %vm4710_vm5 }
  0xad   :  { %3175 = vrot.lane.b32.xlu1 %v3590_v50, %s3357_s12  ;;  %v637_v36 = vsel %vm4645_vm11, %v3073_v27, %v3077_v30  ;;  %v634_v38 = vsel %vm4645_vm11, %v3068_v52, %v3072_v58  ;;  %vm4712_vm5 = vcmask 1043456   ;;  %v670_v2 = vpack.c.b16 %v668_v47, %v668_v47 }
  0xae   :  { %v636_v35 = vsel %vm4645_vm11, %v3083_v9, %v3073_v27  ;;  %v2746_v40 = vpack.c.bf16 %v637_v36, %v633_v32  ;;  %v2751_v41 = vpack.c.bf16 %v638_v34, %v634_v38  ;;  %v2934_v34 = vld [vmem:[%s4627_s2 + $0x30] sm:$0xff] }
  0xb0   :  { %2747 = vmatpush.bf16.msk.msrb.mxu2 %vm2745_vm0, %v2746_v40  ;;  %2752 = vmatpush.bf16.msk.msrb.mxu3 %vm2750_vm8, %v2751_v41  ;;  %vm2735_vm8 = vmpackc.low %vm4711_vm15, %vm4711_vm15  ;;  %vm3358_vm0 = vmmov 1   ;;  %vm4647_vm15 = vcmask 1039360  }
  0xb1   :  { %3155 = vrot.lane.b32.xlu0 %v3667_v44, %s3356_s9 }
  0xb2   :  { %3165 = vrot.lane.b32.xlu2 %v3651_v1, %s3357_s12  ;;  %v2703_v1 = vld [vmem:[%s4627_s2 + $0x20] sm:$0xf] }
  0xb3   :  { %2684 = vmatmul.msk.bf16.vlgmr.msrb.gmra.mxu0 %vm4650_vm10, %v2930_v60  ;;  %2689 = vmatmul.msk.bf16.vlgmr.msrb.gmra.mxu1 %vm4650_vm10, %v2930_v60  ;;  %v509_v15 = vunpack.c.l.b16 %v2703_v1  ;;  %v2933_v60 = vld [vmem:[%s4627_s2 + $0x24] sm:$0xff] }
  0xb5   :  { %v511_v54 = vpack.c.b16 %v509_v15, %v509_v15 }
  0xb9   :  { %3170 = vrot.lane.b32.xlu0 %v3587_v48, %s3357_s12  ;;  %v632_v48 = vsel %vm4645_vm11, %v3082_v24, %v3067_v17 }
  0xba   :  { %v2741_v39 = vpack.c.bf16 %v636_v35, %v632_v48  ;;  %3180 = vrot.lane.b32.xlu2 %v3667_v44, %s3357_s12  ;;  %v3313_v44 = vpack.c.bf16 %v3410_v12, %v3402_v4  ;;  %v3319_v12 = vpack.c.bf16 %v3431_v19, %v3433_v20 }
  0xbc   :  { %2695 = vmatmul.msk.bf16.gmra.mxu2 %vm4650_vm10, %v356_v8  ;;  %2700 = vmatmul.msk.bf16.gmra.mxu3 %vm4650_vm10, %v356_v8 }
  0xbd   :  { %2742 = vmatpush.bf16.msk.msrb.mxu1 %vm2740_vm1, %v2741_v39  ;;  %vm3312_vm1 = vmpackc.low %vm4712_vm5, %vm3358_vm0  ;;  %vm4714_vm5 = vcmp.lt.s32.totalorder %v3536_v10, 15 }
  0xc1   :  { %3185 = vrot.lane.b32.xlu0 %v3442_v23, %s3357_s12  ;;  %v3086_v23 = vpop.permute.xlu1 %3085 }
  0xc2   :  { %v3088_v50 = vunpack.i.h.bf16 %v3086_v23  ;;  %v3087_v45 = vunpack.i.l.bf16 %v3086_v23 }
  0xc3   :  { %2685 = vmatmul.msk.bf16.gmra.mxu0 %vm4650_vm10, %v356_v8  ;;  %2690 = vmatmul.msk.bf16.gmra.mxu1 %vm4650_vm10, %v356_v8 }
  0xc4   :  { %v635_v49 = vsel %vm4645_vm11, %v3088_v50, %v3083_v9  ;;  %v631_v18 = vsel %vm4645_vm11, %v3087_v45, %v3082_v24  ;;  %vm4715_vm11 = vcmp.lt.s32.totalorder %v3546_v28, 15 }
  0xc5   :  { %v2736_v51 = vpack.c.bf16 %v635_v49, %v631_v18  ;;  %vm2792_vm14 = vmpackc.low %vm4715_vm11, %vm4715_vm11 }
  0xc7   :  { %2737 = vmatpush.bf16.msk.msrb.mxu0 %vm2735_vm8, %v2736_v51  ;;  %vm4713_vm8 = vcmp.lt.s32.totalorder %v3504_v57, 15  ;;  %v2757_v51 = vld [vmem:[%s4627_s2 + $0x38] sm:$0xf] }
  0xc8   :  { %vm2782_vm0 = vmpackc.low %vm4713_vm8, %vm4713_vm8  ;;  %v774_v1 = vunpack.c.l.b16 %v2757_v51  ;;  %vm4648_vm8 = vcmask 924672  }
  0xc9   :  { %v3101_v9 = vpop.permute.xlu1 %3100 }
  0xca   :  { %v3103_v29 = vunpack.i.h.bf16 %v3101_v9  ;;  %v3102_v30 = vunpack.i.l.bf16 %v3101_v9 }
  0xcc   :  { %2721 = vmatmul.msk.bf16.vlgmr.msra.gmra.mxu2 %vm4650_vm10, %v2932_v25  ;;  %2726 = vmatmul.msk.bf16.vlgmr.msra.gmra.mxu3 %vm4650_vm10, %v2932_v25  ;;  %v3091_v6 = vpop.permute.xlu2 %3090  ;;  %v923_v48 = vsel %vm4647_vm15, %v3102_v30, %v3103_v29 }
  0xcd   :  { %3314 = vmatpush.bf16.msk.msra.mxu2 %vm3312_vm1, %v3313_v44  ;;  %3317 = vmatpush.bf16.msk.msra.mxu3 %vm3312_vm1, %v3316_v55  ;;  %v3092_v7 = vunpack.i.l.bf16 %v3091_v6  ;;  %v3093_v19 = vunpack.i.h.bf16 %v3091_v6 }
  0xcf   :  { %v918_v24 = vsel %vm4647_vm15, %v3092_v7, %v3093_v19 }
  0xd3   :  { %2711 = vmatmul.msk.bf16.vlgmr.msra.gmra.mxu0 %vm4650_vm10, %v2932_v25  ;;  %2716 = vmatmul.msk.bf16.vlgmr.msra.gmra.mxu1 %vm4650_vm10, %v2932_v25 }
  0xd4   :  { %3320 = vmatpush.bf16.msk.msra.mxu0 %vm3312_vm1, %v3319_v12  ;;  %3323 = vmatpush.bf16.msk.msra.mxu1 %vm3312_vm1, %v3322_v13  ;;  %vm2787_vm1 = vmpackc.low %vm4714_vm5, %vm4714_vm5  ;;  %vm4651_vm5 = vcmp.lt.s32.totalorder %v3494_v42, 15 }
  0xdc   :  { %2722 = vmatmul.msk.bf16.gmra.mxu2 %vm4650_vm10, %v511_v54  ;;  %2727 = vmatmul.msk.bf16.gmra.mxu3 %vm4650_vm10, %v511_v54 }
  0xe3   :  { %2712 = vmatmul.msk.bf16.gmra.mxu0 %vm4650_vm10, %v511_v54  ;;  %2717 = vmatmul.msk.bf16.gmra.mxu1 %vm4650_vm10, %v511_v54 }
  0xe4   :  { %v3116_v33 = vpop.permute.xlu1 %3115 }
  0xe5   :  { %v3118_v6 = vunpack.i.h.bf16 %v3116_v33 }
  0xec   :  { %2748 = vmatmul.msk.bf16.vlgmr.msrb.gmra.mxu2 %vm4650_vm10, %v2933_v60  ;;  %2753 = vmatmul.msk.bf16.vlgmr.msrb.gmra.mxu3 %vm4650_vm10, %v2933_v60  ;;  %v3106_v59 = vpop.permute.xlu2 %3105 }
  0xed   :  { %v3107_v8 = vunpack.i.l.bf16 %v3106_v59  ;;  %v3108_v52 = vunpack.i.h.bf16 %v3106_v59 }
  0xef   :  { %v917_v26 = vsel %vm4647_vm15, %v3107_v8, %v3092_v7  ;;  %v3117_v7 = vunpack.i.l.bf16 %v3116_v33 }
  0xf3   :  { %2738 = vmatmul.msk.bf16.vlgmr.msrb.gmra.mxu0 %vm4650_vm10, %v2933_v60  ;;  %2743 = vmatmul.msk.bf16.vlgmr.msrb.gmra.mxu1 %vm4650_vm10, %v2933_v60  ;;  %v776_v60 = vpack.c.b16 %v774_v1, %v774_v1 }
  0xfc   :  { %2749 = vmatmul.msk.bf16.gmra.mxu2 %vm4650_vm10, %v670_v2  ;;  %2754 = vmatmul.msk.bf16.gmra.mxu3 %vm4650_vm10, %v670_v2 }
 0x103   :  { %2739 = vmatmul.msk.bf16.gmra.mxu0 %vm4650_vm10, %v670_v2  ;;  %2744 = vmatmul.msk.bf16.gmra.mxu1 %vm4650_vm10, %v670_v2  ;;  %v3096_v16 = vpop.permute.xlu0 %3095 }
 0x104   :  { %v3098_v17 = vunpack.i.h.bf16 %v3096_v16  ;;  %v3097_v22 = vunpack.i.l.bf16 %v3096_v16 }
 0x106   :  { %v919_v31 = vsel %vm4647_vm15, %v3093_v19, %v3097_v22  ;;  %v921_v32 = vsel %vm4647_vm15, %v3108_v52, %v3098_v17  ;;  %v922_v58 = vsel %vm4647_vm15, %v3098_v17, %v3102_v30  ;;  %v3121_v19 = vpop.permute.xlu2 %3120  ;;  %v3131_v22 = vpop.permute.xlu1 %3130 }
 0x107   :  { %v2783_v27 = vpack.c.bf16 %v921_v32, %v917_v26  ;;  %v2788_v35 = vpack.c.bf16 %v922_v58, %v918_v24  ;;  %v2793_v36 = vpack.c.bf16 %v923_v48, %v919_v31  ;;  %v3123_v16 = vunpack.i.h.bf16 %v3121_v19 }
 0x108   :  { %v3122_v17 = vunpack.i.l.bf16 %v3121_v19  ;;  %v3133_v26 = vunpack.i.h.bf16 %v3131_v22  ;;  %v3132_v9 = vunpack.i.l.bf16 %v3131_v22  ;;  %v1085_v24 = vsel %vm4648_vm8, %v3117_v7, %v3118_v6 }
 0x109   :  { %2784 = vmatpush.bf16.msk.msrb.mxu1 %vm2782_vm0, %v2783_v27  ;;  %2789 = vmatpush.bf16.msk.msrb.mxu2 %vm2787_vm1, %v2788_v35  ;;  %vm4649_vm0 = vcmp.lt.s32.totalorder %v3518_v0, 15  ;;  %vm4717_vm1 = vcmp.ge.s32.totalorder %v3504_v57, 1 }
 0x10a   :  { %2794 = vmatpush.bf16.msk.msrb.mxu3 %vm2792_vm14, %v2793_v36  ;;  %vm4716_vm14 = vcmp.lt.s32.totalorder %v3572_v37, 15  ;;  %v1088_v30 = vsel %vm4648_vm8, %v3133_v26, %v3123_v16  ;;  %v1084_v31 = vsel %vm4648_vm8, %v3132_v9, %v3117_v7  ;;  %v1086_v27 = vsel %vm4648_vm8, %v3118_v6, %v3122_v17 }
 0x10b   :  { %v3111_v38 = vpop.permute.xlu0 %3110  ;;  %vm2777_vm11 = vmpackc.low %vm4716_vm14, %vm4716_vm14  ;;  %v2810_v58 = vpack.c.bf16 %v1088_v30, %v1084_v31  ;;  %v4718_v36 = vmov 0 }
 0x10c   :  { %2766 = vmatmul.msk.bf16.vlgmr.msra.gmra.mxu2 %vm4650_vm10, %v2934_v34  ;;  %2768 = vmatmul.msk.bf16.vlgmr.msra.gmra.mxu3 %vm4650_vm10, %v2934_v34  ;;  %v3113_v39 = vunpack.i.h.bf16 %v3111_v38  ;;  %v3112_v40 = vunpack.i.l.bf16 %v3111_v38  ;;  %vm3890_vm14 = vmand %vm4649_vm0, %vm4717_vm1 }
 0x10d   :  { %v4719_v36 = vsel %vm3890_vm14, 4294967295, %v4718_v36 }
 0x10e   :  { %v916_v41 = vsel %vm4647_vm15, %v3112_v40, %v3107_v8  ;;  %v920_v23 = vsel %vm4647_vm15, %v3113_v39, %v3108_v52  ;;  %4720 = vst [vmem:[#allocation12_spill] sm:$0xff] %v4719_v36  ;;  %v2935_v40 = vld [vmem:[%s4627_s2 + $0x3c] sm:$0xff]  ;;  %vm2809_vm15 = vmpackc.low %vm3890_vm14, %vm3890_vm14 }
 0x10f   :  { %v3842_v50 = vpop.f32.mrf.mxu2  ;;  %v3844_v45 = vpop.f32.mrf.mxu3  ;;  %v2778_v25 = vpack.c.bf16 %v920_v23, %v916_v41  ;;  %v4722_v23 = vmov 0 }
 0x110   :  { %v3846_v49 = vpop.f32.mrf.mxu0  ;;  %v3848_v18 = vpop.f32.mrf.mxu1 }
 0x111   :  { %2779 = vmatpush.bf16.msk.msrb.mxu0 %vm2777_vm11, %v2778_v25  ;;  %vm4655_vm11 = vcmp.lt.s32.totalorder %v3497_v43, 15  ;;  %v3136_v25 = vpop.permute.xlu2 %3135 }
 0x112   :  { %v3138_v51 = vunpack.i.h.bf16 %v3136_v25  ;;  %v3137_v1 = vunpack.i.l.bf16 %v3136_v25 }
 0x113   :  { %2762 = vmatmul.msk.bf16.vlgmr.msra.gmra.mxu0 %vm4650_vm10, %v2934_v34  ;;  %2764 = vmatmul.msk.bf16.vlgmr.msra.gmra.mxu1 %vm4650_vm10, %v2934_v34  ;;  %v3126_v59 = vpop.permute.xlu0 %3125 }
 0x114   :  { %v3128_v8 = vunpack.i.h.bf16 %v3126_v59  ;;  %v3127_v52 = vunpack.i.l.bf16 %v3126_v59  ;;  %2811 = vmatpush.bf16.msk.msra.mxu1 %vm2809_vm15, %v2810_v58  ;;  %v1083_v33 = vsel %vm4731_vm7, %v3137_v1, %v3132_v9 }
 0x116   :  { %v1089_v29 = vsel %vm4648_vm8, %v3123_v16, %v3127_v52  ;;  %v1090_v32 = vsel %vm4648_vm8, %v3127_v52, %v3128_v8  ;;  %vm4721_vm8 = vcmp.ge.s32.totalorder %v3536_v10, 1  ;;  %v4734_v8 = vmov 0 }
 0x117   :  { %v3858_v15 = vpop.f32.mrf.mxu2  ;;  %v3860_v54 = vpop.f32.mrf.mxu3  ;;  %v2815_v35 = vpack.c.bf16 %v1089_v29, %v1085_v24  ;;  %v2820_v41 = vpack.c.bf16 %v1090_v32, %v1086_v27  ;;  %vm3905_vm1 = vmand %vm4651_vm5, %vm4721_vm8  ;;  %vm4656_vm8 = vcmp.lt.s32.totalorder %v3516_v63, 15  ;;  %vm4729_vm5 = vcmask 130048  }
 0x118   :  { %v3862_v44 = vpop.f32.mrf.mxu0  ;;  %v3864_v55 = vpop.f32.mrf.mxu1  ;;  %v4723_v23 = vsel %vm3905_vm1, 4294967295, %v4722_v23  ;;  %vm2814_vm0 = vmpackc.low %vm3905_vm1, %vm3905_vm1 }
 0x119   :  { %4724 = vst [vmem:[#allocation13_spill] sm:$0xff] %v4723_v23  ;;  %2816 = vmatpush.bf16.msk.msra.mxu2 %vm2814_vm0, %v2815_v35  ;;  %vm4730_vm14 = vmmov %vm4729_vm5 }
 0x11a   :  { %vm4732_vm0 = vmmov %vm4731_vm7 }
 0x11b   :  { %v1087_v6 = vsel %vm4732_vm0, %v3138_v51, %v3133_v26  ;;  %v3151_v51 = vpop.permute.xlu2 %3150 }
 0x11c   :  { %2767 = vmatmul.msk.bf16.gmra.mxu2 %vm4650_vm10, %v776_v60  ;;  %2769 = vmatmul.msk.bf16.gmra.mxu3 %vm4650_vm10, %v776_v60  ;;  %v2805_v7 = vpack.c.bf16 %v1087_v6, %v1083_v33  ;;  %v3153_v6 = vunpack.i.h.bf16 %v3151_v51 }
 0x11f   :  { %v3868_v12 = vpop.f32.mrf.mxu2  ;;  %v3870_v13 = vpop.f32.mrf.mxu3 }
 0x120   :  { %v3872_v47 = vpop.f32.mrf.mxu0  ;;  %v3874_v2 = vpop.f32.mrf.mxu1 }
 0x123   :  { %2763 = vmatmul.msk.bf16.gmra.mxu0 %vm4650_vm10, %v776_v60  ;;  %2765 = vmatmul.msk.bf16.gmra.mxu1 %vm4650_vm10, %v776_v60  ;;  %vm4725_vm10 = vcmp.ge.s32.totalorder %v3546_v28, 1  ;;  %v4726_v60 = vmov 0 }
 0x124   :  { %vm3916_vm15 = vmand %vm4655_vm11, %vm4725_vm10  ;;  %vm4733_vm10 = vcmp.ge.s32.totalorder %v3572_v37, 1 }
 0x125   :  { %v4727_v60 = vsel %vm3916_vm15, 4294967295, %v4726_v60  ;;  %vm2819_vm1 = vmpackc.low %vm3916_vm15, %vm3916_vm15  ;;  %vm4747_vm15 = vcmask 916480  }
 0x126   :  { %4728 = vst [vmem:[#allocation14_spill] sm:$0xff] %v4727_v60  ;;  %2821 = vmatpush.bf16.msk.msra.mxu3 %vm2819_vm1, %v2820_v41  ;;  %vm3932_vm11 = vmand %vm4656_vm8, %vm4733_vm10  ;;  %vm4657_vm10 = vcmask 916480  }
 0x127   :  { %v329_v48 = vpop.f32.mrf.mxu2  ;;  %v347_v34 = vpop.f32.mrf.mxu3  ;;  %v4735_v8 = vsel %vm3932_vm11, 4294967295, %v4734_v8  ;;  %vm2804_vm7 = vmpackc.low %vm3932_vm11, %vm3932_vm11 }
 0x128   :  { %v293_v38 = vpop.f32.mrf.mxu0  ;;  %v311_v39 = vpop.f32.mrf.mxu1  ;;  %4736 = vst [vmem:[#allocation15_spill] sm:$0xff] %v4735_v8  ;;  %2806 = vmatpush.bf16.msk.msra.mxu0 %vm2804_vm7, %v2805_v7  ;;  %vm4738_vm1 = vmmov %vm4729_vm5  ;;  %v3152_v7 = vunpack.i.l.bf16 %v3151_v51 }
 0x129   :  { %v3141_v48 = vpop.permute.xlu0 %3140  ;;  %vm4739_vm0 = vmmov %vm4738_vm1 }
 0x12a   :  { %v3143_v35 = vunpack.i.h.bf16 %v3141_v48  ;;  %v3142_v38 = vunpack.i.l.bf16 %v3141_v48  ;;  %vm4740_vm7 = vmmov %vm4739_vm0 }
 0x12c   :  { %2790 = vmatmul.msk.bf16.vlgmr.msrb.gmra.mxu2 %vm4729_vm5, %v2935_v40  ;;  %2795 = vmatmul.msk.bf16.vlgmr.msrb.gmra.mxu3 %vm4730_vm14, %v2935_v40  ;;  %vm4737_vm14 = vmmov %vm4729_vm5 }
 0x12f   :  { %v408_v59 = vpop.f32.mrf.mxu2  ;;  %v426_v19 = vpop.f32.mrf.mxu3 }
 0x130   :  { %v3937_v52 = vadd.f32 %v408_v59, %v3842_v50  ;;  %v3940_v16 = vadd.f32 %v426_v19, %v3844_v45  ;;  %v372_v17 = vpop.f32.mrf.mxu0  ;;  %v390_v22 = vpop.f32.mrf.mxu1  ;;  %v2772_v50 = vld [vmem:[%s4627_s2 + $0x44] sm:$0xf] }
 0x131   :  { %v3946_v26 = vadd.f32 %v372_v17, %v3846_v49  ;;  %v3949_v9 = vadd.f32 %v390_v22, %v3848_v18  ;;  %v953_v45 = vunpack.c.l.b16 %v2772_v50  ;;  %v3156_v25 = vpop.permute.xlu0 %3155 }
 0x132   :  { %v3158_v1 = vunpack.i.h.bf16 %v3156_v25  ;;  %v3157_v33 = vunpack.i.l.bf16 %v3156_v25 }
 0x133   :  { %2780 = vmatmul.msk.bf16.vlgmr.msrb.gmra.mxu0 %vm4729_vm5, %v2935_v40  ;;  %2785 = vmatmul.msk.bf16.vlgmr.msrb.gmra.mxu1 %vm4737_vm14, %v2935_v40  ;;  %v955_v32 = vpack.c.b16 %v953_v45, %v953_v45  ;;  %vm4741_vm5 = vmmov %vm4739_vm0  ;;  %vm4742_vm14 = vcmp.lt.s32.totalorder %v3518_v0, 15 }
 0x137   :  { %v410_v24 = vpop.f32.mrf.mxu2  ;;  %v428_v29 = vpop.f32.mrf.mxu3 }
 0x138   :  { %v3957_v30 = vadd.f32 %v410_v24, %v3858_v15  ;;  %v3960_v49 = vadd.f32 %v428_v29, %v3860_v54  ;;  %v374_v18 = vpop.f32.mrf.mxu0  ;;  %v392_v31 = vpop.f32.mrf.mxu1 }
 0x139   :  { %v3963_v27 = vadd.f32 %v374_v18, %v3862_v44  ;;  %v3966_v58 = vadd.f32 %v392_v31, %v3864_v55 }
 0x13c   :  { %2791 = vmatmul.msk.bf16.gmra.mxu2 %vm4738_vm1, %v955_v32  ;;  %2796 = vmatmul.msk.bf16.gmra.mxu3 %vm4739_vm0, %v955_v32  ;;  %vm2836_vm1 = vmpackc.low %vm4742_vm14, %vm4742_vm14  ;;  %vm4743_vm0 = vcmp.lt.s32.totalorder %v3494_v42, 15 }
 0x13d   :  { %vm4748_vm14 = vmmov %vm4747_vm15 }
 0x13f   :  { %v413_v34 = vpop.f32.mrf.mxu2  ;;  %v431_v15 = vpop.f32.mrf.mxu3 }
 0x140   :  { %v3971_v54 = vadd.f32 %v413_v34, %v3868_v12  ;;  %v3974_v39 = vadd.f32 %v431_v15, %v3870_v13  ;;  %v377_v44 = vpop.f32.mrf.mxu0  ;;  %v395_v40 = vpop.f32.mrf.mxu1  ;;  %v1244_v13 = vsel %vm4657_vm10, %v3142_v38, %v3143_v35  ;;  %v2936_v34 = vld [vmem:[%s4627_s2 + $0x48] sm:$0xff] }
 0x141   :  { %v3977_v55 = vadd.f32 %v377_v44, %v3872_v47  ;;  %v3980_v41 = vadd.f32 %v395_v40, %v3874_v2  ;;  %v3146_v12 = vpop.permute.xlu1 %3145  ;;  %v1243_v47 = vsel %vm4657_vm10, %v3157_v33, %v3142_v38  ;;  %v1249_v2 = vsel %vm4657_vm10, %v3152_v7, %v3153_v6 }
 0x142   :  { %v3148_v59 = vunpack.i.h.bf16 %v3146_v12  ;;  %v3147_v19 = vunpack.i.l.bf16 %v3146_v12 }
 0x143   :  { %2781 = vmatmul.msk.bf16.gmra.mxu0 %vm4740_vm7, %v955_v32  ;;  %2786 = vmatmul.msk.bf16.gmra.mxu1 %vm4741_vm5, %v955_v32  ;;  %vm2841_vm7 = vmpackc.low %vm4743_vm0, %vm4743_vm0  ;;  %vm4744_vm5 = vcmp.lt.s32.totalorder %v3497_v43, 15 }
 0x144   :  { %v1247_v17 = vsel %vm4657_vm10, %v3158_v1, %v3148_v59  ;;  %v1248_v22 = vsel %vm4657_vm10, %v3148_v59, %v3152_v7  ;;  %v1245_v50 = vsel %vm4657_vm10, %v3143_v35, %v3147_v19  ;;  %vm2846_vm8 = vmpackc.low %vm4744_vm5, %vm4744_vm5  ;;  %vm4745_vm10 = vcmask 130048  }
 0x145   :  { %v2837_v45 = vpack.c.bf16 %v1247_v17, %v1243_v47  ;;  %v2842_v24 = vpack.c.bf16 %v1248_v22, %v1244_v13  ;;  %v2847_v31 = vpack.c.bf16 %v1249_v2, %v1245_v50  ;;  %vm4746_vm11 = vmmov %vm4745_vm10 }
 0x147   :  { %v415_v29 = vpop.f32.mrf.mxu2  ;;  %v433_v18 = vpop.f32.mrf.mxu3  ;;  %2838 = vmatpush.bf16.msk.msrb.mxu1 %vm2836_vm1, %v2837_v45  ;;  %2843 = vmatpush.bf16.msk.msrb.mxu2 %vm2841_vm7, %v2842_v24  ;;  %vm4751_vm1 = vmmov %vm4746_vm11  ;;  %vm4660_vm7 = vcmask 908288  }
 0x148   :  { %v379_v32 = vpop.f32.mrf.mxu0  ;;  %v397_v48 = vpop.f32.mrf.mxu1  ;;  %2848 = vmatpush.bf16.msk.msrb.mxu3 %vm2846_vm8, %v2847_v31  ;;  %vm4749_vm8 = vcmp.lt.s32.totalorder %v3516_v63, 15  ;;  %vm4752_vm0 = vmmov %vm4751_vm1 }
 0x149   :  { %v3161_v15 = vpop.permute.xlu1 %3160  ;;  %v3166_v24 = vpop.permute.xlu2 %3165  ;;  %vm4753_vm5 = vmmov %vm4752_vm0 }
 0x14a   :  { %v3163_v35 = vunpack.i.h.bf16 %v3161_v15  ;;  %v3162_v38 = vunpack.i.l.bf16 %v3161_v15  ;;  %v3167_v48 = vunpack.i.l.bf16 %v3166_v24  ;;  %v3171_v15 = vpop.permute.xlu0 %3170 }
 0x14c   :  { %2817 = vmatmul.msk.bf16.vlgmr.msra.gmra.mxu2 %vm4745_vm10, %v2936_v34  ;;  %2822 = vmatmul.msk.bf16.vlgmr.msra.gmra.mxu3 %vm4746_vm11, %v2936_v34  ;;  %v1246_v44 = vsel %vm4747_vm15, %v3163_v35, %v3158_v1  ;;  %v1242_v40 = vsel %vm4748_vm14, %v3162_v38, %v3157_v33  ;;  %vm2831_vm10 = vmpackc.low %vm4749_vm8, %vm4749_vm8  ;;  %v3173_v38 = vunpack.i.h.bf16 %v3171_v15  ;;  %vm4755_vm8 = vcmp.lt.s32.totalorder %v3504_v57, 15 }
 0x14d   :  { %v2832_v25 = vpack.c.bf16 %v1246_v44, %v1242_v40  ;;  %vm4750_vm15 = vmmov %vm4746_vm11  ;;  %v3172_v44 = vunpack.i.l.bf16 %v3171_v15  ;;  %v4767_v15 = vmov 0 }
 0x14e   :  { %vm4754_vm14 = vmmov %vm4752_vm0 }
 0x14f   :  { %v563_v51 = vpop.f32.mrf.mxu2  ;;  %v581_v6 = vpop.f32.mrf.mxu3  ;;  %2833 = vmatpush.bf16.msk.msrb.mxu0 %vm2831_vm10, %v2832_v25  ;;  %vm4756_vm10 = vcmp.lt.s32.totalorder %v3518_v0, 15 }
 0x150   :  { %v4007_v7 = vadd.f32 %v563_v51, %v3937_v52  ;;  %v4010_v12 = vadd.f32 %v581_v6, %v3940_v16  ;;  %v527_v13 = vpop.f32.mrf.mxu0  ;;  %v545_v59 = vpop.f32.mrf.mxu1  ;;  %v2799_v52 = vld [vmem:[%s4627_s2 + $0x50] sm:$0xf] }
 0x151   :  { %v4016_v19 = vadd.f32 %v527_v13, %v3946_v26  ;;  %v4019_v1 = vadd.f32 %v545_v59, %v3949_v9  ;;  %v1120_v16 = vunpack.c.l.b16 %v2799_v52  ;;  %v3181_v35 = vpop.permute.xlu2 %3180  ;;  %v3176_v25 = vpop.permute.xlu1 %3175 }
 0x152   :  { %v3182_v40 = vunpack.i.l.bf16 %v3181_v35  ;;  %v3177_v51 = vunpack.i.l.bf16 %v3176_v25 }
 0x153   :  { %2807 = vmatmul.msk.bf16.vlgmr.msra.gmra.mxu0 %vm4746_vm11, %v2936_v34  ;;  %2812 = vmatmul.msk.bf16.vlgmr.msra.gmra.mxu1 %vm4750_vm15, %v2936_v34  ;;  %v1122_v22 = vpack.c.b16 %v1120_v16, %v1120_v16  ;;  %vm4064_vm11 = vmand %vm4756_vm10, %vm4755_vm8  ;;  %vm4765_vm8 = vcmp.lt.s32.totalorder %v3546_v28, 15  ;;  %vm4766_vm10 = vcmp.lt.s32.totalorder %v3497_v43, 15 }
 0x154   :  { %v1411_v59 = vsel %vm4660_vm7, %v3173_v38, %v3177_v51  ;;  %vm2863_vm15 = vmpackc.low %vm4064_vm11, %vm4064_vm11 }
 0x157   :  { %v565_v33 = vpop.f32.mrf.mxu2  ;;  %v583_v47 = vpop.f32.mrf.mxu3 }
 0x158   :  { %v4027_v2 = vadd.f32 %v565_v33, %v3957_v30  ;;  %v4030_v26 = vadd.f32 %v583_v47, %v3960_v49  ;;  %v529_v9 = vpop.f32.mrf.mxu0  ;;  %v547_v17 = vpop.f32.mrf.mxu1 }
 0x159   :  { %v4033_v50 = vadd.f32 %v529_v9, %v3963_v27  ;;  %v4036_v45 = vadd.f32 %v547_v17, %v3966_v58  ;;  %v3168_v27 = vunpack.i.h.bf16 %v3166_v24  ;;  %v4757_v17 = vmov 0 }
 0x15a   :  { %v4758_v17 = vsel %vm4064_vm11, 4294967295, %v4757_v17  ;;  %vm4772_vm11 = vcmask 908288  }
 0x15b   :  { %v1408_v52 = vsel %vm4660_vm7, %v3168_v27, %v3172_v44  ;;  %4759 = vst [vmem:[#allocation16_spill] sm:$0xff] %v4758_v17 }
 0x15c   :  { %2818 = vmatmul.msk.bf16.gmra.mxu2 %vm4751_vm1, %v1122_v22  ;;  %2823 = vmatmul.msk.bf16.gmra.mxu3 %vm4752_vm0, %v1122_v22  ;;  %vm4760_vm1 = vcmp.lt.s32.totalorder %v3536_v10, 15  ;;  %vm4761_vm0 = vcmp.lt.s32.totalorder %v3494_v42, 15 }
 0x15f   :  { %v568_v29 = vpop.f32.mrf.mxu2  ;;  %v586_v30 = vpop.f32.mrf.mxu3 }
 0x160   :  { %v4041_v18 = vadd.f32 %v568_v29, %v3971_v54  ;;  %v4044_v49 = vadd.f32 %v586_v30, %v3974_v39  ;;  %v532_v31 = vpop.f32.mrf.mxu0  ;;  %v550_v32 = vpop.f32.mrf.mxu1  ;;  %v3183_v54 = vunpack.i.h.bf16 %v3181_v35  ;;  %v3178_v39 = vunpack.i.h.bf16 %v3176_v25  ;;  %v2937_v29 = vld [vmem:[%s4627_s2 + $0x54] sm:$0xff] }
 0x161   :  { %v4047_v58 = vadd.f32 %v532_v31, %v3977_v55  ;;  %v4050_v34 = vadd.f32 %v550_v32, %v3980_v41  ;;  %v1407_v55 = vsel %vm4660_vm7, %v3167_v48, %v3168_v27  ;;  %v1406_v41 = vsel %vm4660_vm7, %v3182_v40, %v3167_v48  ;;  %v3186_v32 = vpop.permute.xlu0 %3185 }
 0x162   :  { %v1410_v6 = vsel %vm4660_vm7, %v3183_v54, %v3173_v38  ;;  %v1412_v16 = vsel %vm4660_vm7, %v3177_v51, %v3178_v39  ;;  %v2869_v9 = vpack.c.bf16 %v1411_v59, %v1407_v55  ;;  %v4762_v31 = vmov 0  ;;  %v2826_v59 = vld [vmem:[%s4627_s2 + $0x5c] sm:$0xf] }
 0x163   :  { %2808 = vmatmul.msk.bf16.gmra.mxu0 %vm4753_vm5, %v1122_v22  ;;  %2813 = vmatmul.msk.bf16.gmra.mxu1 %vm4754_vm14, %v1122_v22  ;;  %v2864_v13 = vpack.c.bf16 %v1410_v6, %v1406_v41  ;;  %v2874_v30 = vpack.c.bf16 %v1412_v16, %v1408_v52  ;;  %vm4078_vm5 = vmand %vm4761_vm0, %vm4760_vm1  ;;  %v3188_v27 = vunpack.i.h.bf16 %v3186_v32  ;;  %v3187_v48 = vunpack.i.l.bf16 %v3186_v32 }
 0x164   :  { %v4763_v31 = vsel %vm4078_vm5, 4294967295, %v4762_v31  ;;  %vm2868_vm14 = vmpackc.low %vm4078_vm5, %vm4078_vm5  ;;  %vm4770_vm1 = vcmask 130048   ;;  %v4776_v51 = vmov 0 }
 0x165   :  { %2865 = vmatpush.bf16.msk.msra.mxu1 %vm2863_vm15, %v2864_v13  ;;  %4764 = vst [vmem:[#allocation17_spill] sm:$0xff] %v4763_v31  ;;  %2870 = vmatpush.bf16.msk.msra.mxu2 %vm2868_vm14, %v2869_v9  ;;  %vm4089_vm15 = vmand %vm4766_vm10, %vm4765_vm8  ;;  %v1405_v35 = vsel %vm4772_vm11, %v3187_v48, %v3182_v40  ;;  %vm4774_vm14 = vcmp.lt.s32.totalorder %v3572_v37, 15  ;;  %vm4775_vm8 = vcmp.lt.s32.totalorder %v3516_v63, 15  ;;  %v3359_v48 = vmov 0  }
 0x166   :  { %v4768_v15 = vsel %vm4089_vm15, 4294967295, %v4767_v15  ;;  %vm4771_vm0 = vmmov %vm4770_vm1  ;;  %3189 = vset.pattern.permute.xlu1 %v3359_v48  ;;  %3271 = vset.pattern.permute.xlu0 %v3359_v48 }
 0x167   :  { %v570_v33 = vpop.f32.mrf.mxu2  ;;  %v588_v47 = vpop.f32.mrf.mxu3  ;;  %4769 = vst [vmem:[#allocation18_spill] sm:$0xff] %v4768_v15  ;;  %vm2873_vm7 = vmpackc.low %vm4089_vm15, %vm4089_vm15  ;;  %3270 = vset.pattern.permute.xlu2 %v3359_v48 }
 0x168   :  { %v534_v22 = vpop.f32.mrf.mxu0  ;;  %v552_v24 = vpop.f32.mrf.mxu1  ;;  %vm4773_vm5 = vmmov %vm4772_vm11  ;;  %2875 = vmatpush.bf16.msk.msra.mxu3 %vm2873_vm7, %v2874_v30 }
 0x169   :  { %v1409_v38 = vsel %vm4773_vm5, %v3188_v27, %v3183_v54  ;;  %vm4104_vm10 = vmand %vm4775_vm8, %vm4774_vm14  ;;  %v1536_v27 = vld [vmem:[%s4629_s4 + $0x8] sm:$0xff] }
 0x16a   :  { %v2859_v44 = vpack.c.bf16 %v1409_v38, %v1405_v35  ;;  %v4777_v51 = vsel %vm4104_vm10, 4294967295, %v4776_v51  ;;  %vm2858_vm7 = vmpackc.low %vm4104_vm10, %vm4104_vm10  ;;  %1545 = vperm.xlu1 %3189, %v1536_v27  }
 0x16b   :  { %4778 = vst [vmem:[#allocation19_spill] sm:$0xff] %v4777_v51  ;;  %vm4779_vm11 = vmmov %vm4771_vm0 }
 0x16c   :  { %2844 = vmatmul.msk.bf16.vlgmr.msrb.gmra.mxu2 %vm4770_vm1, %v2937_v29  ;;  %2849 = vmatmul.msk.bf16.vlgmr.msrb.gmra.mxu3 %vm4771_vm0, %v2937_v29  ;;  %vm4780_vm5 = vmmov %vm4771_vm0 }
 0x16d   :  { %2860 = vmatpush.bf16.msk.msra.mxu0 %vm2858_vm7, %v2859_v44  ;;  %vm4781_vm1 = vmmov %vm4771_vm0 }
 0x16e   :  { %vm4782_vm14 = vmmov %vm4771_vm0 }
 0x16f   :  { %v722_v25 = vpop.f32.mrf.mxu2  ;;  %v740_v39 = vpop.f32.mrf.mxu3  ;;  %vm4783_vm8 = vmmov %vm4771_vm0 }
 0x170   :  { %v751_v55 = vadd.f32 %v722_v25, %v4007_v7  ;;  %v752_v6 = vadd.f32 %v740_v39, %v4010_v12  ;;  %v686_v41 = vpop.f32.mrf.mxu0  ;;  %v704_v40 = vpop.f32.mrf.mxu1  ;;  %v1279_v7 = vunpack.c.l.b16 %v2826_v59  ;;  %vm4784_vm7 = vmmov %vm4771_vm0 }
 0x171   :  { %v749_v54 = vadd.f32 %v686_v41, %v4016_v19  ;;  %v750_v13 = vadd.f32 %v704_v40, %v4019_v1 }
 0x172   :  { %v1281_v19 = vpack.c.b16 %v1279_v7, %v1279_v7 }
 0x173   :  { %2834 = vmatmul.msk.bf16.vlgmr.msrb.gmra.mxu0 %vm4779_vm11, %v2937_v29  ;;  %2839 = vmatmul.msk.bf16.vlgmr.msrb.gmra.mxu1 %vm4780_vm5, %v2937_v29  ;;  %vm4785_vm11 = vmmov %vm4771_vm0 }
 0x174   :  { %vm4786_vm5 = vmmov %vm4771_vm0 }
 0x177   :  { %v4120_v12 = vpop.f32.mrf.mxu2  ;;  %v4122_v52 = vpop.f32.mrf.mxu3 }
 0x178   :  { %v4124_v16 = vpop.f32.mrf.mxu0  ;;  %v4126_v33 = vpop.f32.mrf.mxu1 }
 0x17c   :  { %2845 = vmatmul.msk.bf16.gmra.mxu2 %vm4781_vm1, %v1281_v19  ;;  %2850 = vmatmul.msk.bf16.gmra.mxu3 %vm4771_vm0, %v1281_v19  ;;  %vm4787_vm1 = vmmov %vm4771_vm0 }
 0x17f   :  { %v727_v1 = vpop.f32.mrf.mxu2  ;;  %v745_v47 = vpop.f32.mrf.mxu3 }
 0x180   :  { %v759_v9 = vadd.f32 %v727_v1, %v4041_v18  ;;  %v760_v22 = vadd.f32 %v745_v47, %v4044_v49  ;;  %v691_v24 = vpop.f32.mrf.mxu0  ;;  %v709_v29 = vpop.f32.mrf.mxu1 }
 0x181   :  { %v757_v30 = vadd.f32 %v691_v24, %v4047_v58  ;;  %v758_v32 = vadd.f32 %v709_v29, %v4050_v34  ;;  %v2938_v58 = vld [vmem:[%s4627_s2 + $0x60] sm:$0xff] }
 0x183   :  { %2835 = vmatmul.msk.bf16.gmra.mxu0 %vm4782_vm14, %v1281_v19  ;;  %2840 = vmatmul.msk.bf16.gmra.mxu1 %vm4783_vm8, %v1281_v19  ;;  %v2853_v19 = vld [vmem:[%s4627_s2 + $0x68] sm:$0xf]  ;;  %vm4788_vm14 = vmmov %vm4771_vm0 }
 0x184   :  { %v1442_v1 = vunpack.c.l.b16 %v2853_v19  ;;  %vm4789_vm8 = vmmov %vm4771_vm0 }
 0x187   :  { %v729_v18 = vpop.f32.mrf.mxu2  ;;  %v747_v49 = vpop.f32.mrf.mxu3 }
 0x188   :  { %v693_v35 = vpop.f32.mrf.mxu0  ;;  %v711_v38 = vpop.f32.mrf.mxu1 }
 0x18c   :  { %2871 = vmatmul.msk.bf16.vlgmr.msra.gmra.mxu2 %vm4784_vm7, %v2938_v58  ;;  %2876 = vmatmul.msk.bf16.vlgmr.msra.gmra.mxu3 %vm4785_vm11, %v2938_v58  ;;  %vm4790_vm7 = vmmov %vm4771_vm0 }
 0x18f   :  { %v828_v34 = vpop.f32.mrf.mxu2  ;;  %v846_v44 = vpop.f32.mrf.mxu3 }
 0x190   :  { %v857_v25 = vadd.f32 %v828_v34, %v751_v55  ;;  %v858_v39 = vadd.f32 %v846_v44, %v752_v6  ;;  %v792_v41 = vpop.f32.mrf.mxu0  ;;  %v810_v40 = vpop.f32.mrf.mxu1  ;;  %v1444_v6 = vpack.c.b16 %v1442_v1, %v1442_v1 }
 0x191   :  { %v855_v59 = vadd.f32 %v792_v41, %v749_v54  ;;  %v856_v7 = vadd.f32 %v810_v40, %v750_v13 }
 0x193   :  { %2861 = vmatmul.msk.bf16.vlgmr.msra.gmra.mxu0 %vm4786_vm5, %v2938_v58  ;;  %2866 = vmatmul.msk.bf16.vlgmr.msra.gmra.mxu1 %vm4787_vm1, %v2938_v58 }
 0x197   :  { %v4149_v47 = vpop.f32.mrf.mxu2  ;;  %v4151_v24 = vpop.f32.mrf.mxu3 }
 0x198   :  { %v4153_v29 = vpop.f32.mrf.mxu0  ;;  %v4155_v55 = vpop.f32.mrf.mxu1 }
 0x19c   :  { %2872 = vmatmul.msk.bf16.gmra.mxu2 %vm4771_vm0, %v1444_v6  ;;  %2877 = vmatmul.msk.bf16.gmra.mxu3 %vm4788_vm14, %v1444_v6 }
 0x19f   :  { %v833_v54 = vpop.f32.mrf.mxu2  ;;  %v851_v13 = vpop.f32.mrf.mxu3 }
 0x1a0   :  { %v865_v27 = vadd.f32 %v833_v54, %v759_v9  ;;  %v866_v48 = vadd.f32 %v851_v13, %v760_v22  ;;  %v797_v18 = vpop.f32.mrf.mxu0  ;;  %v815_v49 = vpop.f32.mrf.mxu1 }
 0x1a1   :  { %v863_v35 = vadd.f32 %v797_v18, %v757_v30  ;;  %v864_v38 = vadd.f32 %v815_v49, %v758_v32 }
 0x1a3   :  { %2862 = vmatmul.msk.bf16.gmra.mxu0 %vm4789_vm8, %v1444_v6  ;;  %2867 = vmatmul.msk.bf16.gmra.mxu1 %vm4790_vm7, %v1444_v6 }
 0x1a7   :  { %v835_v58 = vpop.f32.mrf.mxu2  ;;  %v853_v34 = vpop.f32.mrf.mxu3 }
 0x1a8   :  { %v799_v44 = vpop.f32.mrf.mxu0  ;;  %v817_v41 = vpop.f32.mrf.mxu1 }
 0x1af   :  { %v1007_v40 = vpop.f32.mrf.mxu2  ;;  %v1025_v19 = vpop.f32.mrf.mxu3 }
 0x1b0   :  { %v1036_v1 = vadd.f32 %v1007_v40, %v857_v25  ;;  %v1037_v17 = vadd.f32 %v1025_v19, %v858_v39  ;;  %v971_v51 = vpop.f32.mrf.mxu0  ;;  %v989_v15 = vpop.f32.mrf.mxu1 }
 0x1b1   :  { %v1034_v9 = vadd.f32 %v971_v51, %v855_v59  ;;  %v1035_v22 = vadd.f32 %v989_v15, %v856_v7 }
 0x1b7   :  { %v4161_v54 = vpop.f32.mrf.mxu2  ;;  %v4163_v30 = vpop.f32.mrf.mxu3 }
 0x1b8   :  { %v4165_v32 = vpop.f32.mrf.mxu0  ;;  %v4167_v13 = vpop.f32.mrf.mxu1 }
 0x1bf   :  { %v1012_v6 = vpop.f32.mrf.mxu2  ;;  %v1030_v18 = vpop.f32.mrf.mxu3 }
 0x1c0   :  { %v1044_v49 = vadd.f32 %v1012_v6, %v865_v27  ;;  %v1045_v58 = vadd.f32 %v1030_v18, %v866_v48  ;;  %v976_v34 = vpop.f32.mrf.mxu0  ;;  %v994_v44 = vpop.f32.mrf.mxu1 }
 0x1c1   :  { %v1042_v25 = vadd.f32 %v976_v34, %v863_v35  ;;  %v1043_v39 = vadd.f32 %v994_v44, %v864_v38 }
 0x1c7   :  { %v1014_v41 = vpop.f32.mrf.mxu2  ;;  %v1032_v40 = vpop.f32.mrf.mxu3 }
 0x1c8   :  { %v978_v51 = vpop.f32.mrf.mxu0  ;;  %v996_v15 = vpop.f32.mrf.mxu1 }
 0x1cf   :  { %v1174_v59 = vpop.f32.mrf.mxu2  ;;  %v1192_v7 = vpop.f32.mrf.mxu3 }
 0x1d0   :  { %v1203_v19 = vadd.f32 %v1174_v59, %v1036_v1  ;;  %v1204_v31 = vadd.f32 %v1192_v7, %v1037_v17  ;;  %v1138_v36 = vpop.f32.mrf.mxu0  ;;  %v1156_v8 = vpop.f32.mrf.mxu1 }
 0x1d1   :  { %v1201_v60 = vadd.f32 %v1138_v36, %v1034_v9  ;;  %v1202_v23 = vadd.f32 %v1156_v8, %v1035_v22 }
 0x1d7   :  { %v1176_v57 = vpop.f32.mrf.mxu2  ;;  %v1194_v37 = vpop.f32.mrf.mxu3 }
 0x1d8   :  { %v1140_v27 = vpop.f32.mrf.mxu0  ;;  %v1158_v48 = vpop.f32.mrf.mxu1 }
 0x1df   :  { %v1179_v6 = vpop.f32.mrf.mxu2  ;;  %v1197_v18 = vpop.f32.mrf.mxu3 }
 0x1e0   :  { %v1211_v35 = vadd.f32 %v1179_v6, %v1044_v49  ;;  %v1212_v38 = vadd.f32 %v1197_v18, %v1045_v58  ;;  %v1143_v34 = vpop.f32.mrf.mxu0  ;;  %v1161_v44 = vpop.f32.mrf.mxu1 }
 0x1e1   :  { %v1209_v41 = vadd.f32 %v1143_v34, %v1042_v25  ;;  %v1210_v40 = vadd.f32 %v1161_v44, %v1043_v39 }
 0x1e7   :  { %v1181_v51 = vpop.f32.mrf.mxu2  ;;  %v1199_v15 = vpop.f32.mrf.mxu3 }
 0x1e8   :  { %v1145_v1 = vpop.f32.mrf.mxu0  ;;  %v1163_v17 = vpop.f32.mrf.mxu1 }
 0x1ef   :  { %v1333_v59 = vpop.f32.mrf.mxu2  ;;  %v1351_v7 = vpop.f32.mrf.mxu3 }
 0x1f0   :  { %v1362_v36 = vadd.f32 %v1333_v59, %v1203_v19  ;;  %v1363_v8 = vadd.f32 %v1351_v7, %v1204_v31  ;;  %v1297_v9 = vpop.f32.mrf.mxu0  ;;  %v1315_v22 = vpop.f32.mrf.mxu1  ;;  %v753_v59 = vadd.f32 %v4124_v16, %v4033_v50 }
 0x1f1   :  { %v1360_v28 = vadd.f32 %v1297_v9, %v1201_v60  ;;  %v1361_v46 = vadd.f32 %v1315_v22, %v1202_v23  ;;  %v755_v60 = vadd.f32 %v4120_v12, %v4027_v2  ;;  %v756_v23 = vadd.f32 %v4122_v52, %v4030_v26 }
 0x1f2   :  { %v859_v26 = vadd.f32 %v4153_v29, %v753_v59 }
 0x1f7   :  { %v1335_v5 = vpop.f32.mrf.mxu2  ;;  %v1353_v61 = vpop.f32.mrf.mxu3 }
 0x1f8   :  { %v1299_v49 = vpop.f32.mrf.mxu0  ;;  %v1317_v58 = vpop.f32.mrf.mxu1 }
 0x1ff   :  { %v1338_v6 = vpop.f32.mrf.mxu2  ;;  %v1356_v18 = vpop.f32.mrf.mxu3 }
 0x200   :  { %v1370_v25 = vadd.f32 %v1338_v6, %v1211_v35  ;;  %v1371_v39 = vadd.f32 %v1356_v18, %v1212_v38  ;;  %v1302_v34 = vpop.f32.mrf.mxu0  ;;  %v1320_v44 = vpop.f32.mrf.mxu1  ;;  %v754_v35 = vadd.f32 %v4126_v33, %v4036_v45 }
 0x201   :  { %v1368_v51 = vadd.f32 %v1302_v34, %v1209_v41  ;;  %v1369_v15 = vadd.f32 %v1320_v44, %v1210_v40  ;;  %v861_v41 = vadd.f32 %v4149_v47, %v755_v60  ;;  %v862_v40 = vadd.f32 %v4151_v24, %v756_v23  ;;  %v1546_v44 = vpop.permute.xlu1 %1545 }
 0x202   :  { %v860_v52 = vadd.f32 %v4155_v55, %v754_v35  ;;  %v1038_v47 = vadd.f32 %v4165_v32, %v859_v26 }
 0x203   :  { %v1040_v45 = vadd.f32 %v4161_v54, %v861_v41  ;;  %v1041_v33 = vadd.f32 %v4163_v30, %v862_v40 }
 0x204   :  { %v1039_v24 = vadd.f32 %v4167_v13, %v860_v52  ;;  %v1205_v6 = vadd.f32 %v1140_v27, %v1038_v47 }
 0x206   :  { %v1206_v18 = vadd.f32 %v1158_v48, %v1039_v24  ;;  %v1364_v55 = vadd.f32 %v1299_v49, %v1205_v6 }
 0x207   :  { %v1340_v1 = vpop.f32.mrf.mxu2  ;;  %v1358_v17 = vpop.f32.mrf.mxu3 }
 0x208   :  { %v1304_v19 = vpop.f32.mrf.mxu0  ;;  %v1322_v31 = vpop.f32.mrf.mxu1 }
 0x20f   :  { %v1496_v38 = vpop.f32.mrf.mxu2  ;;  %v1514_v7 = vpop.f32.mrf.mxu3 }
 0x210   :  { %v4179_v9 = vadd.f32 %v1496_v38, %v1362_v36  ;;  %v4181_v22 = vadd.f32 %v1514_v7, %v1363_v8  ;;  %v1460_v2 = vpop.f32.mrf.mxu0  ;;  %v1478_v12 = vpop.f32.mrf.mxu1  ;;  %v1207_v36 = vadd.f32 %v1176_v57, %v1040_v45  ;;  %v1208_v8 = vadd.f32 %v1194_v37, %v1041_v33 }
 0x211   :  { %v4185_v50 = vadd.f32 %v1460_v2, %v1360_v28  ;;  %v4187_v16 = vadd.f32 %v1478_v12, %v1361_v46  ;;  %v1365_v28 = vadd.f32 %v1317_v58, %v1206_v18 }
 0x212   :  { %v1366_v34 = vadd.f32 %v1335_v5, %v1207_v36  ;;  %v1367_v29 = vadd.f32 %v1353_v61, %v1208_v8 }
 0x217   :  { %v1498_v1 = vpop.f32.mrf.mxu2  ;;  %v1516_v46 = vpop.f32.mrf.mxu3 }
 0x218   :  { %v1529_v17 = vadd.f32 %v1498_v1, %v1366_v34  ;;  %v1530_v19 = vadd.f32 %v1516_v46, %v1367_v29  ;;  %v1462_v54 = vpop.f32.mrf.mxu0  ;;  %v1480_v31 = vpop.f32.mrf.mxu1  ;;  %v1537_v1 = vld [vmem:[%s4629_s4 + $0x10] sm:$0xff] }
 0x219   :  { %v1527_v30 = vadd.f32 %v1462_v54, %v1364_v55  ;;  %v1528_v60 = vadd.f32 %v1480_v31, %v1365_v28 }
 0x21a   :  { %v1559_v32 = vadd.f32 %v1546_v44, %v1529_v17  ;;  %v1560_v23 = vadd.f32 %v1546_v44, %v1530_v19 }
 0x21b   :  { %v1557_v13 = vadd.f32 %v1546_v44, %v1527_v30  ;;  %v1558_v57 = vadd.f32 %v1546_v44, %v1528_v60 }
 0x21c   :  { %v2884_v37 = vmul.f32 -1.442695, %v1559_v32  ;;  %v2885_v27 = vmul.f32 -1.442695, %v1560_v23 }
 0x21d   :  { %v2882_v48 = vmul.f32 -1.442695, %v1557_v13  ;;  %v2883_v5 = vmul.f32 -1.442695, %v1558_v57 }
 0x21e   :  { %3272 = vpow2.f32 %v2884_v37 }
 0x21f   :  { %3274 = vpow2.f32 %v2885_v27  ;;  %v1501_v61 = vpop.f32.mrf.mxu2  ;;  %v1519_v49 = vpop.f32.mrf.mxu3 }
 0x220   :  { %3276 = vpow2.f32 %v2882_v48  ;;  %v4193_v58 = vadd.f32 %v1501_v61, %v1370_v25  ;;  %v4195_v59 = vadd.f32 %v1519_v49, %v1371_v39  ;;  %v1465_v35 = vpop.f32.mrf.mxu0  ;;  %v1483_v38 = vpop.f32.mrf.mxu1 }
 0x221   :  { %3278 = vpow2.f32 %v2883_v5  ;;  %v4197_v7 = vadd.f32 %v1465_v35, %v1368_v51  ;;  %v4199_v41 = vadd.f32 %v1483_v38, %v1369_v15 }
 0x224   :  { %v3273_v40 = vpop.eup %3272 }
 0x225   :  { %v3275_v2 = vpop.eup %3274  ;;  %v1655_v12 = vadd.f32 1.0, %v3273_v40 }
 0x226   :  { %v3277_v26 = vpop.eup %3276  ;;  %v1656_v52 = vadd.f32 1.0, %v3275_v2 }
 0x227   :  { %v3279_v45 = vpop.eup %3278  ;;  %3280 = vrcp.f32 %v1655_v12  ;;  %v1503_v33 = vpop.f32.mrf.mxu2  ;;  %v1653_v24 = vadd.f32 1.0, %v3277_v26  ;;  %v1696_v8 = vand.u32 2147483647, %v1655_v12  ;;  %v1698_v18 = vand.u32 2147483648, %v1655_v12 }
 0x228   :  { %v1521_v47 = vpop.f32.mrf.mxu3  ;;  %3282 = vrcp.f32 %v1656_v52  ;;  %v1467_v25 = vpop.f32.mrf.mxu0  ;;  %v1654_v36 = vadd.f32 1.0, %v3279_v45  ;;  %v1711_v29 = vand.u32 2147483647, %v1656_v52  ;;  %v1713_v55 = vand.u32 2147483648, %v1656_v52 }
 0x229   :  { %v1485_v39 = vpop.f32.mrf.mxu1  ;;  %3284 = vrcp.f32 %v1653_v24  ;;  %vm1692_vm11 = vweird.f32 %v1655_v12  ;;  %vm4201_vm5 = vcmp.eq.f32.partialorder %v1696_v8, 8.507059e+37  ;;  %vm1707_vm1 = vweird.f32 %v1656_v52 }
 0x22a   :  { %3286 = vrcp.f32 %v1654_v36  ;;  %v1699_v54 = vor.u32 1.1754944e-38, %v1698_v18  ;;  %vm4205_vm8 = vcmp.eq.f32.partialorder %v1711_v29, 8.507059e+37  ;;  %v1714_v13 = vor.u32 1.1754944e-38, %v1713_v55 }
 0x22b   :  { %v1666_v37 = vand.u32 2147483647, %v1653_v24  ;;  %v1668_v48 = vand.u32 2147483648, %v1653_v24  ;;  %v1681_v61 = vand.u32 2147483647, %v1654_v36  ;;  %v1683_v38 = vand.u32 2147483648, %v1654_v36 }
 0x22d   :  { %v3281_v51 = vpop.eup %3280  ;;  %v1669_v47 = vor.u32 1.1754944e-38, %v1668_v48 }
 0x22e   :  { %v3283_v15 = vpop.eup %3282  ;;  %v1688_v6 = vmul.f32 %v3281_v51, %v1655_v12  ;;  %vm1693_vm0 = vweird.f32 %v3281_v51 }
 0x22f   :  { %v1703_v34 = vmul.f32 %v3283_v15, %v1656_v52  ;;  %v3285_v28 = vpop.eup %3284  ;;  %vm1708_vm14 = vweird.f32 %v3283_v15  ;;  %vm1694_vm7 = vmor %vm1692_vm11, %vm1693_vm0  ;;  %vm1662_vm11 = vweird.f32 %v1653_v24  ;;  %vm1677_vm0 = vweird.f32 %v1654_v36 }
 0x230   :  { %v1689_v44 = vsub.f32 1.0, %v1688_v6  ;;  %v3287_v17 = vpop.eup %3286  ;;  %v1658_v31 = vmul.f32 %v3285_v28, %v1653_v24  ;;  %vm1709_vm10 = vmor %vm1707_vm1, %vm1708_vm14  ;;  %vm1663_vm15 = vweird.f32 %v3285_v28  ;;  %vm1682_vm14 = vcmp.eq.f32.partialorder %v1681_v61, 8.507059e+37  ;;  %v1725_v6 = vld [vmem:[#allocation2 + $0x40] sm:$0xff] }
 0x231   :  { %v1704_v46 = vsub.f32 1.0, %v1703_v34  ;;  %v1673_v32 = vmul.f32 %v3287_v17, %v1654_v36  ;;  %vm1678_vm12 = vweird.f32 %v3287_v17  ;;  %vm1664_vm1 = vmor %vm1662_vm11, %vm1663_vm15  ;;  %vm4796_vm15 = vcmask 1043456  }
 0x232   :  { %v1690_v19 = vmul.f32 %v3281_v51, %v1689_v44  ;;  %v1659_v57 = vsub.f32 1.0, %v1658_v31  ;;  %vm4798_vm11 = vcmp.ge.s32.totalorder %v3494_v42, 1 }
 0x233   :  { %v1705_v30 = vmul.f32 %v3283_v15, %v1704_v46  ;;  %v1674_v5 = vsub.f32 1.0, %v1673_v32  ;;  %v1535_v46 = vld [vmem:[%s4629_s4] sm:$0xff] }
 0x234   :  { %v1691_v23 = vadd.f32 %v3281_v51, %v1690_v19  ;;  %v1660_v35 = vmul.f32 %v3285_v28, %v1659_v57 }
 0x235   :  { %v1706_v27 = vadd.f32 %v3283_v15, %v1705_v30  ;;  %v1675_v26 = vmul.f32 %v3287_v17, %v1674_v5 }
 0x236   :  { %v1695_v49 = vsel %vm1694_vm7, %v3281_v51, %v1691_v23  ;;  %v1661_v33 = vadd.f32 %v3285_v28, %v1660_v35  ;;  %v1684_v51 = vor.u32 1.1754944e-38, %v1683_v38  ;;  %vm4797_vm7 = vcmask 130048  }
 0x237   :  { %v1700_v40 = vsel %vm4201_vm5, %v1699_v54, %v1695_v49  ;;  %v1710_v2 = vsel %vm1709_vm10, %v3283_v15, %v1706_v27  ;;  %v1676_v25 = vadd.f32 %v3287_v17, %v1675_v26  ;;  %vm1667_vm5 = vcmp.eq.f32.partialorder %v1666_v37, 8.507059e+37  ;;  %vm1679_vm10 = vmor %vm1677_vm0, %vm1678_vm12 }
 0x238   :  { %v1715_v12 = vsel %vm4205_vm8, %v1714_v13, %v1710_v2  ;;  %v4216_v45 = vmul.f32 %v1700_v40, %v3402_v4  ;;  %v1665_v39 = vsel %vm1664_vm1, %v3285_v28, %v1661_v33  ;;  %v2212_v28 = vld [vmem:[#allocation2 + $0x18] sm:$0xff]  ;;  %vm4795_vm12 = vcmask 138240  }
 0x239   :  { %v4219_v52 = vmul.f32 %v1715_v12, %v3408_v11  ;;  %v1670_v8 = vsel %vm1667_vm5, %v1669_v47, %v1665_v39  ;;  %v1680_v15 = vsel %vm1679_vm10, %v3287_v17, %v1676_v25  ;;  %v1757_v13 = vld [vmem:[%s4628_s3] sm:$0xf]  ;;  %vm1762_vm8 = vcmask 64512   ;;  %vm4801_vm0 = vmmov %vm4795_vm12 }
 0x23a   :  { %v4226_v18 = vmul.f32 %v1670_v8, %v3433_v20  ;;  %v1685_v34 = vsel %vm1682_vm14, %v1684_v51, %v1680_v15  ;;  %vm4800_vm1 = vcmask 121856   ;;  %vm4806_vm14 = vcmask 7168  }
 0x23b   :  { %1743 = vrot.lane.b32.xlu0 %v4219_v52, %s3351_s0  ;;  %v3230_v24 = vpack.i.bf16 %v4219_v52, %v4216_v45  ;;  %v4229_v36 = vmul.f32 %v1685_v34, %v3400_v3 }
 0x23c   :  { %v3195_v29 = vpack.i.bf16 %v4226_v18, %v1725_v6 }
 0x23d   :  { %v3190_v44 = vpack.i.bf16 %v4216_v45, %v4229_v36  ;;  %v3235_v55 = vpack.i.bf16 %v4229_v36, %v4226_v18 }
 0x23e   :  { %3196 = vrot.lane.b32.xlu1 %v3195_v29, %s3351_s0 }
 0x23f   :  { %3191 = vrot.lane.b32.xlu2 %v3190_v44, %s3351_s0 }
 0x243   :  { %1842 = vrot.lane.b32.xlu0 %v4219_v52, %s3350_s24 }
 0x246   :  { %3206 = vrot.lane.b32.xlu1 %v3195_v29, %s3350_s24 }
 0x247   :  { %3201 = vrot.lane.b32.xlu2 %v3190_v44, %s3350_s24 }
 0x24b   :  { %1941 = vrot.lane.b32.xlu0 %v4219_v52, %s3352_s1 }
 0x24e   :  { %3216 = vrot.lane.b32.xlu1 %v3195_v29, %s3352_s1 }
 0x24f   :  { %3211 = vrot.lane.b32.xlu2 %v3190_v44, %s3352_s1 }
 0x253   :  { %2040 = vrot.lane.b32.xlu0 %v4219_v52, %s3353_s25 }
 0x256   :  { %3226 = vrot.lane.b32.xlu1 %v3195_v29, %s3353_s25 }
 0x257   :  { %3221 = vrot.lane.b32.xlu2 %v3190_v44, %s3353_s25 }
 0x25b   :  { %2226 = vrot.lane.b32.xlu0 %v2212_v28, %s3354_s30 }
 0x25e   :  { %3236 = vrot.lane.b32.xlu1 %v3235_v55, %s3354_s30 }
 0x25f   :  { %3231 = vrot.lane.b32.xlu2 %v3230_v24, %s3354_s30 }
 0x263   :  { %2325 = vrot.lane.b32.xlu0 %v2212_v28, %s3355_s6 }
 0x266   :  { %3246 = vrot.lane.b32.xlu1 %v3235_v55, %s3355_s6 }
 0x267   :  { %3241 = vrot.lane.b32.xlu2 %v3230_v24, %s3355_s6 }
 0x26b   :  { %2424 = vrot.lane.b32.xlu0 %v2212_v28, %s3356_s9 }
 0x26e   :  { %3256 = vrot.lane.b32.xlu1 %v3235_v55, %s3356_s9 }
 0x26f   :  { %3251 = vrot.lane.b32.xlu2 %v3230_v24, %s3356_s9 }
 0x273   :  { %2523 = vrot.lane.b32.xlu0 %v2212_v28, %s3357_s12 }
 0x276   :  { %3266 = vrot.lane.b32.xlu1 %v3235_v55, %s3357_s12 }
 0x277   :  { %3261 = vrot.lane.b32.xlu2 %v3230_v24, %s3357_s12 }
 0x27b   :  { %1550 = vperm.xlu0 %3271, %v1537_v1  }
 0x27f   :  { %1540 = vperm.xlu2 %3270, %v1535_v46  }
 0x299   :  { %v3192_v17 = vpop.permute.xlu2 %3191 }
 0x29a   :  { %v3194_v19 = vunpack.i.h.bf16 %v3192_v17  ;;  %v3193_v54 = vunpack.i.l.bf16 %v3192_v17 }
 0x29c   :  { %v1747_v31 = vsel %vm4795_vm12, %v3193_v54, %v3194_v19  ;;  %vm4807_vm12 = vmmov %vm4797_vm7 }
 0x29d   :  { %v1755_v30 = vsel %vm3602_vm13, %v1747_v31, 0.0  ;;  %vm4799_vm13 = vmmov %vm4796_vm15 }
 0x29e   :  { %v1760_v60 = vpack.c.bf16 %v1755_v30, %v1755_v30  ;;  %vm4802_vm5 = vmmov %vm4799_vm13 }
 0x29f   :  { %vm4803_vm10 = vmmov %vm4802_vm5 }
 0x2a0   :  { %v1773_v32 = vsel %vm4796_vm15, %v1760_v60, 0  ;;  %vm4808_vm15 = vcmp.ge.s32.totalorder %v3497_v43, 1 }
 0x2a1   :  { %v3202_v23 = vpop.permute.xlu2 %3201  ;;  %1811 = vmatpush.bf16.msrb.mxu2 %v1773_v32 }
 0x2a2   :  { %v3204_v57 = vunpack.i.h.bf16 %v3202_v23  ;;  %v3203_v37 = vunpack.i.l.bf16 %v3202_v23 }
 0x2a4   :  { %v1846_v27 = vsel %vm4797_vm7, %v3203_v37, %v3204_v57  ;;  %2888 = vmatmul.msk.bf16.vlgmr.msrb.gmra.mxu2 %vm1762_vm8, %v1757_v13  ;;  %vm4809_vm7 = vcmp.ge.s32.totalorder %v3536_v10, 1 }
 0x2a5   :  { %v1854_v14 = vsel %vm4798_vm11, %v1846_v27, 0.0  ;;  %vm4810_vm11 = vmmov %vm4802_vm5 }
 0x2a6   :  { %v1860_v48 = vpack.c.bf16 %v1854_v14, %v1854_v14 }
 0x2a8   :  { %v1872_v5 = vsel %vm4799_vm13, %v1860_v48, 0  ;;  %vm4811_vm13 = vmmov %vm4802_vm5 }
 0x2a9   :  { %v4280_v61 = vpop.permute.xlu2 %3211  ;;  %1910 = vmatpush.bf16.msra.mxu2 %v1872_v5 }
 0x2aa   :  { %v3214_v49 = vunpack.i.h.bf16 %v4280_v61  ;;  %v3213_v35 = vunpack.i.l.bf16 %v4280_v61 }
 0x2ac   :  { %v1945_v40 = vsel %vm4800_vm1, %v3213_v35, %v3214_v49  ;;  %vm4812_vm1 = vmmov %vm4802_vm5 }
 0x2ad   :  { %v1744_v38 = vpop.permute.xlu0 %1743  ;;  %v1953_v12 = vsel %vm3691_vm2, %v1945_v40, 0.0  ;;  %vm4804_vm2 = vmmov %vm4801_vm0 }
 0x2ae   :  { %v1748_v2 = vsel %vm4801_vm0, %v3194_v19, %v1744_v38  ;;  %v1959_v47 = vpack.c.bf16 %v1953_v12, %v1953_v12  ;;  %v4841_v12 = vld [vmem:[#allocation6_spill] sm:$0xff] }
 0x2af   :  { %v1756_v26 = vsel %vm3612_vm4, %v1748_v2, 0.0  ;;  %vm4805_vm4 = vmmov %vm4801_vm0 }
 0x2b0   :  { %v1761_v33 = vpack.c.bf16 %v1756_v26, %v1756_v26  ;;  %v1971_v25 = vsel %vm4802_vm5, %v1959_v47, 0  ;;  %v3197_v39 = vpop.permute.xlu1 %3196  ;;  %vm4816_vm5 = vcmask 121856  }
 0x2b1   :  { %v4294_v8 = vpop.permute.xlu2 %3221  ;;  %2009 = vmatpush.bf16.msrb.mxu2 %v1971_v25  ;;  %v3199_v15 = vunpack.i.h.bf16 %v3197_v39  ;;  %v3198_v6 = vunpack.i.l.bf16 %v3197_v39 }
 0x2b2   :  { %v1776_v51 = vsel %vm4803_vm10, %v1761_v33, 0  ;;  %v3224_v56 = vunpack.i.h.bf16 %v4294_v8  ;;  %v3223_v24 = vunpack.i.l.bf16 %v4294_v8  ;;  %vm4817_vm10 = vcmp.ge.s32.totalorder %v3516_v63, 1 }
 0x2b3   :  { %1824 = vmatpush.bf16.msrb.mxu3 %v1776_v51  ;;  %v1746_v34 = vsel %vm4804_vm2, %v3199_v15, %v3193_v54  ;;  %v1745_v29 = vsel %vm4805_vm4, %v3198_v6, %v3199_v15  ;;  %vm4818_vm2 = vcmp.ge.s32.totalorder %v3518_v0, 1  ;;  %vm4820_vm4 = vmmov %vm4812_vm1  ;;  %v2135_v15 = vpack.c.bf16 %v4216_v45, %v4216_v45 }
 0x2b4   :  { %v2044_v55 = vsel %vm4806_vm14, %v3223_v24, %v3224_v56  ;;  %2893 = vmatmul.msk.bf16.vlgmr.msra.gmra.mxu2 %vm1762_vm8, %v4299_v53  ;;  %v1753_v1 = vsel %vm3626_vm6, %v1745_v29, 0.0  ;;  %v1754_v46 = vsel %vm3554_vm3, %v1746_v34, 0.0  ;;  %vm4813_vm3 = vmmov %vm4812_vm1  ;;  %v2895_v29 = vld [vmem:[%s4628_s3 + $0x8] sm:$0xf] }
 0x2b5   :  { %v1843_v44 = vpop.permute.xlu0 %1842  ;;  %v2052_v19 = vsel %vm4809_vm7, %v2044_v55, 0.0  ;;  %v1758_v54 = vpack.c.bf16 %v1753_v1, %v1753_v1  ;;  %v1759_v31 = vpack.c.bf16 %v1754_v46, %v1754_v46  ;;  %vm4814_vm6 = vmmov %vm4807_vm12 }
 0x2b6   :  { %v1847_v28 = vsel %vm4807_vm12, %v3204_v57, %v1843_v44  ;;  %2889 = vmatmul.msk.bf16.vlgmr.msrb.gmra.mxu3 %vm1762_vm8, %v1757_v13  ;;  %v2058_v60 = vpack.c.bf16 %v2052_v19, %v2052_v19  ;;  %vm4815_vm0 = vmmov %vm4814_vm6 }
 0x2b7   :  { %v1855_v17 = vsel %vm4808_vm15, %v1847_v28, 0.0  ;;  %v1767_v32 = vsel %vm4810_vm11, %v1758_v54, 0  ;;  %v1770_v23 = vsel %vm4811_vm13, %v1759_v31, 0  ;;  %vm4821_vm14 = vmmov %vm4812_vm1  ;;  %vm4826_vm11 = vcmask 7168   ;;  %v4829_v54 = vld [vmem:[#allocation9_spill] sm:$0xff] }
 0x2b8   :  { %v1861_v30 = vpack.c.bf16 %v1855_v17, %v1855_v17  ;;  %v2070_v62 = vsel %vm4812_vm1, %v2058_v60, 0  ;;  %v3207_v57 = vpop.permute.xlu1 %3206  ;;  %1785 = vmatpush.bf16.msrb.mxu0 %v1767_v32  ;;  %1798 = vmatpush.bf16.msrb.mxu1 %v1770_v23  ;;  %vm4822_vm12 = vmmov %vm4812_vm1  ;;  %v4827_v17 = vld [vmem:[#allocation11_spill] sm:$0xff] }
 0x2b9   :  { %2108 = vmatpush.bf16.msra.mxu2 %v2070_v62  ;;  %v3209_v27 = vunpack.i.h.bf16 %v3207_v57  ;;  %v3208_v14 = vunpack.i.l.bf16 %v3207_v57  ;;  %v4343_v44 = vpop.permute.xlu2 %3231  ;;  %vm4824_vm15 = vmmov %vm4816_vm5  ;;  %vm4828_vm13 = vnez %v4827_v17 }
 0x2ba   :  { %v1875_v21 = vsel %vm4813_vm3, %v1861_v30, 0  ;;  %vm4825_vm7 = vmmov %vm4812_vm1  ;;  %vm4830_vm1 = vnez %v4829_v54  ;;  %v3234_v32 = vunpack.i.h.bf16 %v4343_v44  ;;  %v3233_v23 = vunpack.i.l.bf16 %v4343_v44 }
 0x2bb   :  { %1923 = vmatpush.bf16.msra.mxu3 %v1875_v21  ;;  %v1845_v48 = vsel %vm4814_vm6, %v3209_v27, %v3203_v37  ;;  %v1844_v5 = vsel %vm4815_vm0, %v3208_v14, %v3209_v27  ;;  %2886 = vmatmul.msk.bf16.vlgmr.msrb.gmra.mxu0 %vm1762_vm8, %v1757_v13  ;;  %v2147_v45 = vsel %vm4825_vm7, %v2135_v15, 0  ;;  %vm4833_vm6 = vmmov %vm4820_vm4  ;;  %v2134_v44 = vpack.c.bf16 %v4229_v36, %v4229_v36 }
 0x2bc   :  { %2887 = vmatmul.msk.bf16.vlgmr.msrb.gmra.mxu1 %vm1762_vm8, %v1757_v13  ;;  %v1852_v2 = vsel %vm4817_vm10, %v1844_v5, 0.0  ;;  %v1853_v26 = vsel %vm4818_vm2, %v1845_v48, 0.0  ;;  %vm4834_vm0 = vmmov %vm4820_vm4  ;;  %vm4836_vm10 = vcmask 1039360  }
 0x2bd   :  { %v1942_v38 = vpop.permute.xlu0 %1941  ;;  %v1858_v47 = vpack.c.bf16 %v1852_v2, %v1852_v2  ;;  %v1859_v37 = vpack.c.bf16 %v1853_v26, %v1853_v26  ;;  %v2230_v5 = vsel %vm4836_vm10, %v3233_v23, %v3234_v32  ;;  %vm4837_vm2 = vmmov %vm4826_vm11  ;;  %v4839_v2 = vld [vmem:[#allocation8_spill] sm:$0xff] }
 0x2be   :  { %v1946_v40 = vsel %vm4816_vm5, %v3214_v49, %v1942_v38  ;;  %vm4845_vm7 = vmmov %vm4834_vm0 }
 0x2bf   :  { %v1954_v33 = vsel %vm3707_vm9, %v1946_v40, 0.0  ;;  %v1866_v39 = vsel %vm4820_vm4, %v1858_v47, 0  ;;  %v1869_v51 = vsel %vm4821_vm14, %v1859_v37, 0  ;;  %vm4823_vm9 = vmmov %vm4816_vm5  ;;  %vm4840_vm14 = vcmp.ge.s32.totalorder %v4839_v2, 1 }
 0x2c0   :  { %v1960_v25 = vpack.c.bf16 %v1954_v33, %v1954_v33  ;;  %v3217_v13 = vpop.permute.xlu1 %3216  ;;  %1884 = vmatpush.bf16.msra.mxu0 %v1866_v39  ;;  %1897 = vmatpush.bf16.msra.mxu1 %v1869_v51  ;;  %vm4835_vm5 = vmmov %vm4834_vm0  ;;  %v2900_v51 = vld [vmem:[%s4628_s3 + $0xc] sm:$0xf] }
 0x2c1   :  { %v3219_v6 = vunpack.i.h.bf16 %v3217_v13  ;;  %v3218_v34 = vunpack.i.l.bf16 %v3217_v13  ;;  %vm4838_vm4 = vmmov %vm4837_vm2  ;;  %v3242_v13 = vpop.permute.xlu2 %3241 }
 0x2c2   :  { %v1974_v49 = vsel %vm4822_vm12, %v1960_v25, 0  ;;  %vm4842_vm12 = vcmp.ge.s32.totalorder %v4841_v12, 1  ;;  %v3244_v15 = vunpack.i.h.bf16 %v3242_v13 }
 0x2c3   :  { %2022 = vmatpush.bf16.msrb.mxu3 %v1974_v49  ;;  %v1944_v55 = vsel %vm4823_vm9, %v3219_v6, %v3213_v35  ;;  %v1943_v28 = vsel %vm4824_vm15, %v3218_v34, %v3219_v6  ;;  %v4831_v35 = vld [vmem:[#allocation7_spill] sm:$0xff]  ;;  %vm4843_vm9 = vcmp.lt.s32.totalorder %v3536_v10, 15  ;;  %vm4844_vm15 = vmmov %vm4834_vm0  ;;  %v3243_v6 = vunpack.i.l.bf16 %v3242_v13 }
 0x2c4   :  { %2898 = vmatmul.msk.bf16.vlgmr.msrb.gmra.mxu2 %vm1762_vm8, %v2895_v29  ;;  %v1951_v19 = vsel %vm4828_vm13, %v1943_v28, 0.0  ;;  %v1952_v61 = vsel %vm4830_vm1, %v1944_v55, 0.0  ;;  %vm4832_vm3 = vcmp.ge.s32.totalorder %v4831_v35, 1  ;;  %v2238_v8 = vsel %vm4843_vm9, %v2230_v5, 0.0  ;;  %vm4847_vm13 = vmmov %vm4834_vm0 }
 0x2c5   :  { %v2041_v1 = vpop.permute.xlu0 %2040  ;;  %2185 = vmatpush.bf16.msrb.mxu2 %v2147_v45  ;;  %v1957_v30 = vpack.c.bf16 %v1951_v19, %v1951_v19  ;;  %v1958_v60 = vpack.c.bf16 %v1952_v61, %v1952_v61  ;;  %v2244_v39 = vpack.c.bf16 %v2238_v8, %v2238_v8  ;;  %vm4848_vm1 = vcmask 924672   ;;  %v4852_v19 = vld [vmem:[#allocation13_spill] sm:$0xff] }
 0x2c6   :  { %v2045_v46 = vsel %vm4826_vm11, %v3224_v56, %v2041_v1  ;;  %2894 = vmatmul.msk.bf16.vlgmr.msra.gmra.mxu3 %vm1762_vm8, %v4299_v53  ;;  %vm4846_vm11 = vmmov %vm4834_vm0  ;;  %v2329_v55 = vsel %vm4848_vm1, %v3243_v6, %v3244_v15  ;;  %vm4858_vm9 = vcmp.lt.s32.totalorder %v4839_v2, 15 }
 0x2c7   :  { %v2053_v31 = vsel %vm4832_vm3, %v2045_v46, 0.0  ;;  %v1965_v62 = vsel %vm4833_vm6, %v1957_v30, 0  ;;  %v1968_v57 = vsel %vm4834_vm0, %v1958_v60, 0  ;;  %v2256_v10 = vsel %vm4846_vm11, %v2244_v39, 0  ;;  %vm4849_vm3 = vmmov %vm4836_vm10  ;;  %v2905_v60 = vld [vmem:[%s4628_s3 + $0x10] sm:$0xf] }
 0x2c8   :  { %v2059_v56 = vpack.c.bf16 %v2053_v31, %v2053_v31  ;;  %v3227_v21 = vpop.permute.xlu1 %3226  ;;  %1983 = vmatpush.bf16.msrb.mxu0 %v1965_v62  ;;  %1996 = vmatpush.bf16.msrb.mxu1 %v1968_v57  ;;  %vm4850_vm6 = vmmov %vm4834_vm0  ;;  %v2144_v46 = vsel %vm4834_vm0, %v2134_v44, 0  ;;  %vm4853_vm10 = vnez %v4852_v19 }
 0x2c9   :  { %v3229_v14 = vunpack.i.h.bf16 %v3227_v21  ;;  %v3228_v48 = vunpack.i.l.bf16 %v3227_v21  ;;  %v2337_v54 = vsel %vm4853_vm10, %v2329_v55, 0.0  ;;  %vm4861_vm11 = vmmov %vm4848_vm1 }
 0x2ca   :  { %v2073_v27 = vsel %vm4835_vm5, %v2059_v56, 0  ;;  %vm4851_vm5 = vcmp.lt.s32.totalorder %v4831_v35, 15  ;;  %v2343_v31 = vpack.c.bf16 %v2337_v54, %v2337_v54  ;;  %vm4863_vm1 = vmmov %vm4834_vm0 }
 0x2cb   :  { %2121 = vmatpush.bf16.msra.mxu3 %v2073_v27  ;;  %v2043_v38 = vsel %vm4837_vm2, %v3229_v14, %v3223_v24  ;;  %v2042_v40 = vsel %vm4838_vm4, %v3228_v48, %v3229_v14  ;;  %2891 = vmatmul.msk.bf16.vlgmr.msra.gmra.mxu0 %vm1762_vm8, %v4299_v53  ;;  %vm4854_vm2 = vmmov %vm4849_vm3 }
 0x2cc   :  { %2892 = vmatmul.msk.bf16.vlgmr.msra.gmra.mxu1 %vm1762_vm8, %v4299_v53  ;;  %v2050_v26 = vsel %vm4840_vm14, %v2042_v40, 0.0  ;;  %v2051_v33 = vsel %vm4842_vm12, %v2043_v38, 0.0  ;;  %v2136_v53 = vpack.c.bf16 %v4219_v52, %v4219_v52  ;;  %v2133_v52 = vpack.c.bf16 %v4226_v18, %v4226_v18  ;;  %vm4855_vm4 = vmmov %vm4854_vm2 }
 0x2cd   :  { %v2056_v47 = vpack.c.bf16 %v2050_v26, %v2050_v26  ;;  %v2057_v37 = vpack.c.bf16 %v2051_v33, %v2051_v33  ;;  %v2227_v34 = vpop.permute.xlu0 %2226  ;;  %vm4856_vm14 = vmmov %vm4834_vm0 }
 0x2ce   :  { %v2150_v49 = vsel %vm4847_vm13, %v2136_v53, 0  ;;  %v2231_v28 = vsel %vm4849_vm3, %v3234_v32, %v2227_v34  ;;  %v2141_v45 = vsel %vm4850_vm6, %v2133_v52, 0  ;;  %v4410_v32 = vpop.permute.xlu2 %3251  ;;  %v2355_v35 = vsel %vm4856_vm14, %v2343_v31, 0  ;;  %vm4857_vm12 = vmmov %vm4834_vm0  ;;  %v4873_v34 = vld [vmem:[#allocation12_spill] sm:$0xff]  ;;  %v4880_v31 = vld [vmem:[#allocation17_spill] sm:$0xff] }
 0x2cf   :  { %v2064_v24 = vsel %vm4844_vm15, %v2056_v47, 0  ;;  %v2067_v25 = vsel %vm4845_vm7, %v2057_v37, 0  ;;  %v2239_v18 = vsel %vm4851_vm5, %v2231_v28, 0.0  ;;  %vm4859_vm15 = vcmp.lt.s32.totalorder %v4841_v12, 15  ;;  %vm4862_vm13 = vmmov %vm4834_vm0  ;;  %v4864_v12 = vld [vmem:[#allocation14_spill] sm:$0xff] }
 0x2d0   :  { %2082 = vmatpush.bf16.msra.mxu0 %v2064_v24  ;;  %2095 = vmatpush.bf16.msra.mxu1 %v2067_v25  ;;  %v3237_v1 = vpop.permute.xlu1 %3236  ;;  %v2245_v61 = vpack.c.bf16 %v2239_v18, %v2239_v18  ;;  %v3254_v57 = vunpack.i.h.bf16 %v4410_v32  ;;  %v3253_v21 = vunpack.i.l.bf16 %v4410_v32  ;;  %vm4860_vm7 = vcmask 916480   ;;  %vm4867_vm0 = vmmov %vm4861_vm11 }
 0x2d1   :  { %v3239_v17 = vunpack.i.h.bf16 %v3237_v1  ;;  %v3238_v36 = vunpack.i.l.bf16 %v3237_v1  ;;  %vm4865_vm3 = vnez %v4864_v12  ;;  %vm4866_vm6 = vcmp.lt.s32.totalorder %v3494_v42, 15  ;;  %vm4868_vm5 = vmmov %vm4867_vm0 }
 0x2d2   :  { %v2259_v56 = vsel %vm4857_vm12, %v2245_v61, 0  ;;  %v2428_v5 = vsel %vm4860_vm7, %v3253_v21, %v3254_v57  ;;  %vm4869_vm10 = vmmov %vm4863_vm1  ;;  %vm4874_vm14 = vnez %v4873_v34  ;;  %vm4875_vm12 = vcmask 908288  }
 0x2d3   :  { %v2229_v30 = vsel %vm4854_vm2, %v3239_v17, %v3233_v23  ;;  %v2436_v8 = vsel %vm4866_vm6, %v2428_v5, 0.0  ;;  %vm4870_vm2 = vmmov %vm4863_vm1 }
 0x2d4   :  { %2903 = vmatmul.msk.bf16.vlgmr.msra.gmra.mxu2 %vm1762_vm8, %v2900_v51  ;;  %v2237_v23 = vsel %vm4859_vm15, %v2229_v30, 0.0  ;;  %v2442_v25 = vpack.c.bf16 %v2436_v8, %v2436_v8  ;;  %vm4877_vm15 = vmmov %vm4863_vm1 }
 0x2d5   :  { %2294 = vmatpush.bf16.msra.mxu2 %v2256_v10  ;;  %v2326_v27 = vpop.permute.xlu0 %2325  ;;  %v2243_v48 = vpack.c.bf16 %v2237_v23, %v2237_v23  ;;  %vm4884_vm6 = vmmov %vm4870_vm2 }
 0x2d6   :  { %2899 = vmatmul.msk.bf16.vlgmr.msrb.gmra.mxu3 %vm1762_vm8, %v2895_v29  ;;  %v2330_v38 = vsel %vm4861_vm11, %v3244_v15, %v2326_v27  ;;  %v3262_v13 = vpop.permute.xlu2 %3261  ;;  %v2454_v10 = vsel %vm4869_vm10, %v2442_v25, 0  ;;  %vm4879_vm11 = vcmp.lt.s32.totalorder %v3497_v43, 15  ;;  %vm4887_vm10 = vcmp.lt.s32.totalorder %v3518_v0, 15  ;;  %v4891_v0 = vld [vmem:[#allocation18_spill] sm:$0xff] }
 0x2d7   :  { %2198 = vmatpush.bf16.msrb.mxu3 %v2150_v49  ;;  %v2253_v26 = vsel %vm4863_vm1, %v2243_v48, 0  ;;  %v2338_v33 = vsel %vm4865_vm3, %v2330_v38, 0.0  ;;  %v4871_v49 = vld [vmem:[#allocation15_spill] sm:$0xff]  ;;  %v3264_v52 = vunpack.i.h.bf16 %v3262_v13  ;;  %v3263_v44 = vunpack.i.l.bf16 %v3262_v13 }
 0x2d8   :  { %v3247_v40 = vpop.permute.xlu1 %3246  ;;  %v2344_v24 = vpack.c.bf16 %v2338_v33, %v2338_v33 }
 0x2d9   :  { %v3249_v47 = vunpack.i.h.bf16 %v3247_v40  ;;  %v3248_v37 = vunpack.i.l.bf16 %v3247_v40 }
 0x2da   :  { %v2358_v42 = vsel %vm4870_vm2, %v2344_v24, 0  ;;  %v4896_v24 = vld [vmem:[#allocation19_spill] sm:$0xff] }
 0x2db   :  { %2896 = vmatmul.msk.bf16.vlgmr.msrb.gmra.mxu0 %vm1762_vm8, %v2895_v29  ;;  %v2328_v39 = vsel %vm4867_vm0, %v3249_v47, %v3243_v6  ;;  %v2327_v53 = vsel %vm4868_vm5, %v3248_v37, %v3249_v47  ;;  %vm4885_vm0 = vmmov %vm4870_vm2  ;;  %vm4886_vm5 = vcmp.lt.s32.totalorder %v3516_v63, 15  ;;  %v2920_v37 = vld [vmem:[%s4628_s3 + $0x1c] sm:$0xf] }
 0x2dc   :  { %2897 = vmatmul.msk.bf16.vlgmr.msrb.gmra.mxu1 %vm1762_vm8, %v2895_v29  ;;  %2159 = vmatpush.bf16.msrb.mxu0 %v2141_v45  ;;  %v2228_v29 = vsel %vm4855_vm4, %v3238_v36, %v3239_v17  ;;  %vm4872_vm4 = vnez %v4871_v49  ;;  %v2336_v6 = vsel %vm4874_vm14, %v2328_v39, 0.0  ;;  %v2527_v45 = vsel %vm4875_vm12, %v3263_v44, %v3264_v52  ;;  %vm4888_vm2 = vmmov %vm4875_vm12  ;;  %v4898_v39 = vld [vmem:[#allocation16_spill] sm:$0xff]  ;;  %v2925_v49 = vld [vmem:[%s4628_s3 + $0x20] sm:$0xf] }
 0x2dd   :  { %2172 = vmatpush.bf16.msrb.mxu1 %v2144_v46  ;;  %v2236_v62 = vsel %vm4858_vm9, %v2228_v29, 0.0  ;;  %v2335_v15 = vsel %vm4872_vm4, %v2327_v53, 0.0  ;;  %v2425_v55 = vpop.permute.xlu0 %2424  ;;  %v2342_v1 = vpack.c.bf16 %v2336_v6, %v2336_v6  ;;  %vm4876_vm9 = vmmov %vm4860_vm7  ;;  %vm4892_vm12 = vnez %v4891_v0 }
 0x2de   :  { %v2242_v14 = vpack.c.bf16 %v2236_v62, %v2236_v62  ;;  %v2341_v28 = vpack.c.bf16 %v2335_v15, %v2335_v15  ;;  %v2429_v46 = vsel %vm4876_vm9, %v3254_v57, %v2425_v55  ;;  %vm4878_vm7 = vmmov %vm4863_vm1 }
 0x2df   :  { %v2352_v36 = vsel %vm4878_vm7, %v2342_v1, 0  ;;  %v2437_v19 = vsel %vm4879_vm11, %v2429_v46, 0.0  ;;  %vm4882_vm1 = vmmov %vm4876_vm9  ;;  %vm4897_vm11 = vnez %v4896_v24 }
 0x2e0   :  { %v2250_v2 = vsel %vm4862_vm13, %v2242_v14, 0  ;;  %v3257_v18 = vpop.permute.xlu1 %3256  ;;  %v2349_v17 = vsel %vm4877_vm15, %v2341_v28, 0  ;;  %vm4881_vm13 = vnez %v4880_v31  ;;  %v2443_v29 = vpack.c.bf16 %v2437_v19, %v2437_v19  ;;  %vm4883_vm3 = vmmov %vm4882_vm1 }
 0x2e1   :  { %v3259_v54 = vunpack.i.h.bf16 %v3257_v18  ;;  %v3258_v61 = vunpack.i.l.bf16 %v3257_v18  ;;  %v2535_v30 = vsel %vm4881_vm13, %v2527_v45, 0.0  ;;  %vm4889_vm4 = vmmov %vm4885_vm0  ;;  %vm4899_vm13 = vnez %v4898_v39 }
 0x2e2   :  { %v2541_v32 = vpack.c.bf16 %v2535_v30, %v2535_v30  ;;  %v2457_v62 = vsel %vm4885_vm0, %v2443_v29, 0  ;;  %vm4890_vm14 = vmmov %vm4885_vm0 }
 0x2e3   :  { %vm4893_vm9 = vmmov %vm4888_vm2 }
 0x2e4   :  { %2908 = vmatmul.msk.bf16.vlgmr.msrb.gmra.mxu2 %vm1762_vm8, %v2905_v60  ;;  %v2553_v43 = vsel %vm4884_vm6, %v2541_v32, 0  ;;  %vm4894_vm15 = vmmov %vm4888_vm2 }
 0x2e5   :  { %2393 = vmatpush.bf16.msrb.mxu2 %v2355_v35  ;;  %v2427_v35 = vsel %vm4882_vm1, %v3259_v54, %v3253_v21  ;;  %v2524_v21 = vpop.permute.xlu0 %2523  ;;  %vm4895_vm7 = vmmov %vm4885_vm0 }
 0x2e6   :  { %2904 = vmatmul.msk.bf16.vlgmr.msra.gmra.mxu3 %vm1762_vm8, %v2900_v51  ;;  %v2435_v57 = vsel %vm4887_vm10, %v2427_v35, 0.0  ;;  %v2528_v48 = vsel %vm4888_vm2, %v3264_v52, %v2524_v21  ;;  %vm4900_vm1 = vmmov %vm4885_vm0 }
 0x2e7   :  { %2307 = vmatpush.bf16.msra.mxu3 %v2259_v56  ;;  %v2915_v56 = vld [vmem:[%s4628_s3 + $0x18] sm:$0xf]  ;;  %v2441_v14 = vpack.c.bf16 %v2435_v57, %v2435_v57  ;;  %v2536_v40 = vsel %vm4892_vm12, %v2528_v48, 0.0 }
 0x2e8   :  { %v3267_v5 = vpop.permute.xlu1 %3266  ;;  %v2542_v12 = vpack.c.bf16 %v2536_v40, %v2536_v40 }
 0x2e9   :  { %v2451_v63 = vsel %vm4890_vm14, %v2441_v14, 0 }
 0x2ea   :  { %v2556_v8 = vsel %vm4895_vm7, %v2542_v12, 0 }
 0x2eb   :  { %2901 = vmatmul.msk.bf16.vlgmr.msra.gmra.mxu0 %vm1762_vm8, %v2900_v51 }
 0x2ec   :  { %2902 = vmatmul.msk.bf16.vlgmr.msra.gmra.mxu1 %vm1762_vm8, %v2900_v51  ;;  %2268 = vmatpush.bf16.msra.mxu0 %v2250_v2  ;;  %v2910_v51 = vld [vmem:[%s4628_s3 + $0x14] sm:$0xf]  ;;  %v3269_v2 = vunpack.i.h.bf16 %v3267_v5  ;;  %s3360_s3 = smov [#allocation3]  }
 0x2ed   :  { %2281 = vmatpush.bf16.msra.mxu1 %v2253_v26  ;;  %v3268_v26 = vunpack.i.l.bf16 %v3267_v5  ;;  %v1551_v15 = vpop.permute.xlu0 %1550  ;;  %s2639_s17 = sshll.u32 %s3360_s3, 4  ;;  %s2640_s17 = int_to_ptr.vmem [resolvable:$true] %s2639_s17 }
 0x2ee   :  { %v2526_v33 = vsel %vm4893_vm9, %v3269_v2, %v3263_v44  ;;  %v1563_v34 = vadd.f32 %v1551_v15, %v4193_v58  ;;  %v1564_v55 = vadd.f32 %v1551_v15, %v4195_v59  ;;  %v1561_v1 = vadd.f32 %v1551_v15, %v4197_v7 }
 0x2ef   :  { %v2525_v47 = vsel %vm4894_vm15, %v3268_v26, %v3269_v2  ;;  %v2534_v53 = vsel %vm4899_vm13, %v2526_v33, 0.0  ;;  %v1562_v45 = vadd.f32 %v1551_v15, %v4199_v41 }
 0x2f0   :  { %v2533_v25 = vsel %vm4897_vm11, %v2525_v47, 0.0  ;;  %v2540_v13 = vpack.c.bf16 %v2534_v53, %v2534_v53 }
 0x2f4   :  { %2913 = vmatmul.msk.bf16.vlgmr.msra.gmra.mxu2 %vm1762_vm8, %v2910_v51 }
 0x2f5   :  { %2492 = vmatpush.bf16.msra.mxu2 %v2454_v10 }
 0x2f6   :  { %2909 = vmatmul.msk.bf16.vlgmr.msrb.gmra.mxu3 %vm1762_vm8, %v2905_v60 }
 0x2f7   :  { %2406 = vmatpush.bf16.msrb.mxu3 %v2358_v42 }
 0x2fb   :  { %2906 = vmatmul.msk.bf16.vlgmr.msrb.gmra.mxu0 %vm1762_vm8, %v2905_v60 }
 0x2fc   :  { %2907 = vmatmul.msk.bf16.vlgmr.msrb.gmra.mxu1 %vm1762_vm8, %v2905_v60  ;;  %2367 = vmatpush.bf16.msrb.mxu0 %v2349_v17  ;;  %v2426_v60 = vsel %vm4883_vm3, %v3258_v61, %v3259_v54  ;;  %vm4901_vm3 = vmmov %vm4885_vm0 }
 0x2fd   :  { %2380 = vmatpush.bf16.msrb.mxu1 %v2352_v36  ;;  %v2434_v23 = vsel %vm4886_vm5, %v2426_v60, 0.0  ;;  %v2550_v42 = vsel %vm4901_vm3, %v2540_v13, 0 }
 0x2fe   :  { %v2440_v27 = vpack.c.bf16 %v2434_v23, %v2434_v23 }
 0x300   :  { %v2448_v38 = vsel %vm4889_vm4, %v2440_v27, 0 }
 0x304   :  { %2918 = vmatmul.msk.bf16.vlgmr.msrb.gmra.mxu2 %vm1762_vm8, %v2915_v56 }
 0x305   :  { %2591 = vmatpush.bf16.msrb.mxu2 %v2553_v43 }
 0x306   :  { %2914 = vmatmul.msk.bf16.vlgmr.msra.gmra.mxu3 %vm1762_vm8, %v2910_v51 }
 0x307   :  { %2505 = vmatpush.bf16.msra.mxu3 %v2457_v62 }
 0x30b   :  { %2911 = vmatmul.msk.bf16.vlgmr.msra.gmra.mxu0 %vm1762_vm8, %v2910_v51 }
 0x30c   :  { %2912 = vmatmul.msk.bf16.vlgmr.msra.gmra.mxu1 %vm1762_vm8, %v2910_v51  ;;  %2466 = vmatpush.bf16.msra.mxu0 %v2448_v38  ;;  %v2539_v51 = vpack.c.bf16 %v2533_v25, %v2533_v25 }
 0x30d   :  { %2479 = vmatpush.bf16.msra.mxu1 %v2451_v63 }
 0x30e   :  { %v2547_v10 = vsel %vm4900_vm1, %v2539_v51, 0 }
 0x314   :  { %2923 = vmatmul.msk.bf16.vlgmr.msra.gmra.mxu2 %vm1762_vm8, %v2920_v37 }
 0x316   :  { %2919 = vmatmul.msk.bf16.vlgmr.msrb.gmra.mxu3 %vm1762_vm8, %v2915_v56 }
 0x317   :  { %2604 = vmatpush.bf16.msrb.mxu3 %v2556_v8 }
 0x31b   :  { %2916 = vmatmul.msk.bf16.vlgmr.msrb.gmra.mxu0 %vm1762_vm8, %v2915_v56 }
 0x31c   :  { %2917 = vmatmul.msk.bf16.vlgmr.msrb.gmra.mxu1 %vm1762_vm8, %v2915_v56  ;;  %2565 = vmatpush.bf16.msrb.mxu0 %v2547_v10 }
 0x31d   :  { %2578 = vmatpush.bf16.msrb.mxu1 %v2550_v42 }
 0x324   :  { %2928 = vmatmul.msk.bf16.vlgmr.msrb.gmra.mxu2 %vm1762_vm8, %v2925_v49 }
 0x326   :  { %2924 = vmatmul.msk.bf16.vlgmr.msra.gmra.mxu3 %vm1762_vm8, %v2920_v37 }
 0x327   :  { %v1813_v6 = vpop.f32.mrf.mxu2 }
 0x328   :  { %v1832_v52 = vadd.f32 %v1813_v6, %v1563_v34 }
 0x32b   :  { %2921 = vmatmul.msk.bf16.vlgmr.msra.gmra.mxu0 %vm1762_vm8, %v2920_v37 }
 0x32c   :  { %2922 = vmatmul.msk.bf16.vlgmr.msra.gmra.mxu1 %vm1762_vm8, %v2920_v37 }
 0x32f   :  { %v1815_v44 = vpop.f32.mrf.mxu2 }
 0x336   :  { %2929 = vmatmul.msk.bf16.vlgmr.msrb.gmra.mxu3 %vm1762_vm8, %v2925_v49 }
 0x337   :  { %v1912_v28 = vpop.f32.mrf.mxu2 }
 0x338   :  { %v1931_v18 = vadd.f32 %v1912_v28, %v1832_v52  ;;  %v1787_v17 = vpop.f32.mrf.mxu0  ;;  %v1541_v52 = vpop.permute.xlu2 %1540 }
 0x339   :  { %v1826_v46 = vpop.f32.mrf.mxu3  ;;  %v1800_v58 = vpop.f32.mrf.mxu1  ;;  %v1830_v19 = vadd.f32 %v1787_v17, %v1561_v1 }
 0x33a   :  { %v1833_v36 = vadd.f32 %v1826_v46, %v1564_v55  ;;  %v1831_v54 = vadd.f32 %v1800_v58, %v1562_v45  ;;  %v1555_v45 = vadd.f32 %v1541_v52, %v4179_v9  ;;  %v1554_v9 = vadd.f32 %v1541_v52, %v4187_v16 }
 0x33b   :  { %2926 = vmatmul.msk.bf16.vlgmr.msrb.gmra.mxu0 %vm1762_vm8, %v2925_v49 }
 0x33c   :  { %2927 = vmatmul.msk.bf16.vlgmr.msrb.gmra.mxu1 %vm1762_vm8, %v2925_v49  ;;  %v2880_v46 = vmul.f32 -1.442695, %v1555_v45 }
 0x33e   :  { %3288 = vpow2.f32 %v2880_v46 }
 0x33f   :  { %v1914_v61 = vpop.f32.mrf.mxu2 }
 0x340   :  { %v1789_v30 = vpop.f32.mrf.mxu0 }
 0x341   :  { %v1828_v31 = vpop.f32.mrf.mxu3  ;;  %v1802_v59 = vpop.f32.mrf.mxu1 }
 0x342   :  { %v1556_v59 = vadd.f32 %v1541_v52, %v4181_v22 }
 0x347   :  { %v2011_v29 = vpop.f32.mrf.mxu2 }
 0x348   :  { %v2030_v7 = vadd.f32 %v2011_v29, %v1931_v18  ;;  %v1886_v35 = vpop.f32.mrf.mxu0  ;;  %v1553_v29 = vadd.f32 %v1541_v52, %v4185_v50 }
 0x349   :  { %v1925_v32 = vpop.f32.mrf.mxu3  ;;  %v1899_v41 = vpop.f32.mrf.mxu1  ;;  %v1929_v56 = vadd.f32 %v1886_v35, %v1830_v19 }
 0x34a   :  { %v1932_v60 = vadd.f32 %v1925_v32, %v1833_v36  ;;  %v1930_v43 = vadd.f32 %v1899_v41, %v1831_v54  ;;  %v3289_v19 = vpop.eup %3288  ;;  %v2878_v35 = vmul.f32 -1.442695, %v1553_v29  ;;  %v2879_v41 = vmul.f32 -1.442695, %v1554_v9 }
 0x34b   :  { %v1579_v32 = vadd.f32 1.0, %v3289_v19 }
 0x34d   :  { %3290 = vrcp.f32 %v1579_v32  ;;  %vm1616_vm6 = vweird.f32 %v1579_v32 }
 0x34f   :  { %v2013_v62 = vpop.f32.mrf.mxu2 }
 0x350   :  { %v1888_v57 = vpop.f32.mrf.mxu0 }
 0x351   :  { %v1927_v23 = vpop.f32.mrf.mxu3  ;;  %v1901_v21 = vpop.f32.mrf.mxu1 }
 0x353   :  { %v3291_v22 = vpop.eup %3290 }
 0x354   :  { %v1612_v50 = vmul.f32 %v3291_v22, %v1579_v32  ;;  %vm1617_vm8 = vweird.f32 %v3291_v22 }
 0x355   :  { %vm4551_vm0 = vmor %vm1616_vm6, %vm1617_vm8 }
 0x357   :  { %v2110_v27 = vpop.f32.mrf.mxu2 }
 0x358   :  { %v4505_v48 = vadd.f32 %v2110_v27, %v2030_v7  ;;  %v1985_v5 = vpop.f32.mrf.mxu0  ;;  %v2881_v7 = vmul.f32 -1.442695, %v1556_v59 }
 0x359   :  { %v2024_v14 = vpop.f32.mrf.mxu3  ;;  %v1998_v38 = vpop.f32.mrf.mxu1  ;;  %v2028_v0 = vadd.f32 %v1985_v5, %v1929_v56 }
 0x35a   :  { %v2031_v63 = vadd.f32 %v2024_v14, %v1932_v60  ;;  %v2029_v40 = vadd.f32 %v1998_v38, %v1930_v43  ;;  %3292 = vpow2.f32 %v2881_v7 }
 0x35b   :  { %3294 = vpow2.f32 %v2878_v35 }
 0x35c   :  { %3296 = vpow2.f32 %v2879_v41 }
 0x35f   :  { %v2112_v2 = vpop.f32.mrf.mxu2 }
 0x360   :  { %v1987_v12 = vpop.f32.mrf.mxu0  ;;  %v3293_v23 = vpop.eup %3292  ;;  %v1613_v2 = vsub.f32 1.0, %v1612_v50 }
 0x361   :  { %v2026_v26 = vpop.f32.mrf.mxu3  ;;  %v2000_v33 = vpop.f32.mrf.mxu1 }
 0x362   :  { %v3295_v16 = vpop.eup %3294 }
 0x363   :  { %v3297_v38 = vpop.eup %3296 }
 0x364   :  { %v4540_v26 = vadd.f32 1.0, %v3297_v38 }
 0x366   :  { %vm1601_vm7 = vweird.f32 %v4540_v26 }
 0x367   :  { %v2187_v47 = vpop.f32.mrf.mxu2 }
 0x368   :  { %v2084_v8 = vpop.f32.mrf.mxu0  ;;  %v2206_v27 = vadd.f32 %v2187_v47, %v4505_v48 }
 0x369   :  { %v2123_v37 = vpop.f32.mrf.mxu3  ;;  %v2097_v24 = vpop.f32.mrf.mxu1  ;;  %v4509_v39 = vadd.f32 %v2084_v8, %v2028_v0 }
 0x36a   :  { %v4507_v25 = vadd.f32 %v2123_v37, %v2031_v63  ;;  %v4511_v53 = vadd.f32 %v2097_v24, %v2029_v40  ;;  %v4536_v63 = vadd.f32 1.0, %v3293_v23  ;;  %v4538_v40 = vadd.f32 1.0, %v3295_v16 }
 0x36b   :  { %v1614_v37 = vmul.f32 %v3291_v22, %v1613_v2 }
 0x36c   :  { %3298 = vrcp.f32 %v4536_v63  ;;  %vm1631_vm14 = vweird.f32 %v4536_v63  ;;  %vm1586_vm12 = vweird.f32 %v4538_v40 }
 0x36d   :  { %3300 = vrcp.f32 %v4538_v40 }
 0x36e   :  { %3302 = vrcp.f32 %v4540_v26 }
 0x36f   :  { %v2189_v51 = vpop.f32.mrf.mxu2 }
 0x370   :  { %v2086_v10 = vpop.f32.mrf.mxu0 }
 0x371   :  { %v2125_v13 = vpop.f32.mrf.mxu3  ;;  %v2099_v42 = vpop.f32.mrf.mxu1 }
 0x372   :  { %v1615_v13 = vadd.f32 %v3291_v22, %v1614_v37  ;;  %v4545_v10 = vpop.eup %3298  ;;  %v1620_v42 = vand.u32 2147483647, %v1579_v32  ;;  %v1607_v37 = vand.u32 2147483648, %v4540_v26 }
 0x373   :  { %v4547_v52 = vpop.eup %3300  ;;  %vm1632_vm10 = vweird.f32 %v4545_v10 }
 0x374   :  { %v1582_v19 = vmul.f32 %v4547_v52, %v4538_v40  ;;  %vm1621_vm5 = vcmp.eq.f32.partialorder %v1620_v42, 8.507059e+37  ;;  %vm1587_vm2 = vweird.f32 %v4547_v52  ;;  %vm4593_vm9 = vmor %vm1631_vm14, %vm1632_vm10 }
 0x375   :  { %vm4597_vm15 = vmor %vm1586_vm12, %vm1587_vm2 }
 0x377   :  { %v2296_v49 = vpop.f32.mrf.mxu2 }
 0x378   :  { %v4515_v34 = vpop.f32.mrf.mxu0  ;;  %v2315_v0 = vadd.f32 %v2296_v49, %v2206_v27  ;;  %v1622_v49 = vand.u32 2147483648, %v1579_v32 }
 0x379   :  { %v4513_v15 = vpop.f32.mrf.mxu3  ;;  %v4517_v6 = vpop.f32.mrf.mxu1  ;;  %v2204_v29 = vadd.f32 %v4515_v34, %v4509_v39 }
 0x37a   :  { %v2205_v32 = vadd.f32 %v4517_v6, %v4511_v53 }
 0x37f   :  { %v2298_v44 = vpop.f32.mrf.mxu2 }
 0x380   :  { %v2163_v28 = vpop.f32.mrf.mxu0  ;;  %v4549_v44 = vpop.eup %3302 }
 0x381   :  { %v2202_v55 = vpop.f32.mrf.mxu3  ;;  %v2176_v1 = vpop.f32.mrf.mxu1  ;;  %v1627_v28 = vmul.f32 %v4545_v10, %v4536_v63  ;;  %v1597_v59 = vmul.f32 %v4549_v44, %v4540_v26  ;;  %vm1602_vm4 = vweird.f32 %v4549_v44 }
 0x382   :  { %v1619_v1 = vsel %vm4551_vm0, %v3291_v22, %v1615_v13  ;;  %v1583_v22 = vsub.f32 1.0, %v1582_v19  ;;  %vm4609_vm11 = vmor %vm1601_vm7, %vm1602_vm4 }
 0x383   :  { %v1628_v41 = vsub.f32 1.0, %v1627_v28  ;;  %v1598_v50 = vsub.f32 1.0, %v1597_v59 }
 0x387   :  { %v2395_v18 = vpop.f32.mrf.mxu2 }
 0x388   :  { %v4522_v58 = vpop.f32.mrf.mxu0  ;;  %v2414_v12 = vadd.f32 %v2395_v18, %v2315_v0  ;;  %v1637_v0 = vand.u32 2147483648, %v4536_v63 }
 0x389   :  { %v4520_v17 = vpop.f32.mrf.mxu3  ;;  %v4524_v36 = vpop.f32.mrf.mxu1 }
 0x38a   :  { %v1638_v42 = vor.u32 1.1754944e-38, %v1637_v0 }
 0x38f   :  { %v2397_v54 = vpop.f32.mrf.mxu2 }
 0x390   :  { %v2272_v31 = vpop.f32.mrf.mxu0  ;;  %v2207_v54 = vadd.f32 %v4513_v15, %v4507_v25  ;;  %v2313_v25 = vadd.f32 %v4522_v58, %v2204_v29  ;;  %v2314_v15 = vadd.f32 %v4524_v36, %v2205_v32  ;;  %v1584_v36 = vmul.f32 %v4547_v52, %v1583_v22 }
 0x391   :  { %v2311_v61 = vpop.f32.mrf.mxu3  ;;  %v2285_v30 = vpop.f32.mrf.mxu1 }
 0x392   :  { %v1623_v61 = vor.u32 1.1754944e-38, %v1622_v49  ;;  %v2316_v7 = vadd.f32 %v4520_v17, %v2207_v54  ;;  %v1585_v38 = vadd.f32 %v4547_v52, %v1584_v36 }
 0x394   :  { %v1624_v35 = vsel %vm1621_vm5, %v1623_v61, %v1619_v1 }
 0x397   :  { %v2494_v60 = vpop.f32.mrf.mxu2 }
 0x398   :  { %v4531_v43 = vpop.f32.mrf.mxu0  ;;  %v2513_v33 = vadd.f32 %v2494_v60, %v2414_v12  ;;  %v1635_v12 = vand.u32 2147483647, %v4536_v63 }
 0x399   :  { %v4529_v56 = vpop.f32.mrf.mxu3  ;;  %v4533_v62 = vpop.f32.mrf.mxu1  ;;  %v2412_v39 = vadd.f32 %v4531_v43, %v2313_v25 }
 0x39a   :  { %v2415_v23 = vadd.f32 %v4529_v56, %v2316_v7  ;;  %v2413_v34 = vadd.f32 %v4533_v62, %v2314_v15  ;;  %v1592_v62 = vand.u32 2147483648, %v4538_v40  ;;  %vm1636_vm13 = vcmp.eq.f32.partialorder %v1635_v12, 8.507059e+37 }
 0x39c   :  { %v1593_v1 = vor.u32 1.1754944e-38, %v1592_v62 }
 0x39f   :  { %v2496_v57 = vpop.f32.mrf.mxu2 }
 0x3a0   :  { %v2371_v14 = vpop.f32.mrf.mxu0 }
 0x3a1   :  { %v2410_v21 = vpop.f32.mrf.mxu3  ;;  %v2384_v5 = vpop.f32.mrf.mxu1 }
 0x3a2   :  { %v1629_v21 = vmul.f32 %v4545_v10, %v1628_v41  ;;  %v1599_v5 = vmul.f32 %v4549_v44, %v1598_v50 }
 0x3a4   :  { %v1600_v2 = vadd.f32 %v4549_v44, %v1599_v5 }
 0x3a7   :  { %v2593_v8 = vpop.f32.mrf.mxu2 }
 0x3a8   :  { %v2612_v47 = vadd.f32 %v2593_v8, %v2513_v33  ;;  %v2468_v24 = vpop.f32.mrf.mxu0  ;;  %v1590_v33 = vand.u32 2147483647, %v4538_v40 }
 0x3a9   :  { %v2507_v48 = vpop.f32.mrf.mxu3  ;;  %v2481_v51 = vpop.f32.mrf.mxu1  ;;  %v2511_v17 = vadd.f32 %v2468_v24, %v2412_v39 }
 0x3aa   :  { %3304 = vtanh.f32 %v2612_v47  ;;  %v2514_v6 = vadd.f32 %v2507_v48, %v2415_v23  ;;  %v2512_v57 = vadd.f32 %v2481_v51, %v2413_v34  ;;  %v1605_v47 = vand.u32 2147483647, %v4540_v26 }
 0x3ab   :  { %v1589_v51 = vsel %vm4597_vm15, %v4547_v52, %v1585_v38  ;;  %v1604_v26 = vsel %vm4609_vm11, %v4549_v44, %v1600_v2  ;;  %vm1591_vm1 = vcmp.eq.f32.partialorder %v1590_v33, 8.507059e+37 }
 0x3ac   :  { %v1594_v19 = vsel %vm1591_vm1, %v1593_v1, %v1589_v51  ;;  %vm1606_vm3 = vcmp.eq.f32.partialorder %v1605_v47, 8.507059e+37 }
 0x3af   :  { %v2595_v46 = vpop.f32.mrf.mxu2 }
 0x3b0   :  { %v3305_v18 = vpop.eup %3304  ;;  %v2470_v31 = vpop.f32.mrf.mxu0  ;;  %v1608_v46 = vor.u32 1.1754944e-38, %v1607_v37 }
 0x3b1   :  { %v2509_v45 = vpop.f32.mrf.mxu3  ;;  %v2483_v30 = vpop.f32.mrf.mxu1  ;;  %v2620_v9 = vsub.f32 %v3305_v18, %v3402_v4 }
 0x3b2   :  { %v1609_v30 = vsel %vm1606_vm3, %v1608_v46, %v1604_v26 }
 0x3b3   :  { %v2624_v60 = vmul.f32 %v2620_v9, %v1624_v35 }
 0x3b5   :  { %v2628_v53 = vadd.f32 %v2624_v60, %v3402_v4  ;;  %v1630_v4 = vadd.f32 %v4545_v10, %v1629_v21 }
 0x3b7   :  { %2632 = vst [vmem:[#allocation3 + $0x10] sm:$0xff] %v2628_v53  ;;  %v1634_v63 = vsel %vm4593_vm9, %v4545_v10, %v1630_v4 }
 0x3b8   :  { %v2567_v16 = vpop.f32.mrf.mxu0  ;;  %v1639_v18 = vsel %vm1636_vm13, %v1638_v42, %v1634_v63 }
 0x3b9   :  { %v2606_v58 = vpop.f32.mrf.mxu3  ;;  %v2580_v27 = vpop.f32.mrf.mxu1  ;;  %v2610_v56 = vadd.f32 %v2567_v16, %v2511_v17 }
 0x3ba   :  { %v2613_v14 = vadd.f32 %v2606_v58, %v2514_v6  ;;  %v2611_v43 = vadd.f32 %v2580_v27, %v2512_v57 }
 0x3bc   :  { %3306 = vtanh.f32 %v2613_v14 }
 0x3bd   :  { %3308 = vtanh.f32 %v2610_v56 }
 0x3be   :  { %3310 = vtanh.f32 %v2611_v43 }
 0x3c0   :  { %v2569_v49 = vpop.f32.mrf.mxu0 }
 0x3c1   :  { %v2608_v24 = vpop.f32.mrf.mxu3  ;;  %v2582_v55 = vpop.f32.mrf.mxu1 }
 0x3c2   :  { %v3307_v40 = vpop.eup %3306 }
 0x3c3   :  { %v3309_v28 = vpop.eup %3308  ;;  %v2621_v10 = vsub.f32 %v3307_v40, %v3408_v11 }
 0x3c4   :  { %v3311_v45 = vpop.eup %3310  ;;  %v2618_v52 = vsub.f32 %v3309_v28, %v3433_v20 }
 0x3c5   :  { %v2619_v54 = vsub.f32 %v3311_v45, %v3400_v3  ;;  %v2625_v61 = vmul.f32 %v2621_v10, %v1639_v18 }
 0x3c6   :  { %v2622_v31 = vmul.f32 %v2618_v52, %v1594_v19 }
 0x3c7   :  { %v2623_v44 = vmul.f32 %v2619_v54, %v1609_v30  ;;  %v2629_v59 = vadd.f32 %v2625_v61, %v3408_v11 }
 0x3c8   :  { %v2626_v29 = vadd.f32 %v2622_v31, %v3433_v20 }
 0x3c9   :  { %v2627_v32 = vadd.f32 %v2623_v44, %v3400_v3  ;;  %2633 = vst [vmem:[#allocation3 + $0x18] sm:$0xff] %v2629_v59 }
 0x3ca   :  { %2630 = vst [vmem:[#allocation3] sm:$0xff] %v2626_v29 }
 0x3cb   :  { %2631 = vst [vmem:[#allocation3 + $0x8] sm:$0xff] %v2627_v32 }
 0x3cc   :  { %2644 = dma.vmem_to_hbm [thread:$0]  %s2640_s17, 512, %s2642_s20, [#allocation4]  }
 0x3cd   :  { %3348 = dma.done.wait [#allocation4], 512  }
 0x3ce   :  { %3349 = vsyncadd [#allocation4], 4294966784 }
 0x3cf   :  { %2649 = vsyncpa [#allocation4], 1 }

</bundles_post_ra>
